<compile_context>
chip_gen: v7x
topology: tpu7x:2x2x1
jax: 0.10.0
libtpu: 0.0.40
codegen_flags: <defaults>
</compile_context>

<pallas_src>
import functools

import jax
import jax.numpy as jnp
from jax.experimental import pallas as pl
from jax.experimental.pallas import tpu as pltpu

NEG_SLOPE = 0.2
BN_EPS = 1e-5
KS = 4                       # all ConvTranspose2d layers use 4x4 kernels
LANE = 128
VMEM_LIMIT = 40 * 1024 * 1024   # < v7x physical VMEM (64 MiB), headroom for 2x buffering
TILE_TARGET = 512               # target rows per tile (multiple of 256 for v6e/v7x MXU)


# ------------------------------ small helpers ------------------------------ #

def _round_up(n, m=LANE):
    return ((n + m - 1) // m) * m


def _pick_tile(m, target=TILE_TARGET):
    """Largest row tile <= target that divides m and is a multiple of 8."""
    if m <= target:
        return m
    t = (target // 8) * 8
    while t >= 8:
        if m % t == 0:
            return t
        t -= 8
    return m  # fallback: single block


def _compiler_params():
    return pltpu.CompilerParams(
        dimension_semantics=("parallel", "parallel"),
        vmem_limit_bytes=VMEM_LIMIT,
    )


def _pad_last(a, cp):
    pad = [(0, 0)] * (a.ndim - 1) + [(0, cp - a.shape[-1])]
    return jnp.pad(a, pad)


# ----------------------------- Pallas kernels ------------------------------ #

def _matmul_bias_stats_kernel(x_ref, w_ref, b_ref, y_ref, stats_ref):
    """y = x @ w + bias (f32 acc) + per-tile [sum; sum_of_squares] for BatchNorm.

    x_ref: (1, tm, K) bf16; w_ref: (1, K, Cp) bf16; b_ref: (1, Cp) f32
    y_ref: (1, tm, Cp) f32;  stats_ref: (1, 1, 2, Cp) f32
    """
    acc = jnp.dot(x_ref[0], w_ref[0], preferred_element_type=jnp.float32)
    acc = acc + b_ref[...]
    y_ref[...] = acc[None]
    s1 = jnp.sum(acc, axis=0, keepdims=True)          # (1, Cp)
    s2 = jnp.sum(acc * acc, axis=0, keepdims=True)    # (1, Cp)  (E[x^2] path)
    stats_ref[...] = jnp.concatenate([s1, s2], axis=0)[None, None]


def _bn_lrelu_kernel(y_ref, scale_ref, shift_ref, o_ref):
    """Apply precomputed BN scale/shift then LeakyReLU(0.2) (single vmax)."""
    z = y_ref[0] * scale_ref[...] + shift_ref[...]
    o_ref[...] = jnp.maximum(z, NEG_SLOPE * z).astype(o_ref.dtype)[None]


def _matmul_bias_sigmoid_kernel(x_ref, w_ref, b_ref, o_ref):
    """Final ConvTranspose2d (as matmul) + bias + Sigmoid (EUP path)."""
    acc = jnp.dot(x_ref[0], w_ref[0], preferred_element_type=jnp.float32)
    acc = acc + b_ref[...]
    o_ref[...] = jax.nn.sigmoid(acc)[None]


# ------------------------------ layer drivers ------------------------------ #

def _bn_layer_call(patches, lp):
    """patches: (G, Mp, K) bf16 -> normalized+LeakyReLU activation (G, Mp, Cp) bf16."""
    g, mp, k = patches.shape
    cp = lp["w"].shape[-1]
    tm = _pick_tile(mp)
    mt = mp // tm
    grid = (g, mt)

    y, stats = pl.pallas_call(
        _matmul_bias_stats_kernel,
        grid=grid,
        in_specs=[
            pl.BlockSpec((1, tm, k), lambda gi, mi: (gi, mi, 0)),
            pl.BlockSpec((1, k, cp), lambda gi, mi: (gi, 0, 0)),
            pl.BlockSpec((1, cp), lambda gi, mi: (0, 0)),
        ],
        out_specs=[
            pl.BlockSpec((1, tm, cp), lambda gi, mi: (gi, mi, 0)),
            pl.BlockSpec((1, 1, 2, cp), lambda gi, mi: (gi, mi, 0, 0)),
        ],
        out_shape=[
            jax.ShapeDtypeStruct((g, mp, cp), jnp.float32),
            jax.ShapeDtypeStruct((g, mt, 2, cp), jnp.float32),
        ],
        compiler_params=_compiler_params(),
    )(patches, lp["w"], lp["bias"])

    # Tiny cross-tile reduction in JAX: global batch stats (biased var, eps=1e-5),
    # folded into per-channel scale/shift.
    n = float(g * mp)
    tot = jnp.sum(stats, axis=(0, 1))                      # (2, Cp)
    mean = tot[0] / n
    var = jnp.maximum(tot[1] / n - mean * mean, 0.0)
    inv = jax.lax.rsqrt(var + BN_EPS)
    scale = (lp["gamma"] * inv).reshape(1, cp)
    shift = (lp["beta"] - lp["gamma"] * inv * mean).reshape(1, cp)

    out = pl.pallas_call(
        _bn_lrelu_kernel,
        grid=grid,
        in_specs=[
            pl.BlockSpec((1, tm, cp), lambda gi, mi: (gi, mi, 0)),
            pl.BlockSpec((1, cp), lambda gi, mi: (0, 0)),
            pl.BlockSpec((1, cp), lambda gi, mi: (0, 0)),
        ],
        out_specs=pl.BlockSpec((1, tm, cp), lambda gi, mi: (gi, mi, 0)),
        out_shape=jax.ShapeDtypeStruct((g, mp, cp), jnp.bfloat16),
        compiler_params=_compiler_params(),
    )(y, scale, shift)
    return out


def _sigmoid_layer_call(patches, lp):
    g, mp, k = patches.shape
    cp = lp["w"].shape[-1]
    tm = _pick_tile(mp)
    mt = mp // tm
    return pl.pallas_call(
        _matmul_bias_sigmoid_kernel,
        grid=(g, mt),
        in_specs=[
            pl.BlockSpec((1, tm, k), lambda gi, mi: (gi, mi, 0)),
            pl.BlockSpec((1, k, cp), lambda gi, mi: (gi, 0, 0)),
            pl.BlockSpec((1, cp), lambda gi, mi: (0, 0)),
        ],
        out_specs=pl.BlockSpec((1, tm, cp), lambda gi, mi: (gi, mi, 0)),
        out_shape=jax.ShapeDtypeStruct((g, mp, cp), jnp.float32),
        compiler_params=_compiler_params(),
    )(patches, lp["w"], lp["bias"])


# ------------------------------- JAX glue ---------------------------------- #

def _parity_patches(xs):
    """Sub-pixel im2col for ConvTranspose2d(k=4, stride=2, pad=1).

    xs: list of NHWC activations sharing (B, H, W). Returns (4, B*H*W, 4*sum(Cin))
    in bf16. Per tap, channel order matches torch.cat(xs, dim=1); parity order is
    p = 2*po + pw (output row parity major).
    """
    b, h, w, _ = xs[0].shape
    xps = [jnp.pad(x.astype(jnp.bfloat16), ((0, 0), (1, 1), (1, 1), (0, 0))) for x in xs]
    groups = []
    for po in range(2):
        for pw in range(2):
            taps = []
            for ty in range(2):
                for tx in range(2):
                    for xp in xps:
                        taps.append(xp[:, po + ty:po + ty + h, pw + tx:pw + tx + w, :])
            groups.append(jnp.concatenate(taps, axis=-1).reshape(b * h * w, -1))
    return jnp.stack(groups, axis=0)


def _interleave_parities(y, b, h, w, cout):
    """(4, B*H*W, Cp) parity-major -> (B, 2H, 2W, cout) NHWC."""
    y = y[:, :, :cout].reshape(2, 2, b, h, w, cout)
    y = jnp.transpose(y, (2, 3, 0, 4, 1, 5))
    return y.reshape(b, 2 * h, 2 * w, cout)


def _upc1_layer(x_nhwc, lp, cout):
    """ConvTranspose2d(dim, nf*8, 4, 1, 0) + BN + LeakyReLU on a 1x1 input (tiny)."""
    b, _, _, dim = x_nhwc.shape
    xp = jnp.pad(x_nhwc.astype(jnp.bfloat16), ((0, 0), (3, 3), (3, 3), (0, 0)))
    cols = [xp[:, ky:ky + KS, kx:kx + KS, :] for ky in range(KS) for kx in range(KS)]
    patches = jnp.concatenate(cols, axis=-1).reshape(1, b * KS * KS, KS * KS * dim)
    out = _bn_layer_call(patches, lp)                       # (1, B*16, Cp) bf16
    return out[0, :, :cout].reshape(b, KS, KS, cout)


def _upconv2x_bn_layer(xs, lp, cout):
    b, h, w, _ = xs[0].shape
    out = _bn_layer_call(_parity_patches(xs), lp)
    return _interleave_parities(out, b, h, w, cout)


def _upconv2x_sigmoid_layer(xs, lp, cout):
    b, h, w, _ = xs[0].shape
    out = _sigmoid_layer_call(_parity_patches(xs), lp)
    return _interleave_parities(out, b, h, w, cout)


def dcgan_decoder_forward(vec, skips, prep, *, couts):
    """vec: (B, dim); skips: list of 4 NCHW arrays (PyTorch order). Returns NCHW f32."""
    b = vec.shape[0]
    x = vec.reshape(b, 1, 1, -1)                            # NHWC view of vec.view(-1,dim,1,1)
    to_nhwc = lambda a: jnp.transpose(a, (0, 2, 3, 1))

    d1 = _upc1_layer(x, prep["upc1"], couts["upc1"])                                # (B,4,4,8nf)
    d2 = _upconv2x_bn_layer([d1, to_nhwc(skips[3])], prep["upc2"], couts["upc2"])   # (B,8,8,4nf)
    d3 = _upconv2x_bn_layer([d2, to_nhwc(skips[2])], prep["upc3"], couts["upc3"])   # (B,16,16,2nf)
    d4 = _upconv2x_bn_layer([d3, to_nhwc(skips[1])], prep["upc4"], couts["upc4"])   # (B,32,32,nf)
    out = _upconv2x_sigmoid_layer([d4, to_nhwc(skips[0])], prep["upc5"], couts["upc5"])  # (B,64,64,nc)
    return jnp.transpose(out, (0, 3, 1, 2)).astype(jnp.float32)                     # NCHW


# -------------------------- parameter preparation -------------------------- #

def prepare_params(params):
    """Precompute flipped/reshaped bf16 weight matrices + padded channel vectors (once)."""
    prep, couts = {}, {}

    # upc1 (stride 1, pad 0): full 4x4 im2col weight, tap-major / channel-minor.
    p = params["upc1"]
    w = p["weight"]                                          # (Cin, Cout, 4, 4)
    cin, cout = w.shape[0], w.shape[1]
    cp = _round_up(cout)
    wm = jnp.transpose(w[:, :, ::-1, ::-1], (2, 3, 0, 1)).reshape(KS * KS * cin, cout)
    prep["upc1"] = {
        "w": _pad_last(wm, cp).astype(jnp.bfloat16)[None],               # (1, 16*Cin, Cp)
        "bias": _pad_last(p["bias"][None], cp).astype(jnp.float32),      # (1, Cp)
        "gamma": _pad_last(p["gamma"], cp).astype(jnp.float32),          # (Cp,)
        "beta": _pad_last(p["beta"], cp).astype(jnp.float32),            # (Cp,)
    }
    couts["upc1"] = cout

    # Stride-2 layers: 4 parity sub-kernels, each (4*Cin, Cp).
    for name in ("upc2", "upc3", "upc4", "upc5"):
        p = params[name]
        w = p["weight"]
        cin, cout = w.shape[0], w.shape[1]
        cp = _round_up(cout)
        mats = []
        for po in range(2):
            for pw in range(2):
                taps = [w[:, :, 3 - (2 * ty + po), 3 - (2 * tx + pw)]
                        for ty in range(2) for tx in range(2)]
                mats.append(jnp.concatenate(taps, axis=0))               # (4*Cin, Cout)
        wm = jnp.stack(mats, axis=0)                                     # (4, 4*Cin, Cout)
        lp = {
            "w": _pad_last(wm, cp).astype(jnp.bfloat16),
            "bias": _pad_last(p["bias"][None], cp).astype(jnp.float32),
        }
        if "gamma" in p:
            lp["gamma"] = _pad_last(p["gamma"], cp).astype(jnp.float32)
            lp["beta"] = _pad_last(p["beta"], cp).astype(jnp.float32)
        prep[name] = lp
        couts[name] = cout
    return prep, couts


def init_params(key, dim, nf, nc):
    """Deterministic synthetic parameters (shapes follow dcgan_decoder.__init__)."""
    def conv_t(k, cin, cout):
        k1, k2 = jax.random.split(k)
        w = 0.05 * jax.random.normal(k1, (cin, cout, KS, KS), jnp.float32)
        bias = 0.05 * jax.random.normal(k2, (cout,), jnp.float32)
        return w, bias

    def bn(k, c):
        k1, k2 = jax.random.split(k)
        return (1.0 + 0.1 * jax.random.normal(k1, (c,), jnp.float32),
                0.1 * jax.random.normal(k2, (c,), jnp.float32))

    specs = [("upc1", dim, nf * 8), ("upc2", nf * 8 * 2, nf * 4),
             ("upc3", nf * 4 * 2, nf * 2), ("upc4", nf * 2 * 2, nf),
             ("upc5", nf * 2, nc)]
    keys = jax.random.split(key, 2 * len(specs))
    params = {}
    for i, (name, cin, cout) in enumerate(specs):
        w, bias = conv_t(keys[2 * i], cin, cout)
        layer = {"weight": w, "bias": bias}
        if name != "upc5":  # upc5 has no BatchNorm (Sigmoid head)
            g, be = bn(keys[2 * i + 1], cout)
            layer["gamma"], layer["beta"] = g, be
        params[name] = layer
    return params


# --------------------------- pure-JAX reference ----------------------------- #

def _ref_conv_transpose(x, w, b, stride, pad):
    rhs = jnp.transpose(w[:, :, ::-1, ::-1], (1, 0, 2, 3))   # (Cout, Cin, 4, 4)
    pp = KS - 1 - pad
    y = jax.lax.conv_general_dilated(
        x, rhs, window_strides=(1, 1), padding=((pp, pp), (pp, pp)),
        lhs_dilation=(stride, stride),
        dimension_numbers=("NCHW", "OIHW", "NCHW"))
    return y + b.reshape(1, -1, 1, 1)


def _ref_bn_lrelu(x, gamma, beta):
    mean = jnp.mean(x, axis=(0, 2, 3), keepdims=True)
    var = jnp.mean(jnp.square(x - mean), axis=(0, 2, 3), keepdims=True)
    y = (x - mean) * jax.lax.rsqrt(var + BN_EPS)
    y = y * gamma.reshape(1, -1, 1, 1) + beta.reshape(1, -1, 1, 1)
    return jnp.where(y > 0, y, NEG_SLOPE * y)


def reference_forward(vec, skips, params):
    x = vec.reshape(vec.shape[0], -1, 1, 1)

    def bn_layer(x, p, stride, pad):
        y = _ref_conv_transpose(x, p["weight"], p["bias"], stride, pad)
        return _ref_bn_lrelu(y, p["gamma"], p["beta"])

    d1 = bn_layer(x, params["upc1"], 1, 0)
    d2 = bn_layer(jnp.concatenate([d1, skips[3]], 1), params["upc2"], 2, 1)
    d3 = bn_layer(jnp.concatenate([d2, skips[2]], 1), params["upc3"], 2, 1)
    d4 = bn_layer(jnp.concatenate([d3, skips[1]], 1), params["upc4"], 2, 1)
    y = _ref_conv_transpose(jnp.concatenate([d4, skips[0]], 1),
                            params["upc5"]["weight"], params["upc5"]["bias"], 2, 1)
    return jax.nn.sigmoid(y)


# ----------------------------------- main ----------------------------------- #

if __name__ == "__main__":
    # Small test config (nf scaled down from 64 -> 8 to keep shapes small).
    B, DIM, NF, NC = 2, 16, 8, 1
    key = jax.random.PRNGKey(0)
    kp, kv, k0, k1, k2, k3 = jax.random.split(key, 6)
    params = init_params(kp, DIM, NF, NC)
    prep, couts = prepare_params(params)   # one-time weight flip/reshape/pad + bf16

    vec = jax.random.normal(kv, (B, DIM), jnp.float32)
    skips = [
        jax.random.normal(k0, (B, NF, 32, 32), jnp.float32),      # skip[0]
        jax.random.normal(k1, (B, NF * 2, 16, 16), jnp.float32),  # skip[1]
        jax.random.normal(k2, (B, NF * 4, 8, 8), jnp.float32),    # skip[2]
        jax.random.normal(k3, (B, NF * 8, 4, 4), jnp.float32),    # skip[3]
    ]

    fwd = jax.jit(functools.partial(dcgan_decoder_forward, couts=couts))
    out = jax.block_until_ready(fwd(vec, skips, prep))

    assert out.shape == (B, NC, 64, 64), out.shape
    assert bool(jnp.all(jnp.isfinite(out)))
    assert bool(jnp.all((out >= 0.0) & (out <= 1.0)))   # sigmoid output range

    # Numerical check against a pure-JAX f32 reference (bf16 matmul tolerance).
    ref = reference_forward(vec, skips, params)
    err = float(jnp.max(jnp.abs(out - ref)))
    assert err < 0.1, f"max abs diff vs reference = {err}"
    print("KERNEL_OK")
</pallas_src>

<mosaic_0001>
module attributes {stable_mosaic.version = 11 : i64} {
  func.func @_matmul_bias_stats_kernel(%arg0: i32, %arg1: i32, %arg2: memref<1x32x256xbf16, #tpu.memory_space<vmem>>, %arg3: memref<1x256x128xbf16, #tpu.memory_space<vmem>>, %arg4: memref<1x128xf32, #tpu.memory_space<vmem>>, %arg5: memref<1x32x128xf32, #tpu.memory_space<vmem>>, %arg6: memref<1x1x2x128xf32, #tpu.memory_space<vmem>>) attributes {dimension_semantics = [#tpu.dimension_semantics<parallel>, #tpu.dimension_semantics<parallel>], iteration_bounds = array<i64: 1, 1>, scalar_prefetch = 0 : i64, scratch_operands = 0 : i64, tpu.core_type = #tpu.core_type<tc>, window_params = [{transform_indices = @transform_0, window_bounds = array<i64: 1, 32, 256>}, {transform_indices = @transform_1, window_bounds = array<i64: 1, 256, 128>}, {pipeline_mode = #tpu.pipeline_mode<synchronous>, transform_indices = @transform_2, window_bounds = array<i64: 1, 128>}, {transform_indices = @transform_3, window_bounds = array<i64: 1, 32, 128>}, {transform_indices = @transform_4, window_bounds = array<i64: 1, 1, 2, 128>}]} {
    %c0 = arith.constant 0 : index
    %c0_0 = arith.constant 0 : index
    %c0_1 = arith.constant 0 : index
    %0 = vector.load %arg2[%c0, %c0_0, %c0_1] : memref<1x32x256xbf16, #tpu.memory_space<vmem>>, vector<1x32x256xbf16>
    %1 = vector.shape_cast %0 : vector<1x32x256xbf16> to vector<32x256xbf16>
    %c0_2 = arith.constant 0 : index
    %c0_3 = arith.constant 0 : index
    %c0_4 = arith.constant 0 : index
    %2 = vector.load %arg3[%c0_2, %c0_3, %c0_4] : memref<1x256x128xbf16, #tpu.memory_space<vmem>>, vector<1x256x128xbf16>
    %3 = vector.shape_cast %2 : vector<1x256x128xbf16> to vector<256x128xbf16>
    %cst = arith.constant dense<0.000000e+00> : vector<32x128xf32>
    %4 = tpu.matmul %1, %3, %cst {dimension_numbers = #tpu.dot_dimension_numbers<[1], [0], [0], [1], [0, 0, 1, 1], [], []>} : vector<32x256xbf16>, vector<256x128xbf16>, vector<32x128xf32> -> vector<32x128xf32>
    %c0_5 = arith.constant 0 : index
    %c0_6 = arith.constant 0 : index
    %5 = vector.load %arg4[%c0_5, %c0_6] : memref<1x128xf32, #tpu.memory_space<vmem>>, vector<1x128xf32>
    %6 = vector.broadcast %5 : vector<1x128xf32> to vector<32x128xf32>
    %7 = arith.addf %4, %6 : vector<32x128xf32>
    %8 = vector.shape_cast %7 : vector<32x128xf32> to vector<1x32x128xf32>
    %c0_7 = arith.constant 0 : index
    %c0_8 = arith.constant 0 : index
    %c0_9 = arith.constant 0 : index
    %9 = vector.load %arg5[%c0_7, %c0_8, %c0_9] : memref<1x32x128xf32, #tpu.memory_space<vmem>>, vector<1x32x128xf32>
    tpu.vector_store %arg5[%c0_7, %c0_8, %c0_9], %8 {strides = array<i32>} : memref<1x32x128xf32, #tpu.memory_space<vmem>>, vector<1x32x128xf32>,
    %cst_10 = arith.constant dense<0.000000e+00> : vector<128xf32>
    %10 = vector.multi_reduction <add>, %7, %cst_10 [0] : vector<32x128xf32> to vector<128xf32>
    %11 = vector.shape_cast %10 : vector<128xf32> to vector<1x128xf32>
    %12 = arith.mulf %7, %7 : vector<32x128xf32>
    %cst_11 = arith.constant dense<0.000000e+00> : vector<128xf32>
    %13 = vector.multi_reduction <add>, %12, %cst_11 [0] : vector<32x128xf32> to vector<128xf32>
    %14 = vector.shape_cast %13 : vector<128xf32> to vector<1x128xf32>
    %15 = tpu.concatenate %11, %14 in 0 : vector<1x128xf32>, vector<1x128xf32> -> vector<2x128xf32>
    %16 = vector.shape_cast %15 : vector<2x128xf32> to vector<1x1x2x128xf32>
    %c0_12 = arith.constant 0 : index
    %c0_13 = arith.constant 0 : index
    %c0_14 = arith.constant 0 : index
    %c0_15 = arith.constant 0 : index
    %17 = vector.load %arg6[%c0_12, %c0_13, %c0_14, %c0_15] : memref<1x1x2x128xf32, #tpu.memory_space<vmem>>, vector<1x1x2x128xf32>
    tpu.vector_store %arg6[%c0_12, %c0_13, %c0_14, %c0_15], %16 {strides = array<i32>} : memref<1x1x2x128xf32, #tpu.memory_space<vmem>>, vector<1x1x2x128xf32>,
    return
  }
  func.func @transform_0(%arg0: i32, %arg1: i32) -> (i32, i32, i32) {
    %c0_i32 = arith.constant 0 : i32
    %c0_i32_0 = arith.constant 0 : i32
    return %arg0, %arg1, %c0_i32 : i32, i32, i32
  }
  func.func @transform_1(%arg0: i32, %arg1: i32) -> (i32, i32, i32) {
    %c0_i32 = arith.constant 0 : i32
    %c0_i32_0 = arith.constant 0 : i32
    %c0_i32_1 = arith.constant 0 : i32
    return %arg0, %c0_i32, %c0_i32_0 : i32, i32, i32
  }
  func.func @transform_2(%arg0: i32, %arg1: i32) -> (i32, i32) {
    %c0_i32 = arith.constant 0 : i32
    %c0_i32_0 = arith.constant 0 : i32
    %c0_i32_1 = arith.constant 0 : i32
    return %c0_i32, %c0_i32_0 : i32, i32
  }
  func.func @transform_3(%arg0: i32, %arg1: i32) -> (i32, i32, i32) {
    %c0_i32 = arith.constant 0 : i32
    %c0_i32_0 = arith.constant 0 : i32
    return %arg0, %arg1, %c0_i32 : i32, i32, i32
  }
  func.func @transform_4(%arg0: i32, %arg1: i32) -> (i32, i32, i32, i32) {
    %c0_i32 = arith.constant 0 : i32
    %c0_i32_0 = arith.constant 0 : i32
    %c0_i32_1 = arith.constant 0 : i32
    return %arg0, %arg1, %c0_i32, %c0_i32_0 : i32, i32, i32, i32
  }
}

module attributes {stable_mosaic.version = 11 : i64} {
  func.func @_bn_lrelu_kernel(%arg0: i32, %arg1: i32, %arg2: memref<1x32x128xf32, #tpu.memory_space<vmem>>, %arg3: memref<1x128xf32, #tpu.memory_space<vmem>>, %arg4: memref<1x128xf32, #tpu.memory_space<vmem>>, %arg5: memref<1x32x128xbf16, #tpu.memory_space<vmem>>) attributes {dimension_semantics = [#tpu.dimension_semantics<parallel>, #tpu.dimension_semantics<parallel>], iteration_bounds = array<i64: 1, 1>, scalar_prefetch = 0 : i64, scratch_operands = 0 : i64, tpu.core_type = #tpu.core_type<tc>, window_params = [{transform_indices = @transform_0, window_bounds = array<i64: 1, 32, 128>}, {pipeline_mode = #tpu.pipeline_mode<synchronous>, transform_indices = @transform_1, window_bounds = array<i64: 1, 128>}, {pipeline_mode = #tpu.pipeline_mode<synchronous>, transform_indices = @transform_2, window_bounds = array<i64: 1, 128>}, {transform_indices = @transform_3, window_bounds = array<i64: 1, 32, 128>}]} {
    %c0 = arith.constant 0 : index
    %c0_0 = arith.constant 0 : index
    %c0_1 = arith.constant 0 : index
    %0 = vector.load %arg2[%c0, %c0_0, %c0_1] : memref<1x32x128xf32, #tpu.memory_space<vmem>>, vector<1x32x128xf32>
    %1 = vector.shape_cast %0 : vector<1x32x128xf32> to vector<32x128xf32>
    %c0_2 = arith.constant 0 : index
    %c0_3 = arith.constant 0 : index
    %2 = vector.load %arg3[%c0_2, %c0_3] : memref<1x128xf32, #tpu.memory_space<vmem>>, vector<1x128xf32>
    %3 = vector.broadcast %2 : vector<1x128xf32> to vector<32x128xf32>
    %4 = arith.mulf %1, %3 : vector<32x128xf32>
    %c0_4 = arith.constant 0 : index
    %c0_5 = arith.constant 0 : index
    %5 = vector.load %arg4[%c0_4, %c0_5] : memref<1x128xf32, #tpu.memory_space<vmem>>, vector<1x128xf32>
    %6 = vector.broadcast %5 : vector<1x128xf32> to vector<32x128xf32>
    %7 = arith.addf %4, %6 : vector<32x128xf32>
    %cst = arith.constant 2.000000e-01 : f32
    %8 = vector.broadcast %cst : f32 to vector<32x128xf32>
    %9 = arith.mulf %8, %7 : vector<32x128xf32>
    %10 = arith.maximumf %7, %9 : vector<32x128xf32>
    %11 = arith.truncf %10 : vector<32x128xf32> to vector<32x128xbf16>
    %12 = vector.shape_cast %11 : vector<32x128xbf16> to vector<1x32x128xbf16>
    %c0_6 = arith.constant 0 : index
    %c0_7 = arith.constant 0 : index
    %c0_8 = arith.constant 0 : index
    %13 = vector.load %arg5[%c0_6, %c0_7, %c0_8] : memref<1x32x128xbf16, #tpu.memory_space<vmem>>, vector<1x32x128xbf16>
    tpu.vector_store %arg5[%c0_6, %c0_7, %c0_8], %12 {strides = array<i32>} : memref<1x32x128xbf16, #tpu.memory_space<vmem>>, vector<1x32x128xbf16>,
    return
  }
  func.func @transform_0(%arg0: i32, %arg1: i32) -> (i32, i32, i32) {
    %c0_i32 = arith.constant 0 : i32
    %c0_i32_0 = arith.constant 0 : i32
    return %arg0, %arg1, %c0_i32 : i32, i32, i32
  }
  func.func @transform_1(%arg0: i32, %arg1: i32) -> (i32, i32) {
    %c0_i32 = arith.constant 0 : i32
    %c0_i32_0 = arith.constant 0 : i32
    %c0_i32_1 = arith.constant 0 : i32
    return %c0_i32, %c0_i32_0 : i32, i32
  }
  func.func @transform_2(%arg0: i32, %arg1: i32) -> (i32, i32) {
    %c0_i32 = arith.constant 0 : i32
    %c0_i32_0 = arith.constant 0 : i32
    %c0_i32_1 = arith.constant 0 : i32
    return %c0_i32, %c0_i32_0 : i32, i32
  }
  func.func @transform_3(%arg0: i32, %arg1: i32) -> (i32, i32, i32) {
    %c0_i32 = arith.constant 0 : i32
    %c0_i32_0 = arith.constant 0 : i32
    return %arg0, %arg1, %c0_i32 : i32, i32, i32
  }
}

module attributes {stable_mosaic.version = 11 : i64} {
  func.func @_matmul_bias_stats_kernel(%arg0: i32, %arg1: i32, %arg2: memref<1x32x512xbf16, #tpu.memory_space<vmem>>, %arg3: memref<1x512x128xbf16, #tpu.memory_space<vmem>>, %arg4: memref<1x128xf32, #tpu.memory_space<vmem>>, %arg5: memref<1x32x128xf32, #tpu.memory_space<vmem>>, %arg6: memref<1x1x2x128xf32, #tpu.memory_space<vmem>>) attributes {dimension_semantics = [#tpu.dimension_semantics<parallel>, #tpu.dimension_semantics<parallel>], iteration_bounds = array<i64: 4, 1>, scalar_prefetch = 0 : i64, scratch_operands = 0 : i64, tpu.core_type = #tpu.core_type<tc>, window_params = [{transform_indices = @transform_0, window_bounds = array<i64: 1, 32, 512>}, {transform_indices = @transform_1, window_bounds = array<i64: 1, 512, 128>}, {pipeline_mode = #tpu.pipeline_mode<synchronous>, transform_indices = @transform_2, window_bounds = array<i64: 1, 128>}, {transform_indices = @transform_3, window_bounds = array<i64: 1, 32, 128>}, {transform_indices = @transform_4, window_bounds = array<i64: 1, 1, 2, 128>}]} {
    %c0 = arith.constant 0 : index
    %c0_0 = arith.constant 0 : index
    %c0_1 = arith.constant 0 : index
    %0 = vector.load %arg2[%c0, %c0_0, %c0_1] : memref<1x32x512xbf16, #tpu.memory_space<vmem>>, vector<1x32x512xbf16>
    %1 = vector.shape_cast %0 : vector<1x32x512xbf16> to vector<32x512xbf16>
    %c0_2 = arith.constant 0 : index
    %c0_3 = arith.constant 0 : index
    %c0_4 = arith.constant 0 : index
    %2 = vector.load %arg3[%c0_2, %c0_3, %c0_4] : memref<1x512x128xbf16, #tpu.memory_space<vmem>>, vector<1x512x128xbf16>
    %3 = vector.shape_cast %2 : vector<1x512x128xbf16> to vector<512x128xbf16>
    %cst = arith.constant dense<0.000000e+00> : vector<32x128xf32>
    %4 = tpu.matmul %1, %3, %cst {dimension_numbers = #tpu.dot_dimension_numbers<[1], [0], [0], [1], [0, 0, 1, 1], [], []>} : vector<32x512xbf16>, vector<512x128xbf16>, vector<32x128xf32> -> vector<32x128xf32>
    %c0_5 = arith.constant 0 : index
    %c0_6 = arith.constant 0 : index
    %5 = vector.load %arg4[%c0_5, %c0_6] : memref<1x128xf32, #tpu.memory_space<vmem>>, vector<1x128xf32>
    %6 = vector.broadcast %5 : vector<1x128xf32> to vector<32x128xf32>
    %7 = arith.addf %4, %6 : vector<32x128xf32>
    %8 = vector.shape_cast %7 : vector<32x128xf32> to vector<1x32x128xf32>
    %c0_7 = arith.constant 0 : index
    %c0_8 = arith.constant 0 : index
    %c0_9 = arith.constant 0 : index
    %9 = vector.load %arg5[%c0_7, %c0_8, %c0_9] : memref<1x32x128xf32, #tpu.memory_space<vmem>>, vector<1x32x128xf32>
    tpu.vector_store %arg5[%c0_7, %c0_8, %c0_9], %8 {strides = array<i32>} : memref<1x32x128xf32, #tpu.memory_space<vmem>>, vector<1x32x128xf32>,
    %cst_10 = arith.constant dense<0.000000e+00> : vector<128xf32>
    %10 = vector.multi_reduction <add>, %7, %cst_10 [0] : vector<32x128xf32> to vector<128xf32>
    %11 = vector.shape_cast %10 : vector<128xf32> to vector<1x128xf32>
    %12 = arith.mulf %7, %7 : vector<32x128xf32>
    %cst_11 = arith.constant dense<0.000000e+00> : vector<128xf32>
    %13 = vector.multi_reduction <add>, %12, %cst_11 [0] : vector<32x128xf32> to vector<128xf32>
    %14 = vector.shape_cast %13 : vector<128xf32> to vector<1x128xf32>
    %15 = tpu.concatenate %11, %14 in 0 : vector<1x128xf32>, vector<1x128xf32> -> vector<2x128xf32>
    %16 = vector.shape_cast %15 : vector<2x128xf32> to vector<1x1x2x128xf32>
    %c0_12 = arith.constant 0 : index
    %c0_13 = arith.constant 0 : index
    %c0_14 = arith.constant 0 : index
    %c0_15 = arith.constant 0 : index
    %17 = vector.load %arg6[%c0_12, %c0_13, %c0_14, %c0_15] : memref<1x1x2x128xf32, #tpu.memory_space<vmem>>, vector<1x1x2x128xf32>
    tpu.vector_store %arg6[%c0_12, %c0_13, %c0_14, %c0_15], %16 {strides = array<i32>} : memref<1x1x2x128xf32, #tpu.memory_space<vmem>>, vector<1x1x2x128xf32>,
    return
  }
  func.func @transform_0(%arg0: i32, %arg1: i32) -> (i32, i32, i32) {
    %c0_i32 = arith.constant 0 : i32
    %c0_i32_0 = arith.constant 0 : i32
    return %arg0, %arg1, %c0_i32 : i32, i32, i32
  }
  func.func @transform_1(%arg0: i32, %arg1: i32) -> (i32, i32, i32) {
    %c0_i32 = arith.constant 0 : i32
    %c0_i32_0 = arith.constant 0 : i32
    %c0_i32_1 = arith.constant 0 : i32
    return %arg0, %c0_i32, %c0_i32_0 : i32, i32, i32
  }
  func.func @transform_2(%arg0: i32, %arg1: i32) -> (i32, i32) {
    %c0_i32 = arith.constant 0 : i32
    %c0_i32_0 = arith.constant 0 : i32
    %c0_i32_1 = arith.constant 0 : i32
    return %c0_i32, %c0_i32_0 : i32, i32
  }
  func.func @transform_3(%arg0: i32, %arg1: i32) -> (i32, i32, i32) {
    %c0_i32 = arith.constant 0 : i32
    %c0_i32_0 = arith.constant 0 : i32
    return %arg0, %arg1, %c0_i32 : i32, i32, i32
  }
  func.func @transform_4(%arg0: i32, %arg1: i32) -> (i32, i32, i32, i32) {
    %c0_i32 = arith.constant 0 : i32
    %c0_i32_0 = arith.constant 0 : i32
    %c0_i32_1 = arith.constant 0 : i32
    return %arg0, %arg1, %c0_i32, %c0_i32_0 : i32, i32, i32, i32
  }
}

module attributes {stable_mosaic.version = 11 : i64} {
  func.func @_bn_lrelu_kernel(%arg0: i32, %arg1: i32, %arg2: memref<1x32x128xf32, #tpu.memory_space<vmem>>, %arg3: memref<1x128xf32, #tpu.memory_space<vmem>>, %arg4: memref<1x128xf32, #tpu.memory_space<vmem>>, %arg5: memref<1x32x128xbf16, #tpu.memory_space<vmem>>) attributes {dimension_semantics = [#tpu.dimension_semantics<parallel>, #tpu.dimension_semantics<parallel>], iteration_bounds = array<i64: 4, 1>, scalar_prefetch = 0 : i64, scratch_operands = 0 : i64, tpu.core_type = #tpu.core_type<tc>, window_params = [{transform_indices = @transform_0, window_bounds = array<i64: 1, 32, 128>}, {pipeline_mode = #tpu.pipeline_mode<synchronous>, transform_indices = @transform_1, window_bounds = array<i64: 1, 128>}, {pipeline_mode = #tpu.pipeline_mode<synchronous>, transform_indices = @transform_2, window_bounds = array<i64: 1, 128>}, {transform_indices = @transform_3, window_bounds = array<i64: 1, 32, 128>}]} {
    %c0 = arith.constant 0 : index
    %c0_0 = arith.constant 0 : index
    %c0_1 = arith.constant 0 : index
    %0 = vector.load %arg2[%c0, %c0_0, %c0_1] : memref<1x32x128xf32, #tpu.memory_space<vmem>>, vector<1x32x128xf32>
    %1 = vector.shape_cast %0 : vector<1x32x128xf32> to vector<32x128xf32>
    %c0_2 = arith.constant 0 : index
    %c0_3 = arith.constant 0 : index
    %2 = vector.load %arg3[%c0_2, %c0_3] : memref<1x128xf32, #tpu.memory_space<vmem>>, vector<1x128xf32>
    %3 = vector.broadcast %2 : vector<1x128xf32> to vector<32x128xf32>
    %4 = arith.mulf %1, %3 : vector<32x128xf32>
    %c0_4 = arith.constant 0 : index
    %c0_5 = arith.constant 0 : index
    %5 = vector.load %arg4[%c0_4, %c0_5] : memref<1x128xf32, #tpu.memory_space<vmem>>, vector<1x128xf32>
    %6 = vector.broadcast %5 : vector<1x128xf32> to vector<32x128xf32>
    %7 = arith.addf %4, %6 : vector<32x128xf32>
    %cst = arith.constant 2.000000e-01 : f32
    %8 = vector.broadcast %cst : f32 to vector<32x128xf32>
    %9 = arith.mulf %8, %7 : vector<32x128xf32>
    %10 = arith.maximumf %7, %9 : vector<32x128xf32>
    %11 = arith.truncf %10 : vector<32x128xf32> to vector<32x128xbf16>
    %12 = vector.shape_cast %11 : vector<32x128xbf16> to vector<1x32x128xbf16>
    %c0_6 = arith.constant 0 : index
    %c0_7 = arith.constant 0 : index
    %c0_8 = arith.constant 0 : index
    %13 = vector.load %arg5[%c0_6, %c0_7, %c0_8] : memref<1x32x128xbf16, #tpu.memory_space<vmem>>, vector<1x32x128xbf16>
    tpu.vector_store %arg5[%c0_6, %c0_7, %c0_8], %12 {strides = array<i32>} : memref<1x32x128xbf16, #tpu.memory_space<vmem>>, vector<1x32x128xbf16>,
    return
  }
  func.func @transform_0(%arg0: i32, %arg1: i32) -> (i32, i32, i32) {
    %c0_i32 = arith.constant 0 : i32
    %c0_i32_0 = arith.constant 0 : i32
    return %arg0, %arg1, %c0_i32 : i32, i32, i32
  }
  func.func @transform_1(%arg0: i32, %arg1: i32) -> (i32, i32) {
    %c0_i32 = arith.constant 0 : i32
    %c0_i32_0 = arith.constant 0 : i32
    %c0_i32_1 = arith.constant 0 : i32
    return %c0_i32, %c0_i32_0 : i32, i32
  }
  func.func @transform_2(%arg0: i32, %arg1: i32) -> (i32, i32) {
    %c0_i32 = arith.constant 0 : i32
    %c0_i32_0 = arith.constant 0 : i32
    %c0_i32_1 = arith.constant 0 : i32
    return %c0_i32, %c0_i32_0 : i32, i32
  }
  func.func @transform_3(%arg0: i32, %arg1: i32) -> (i32, i32, i32) {
    %c0_i32 = arith.constant 0 : i32
    %c0_i32_0 = arith.constant 0 : i32
    return %arg0, %arg1, %c0_i32 : i32, i32, i32
  }
}

module attributes {stable_mosaic.version = 11 : i64} {
  func.func @_matmul_bias_stats_kernel(%arg0: i32, %arg1: i32, %arg2: memref<1x128x256xbf16, #tpu.memory_space<vmem>>, %arg3: memref<1x256x128xbf16, #tpu.memory_space<vmem>>, %arg4: memref<1x128xf32, #tpu.memory_space<vmem>>, %arg5: memref<1x128x128xf32, #tpu.memory_space<vmem>>, %arg6: memref<1x1x2x128xf32, #tpu.memory_space<vmem>>) attributes {dimension_semantics = [#tpu.dimension_semantics<parallel>, #tpu.dimension_semantics<parallel>], iteration_bounds = array<i64: 4, 1>, scalar_prefetch = 0 : i64, scratch_operands = 0 : i64, tpu.core_type = #tpu.core_type<tc>, window_params = [{transform_indices = @transform_0, window_bounds = array<i64: 1, 128, 256>}, {transform_indices = @transform_1, window_bounds = array<i64: 1, 256, 128>}, {pipeline_mode = #tpu.pipeline_mode<synchronous>, transform_indices = @transform_2, window_bounds = array<i64: 1, 128>}, {transform_indices = @transform_3, window_bounds = array<i64: 1, 128, 128>}, {transform_indices = @transform_4, window_bounds = array<i64: 1, 1, 2, 128>}]} {
    %c0 = arith.constant 0 : index
    %c0_0 = arith.constant 0 : index
    %c0_1 = arith.constant 0 : index
    %0 = vector.load %arg2[%c0, %c0_0, %c0_1] : memref<1x128x256xbf16, #tpu.memory_space<vmem>>, vector<1x128x256xbf16>
    %1 = vector.shape_cast %0 : vector<1x128x256xbf16> to vector<128x256xbf16>
    %c0_2 = arith.constant 0 : index
    %c0_3 = arith.constant 0 : index
    %c0_4 = arith.constant 0 : index
    %2 = vector.load %arg3[%c0_2, %c0_3, %c0_4] : memref<1x256x128xbf16, #tpu.memory_space<vmem>>, vector<1x256x128xbf16>
    %3 = vector.shape_cast %2 : vector<1x256x128xbf16> to vector<256x128xbf16>
    %cst = arith.constant dense<0.000000e+00> : vector<128x128xf32>
    %4 = tpu.matmul %1, %3, %cst {dimension_numbers = #tpu.dot_dimension_numbers<[1], [0], [0], [1], [0, 0, 1, 1], [], []>} : vector<128x256xbf16>, vector<256x128xbf16>, vector<128x128xf32> -> vector<128x128xf32>
    %c0_5 = arith.constant 0 : index
    %c0_6 = arith.constant 0 : index
    %5 = vector.load %arg4[%c0_5, %c0_6] : memref<1x128xf32, #tpu.memory_space<vmem>>, vector<1x128xf32>
    %6 = vector.broadcast %5 : vector<1x128xf32> to vector<128x128xf32>
    %7 = arith.addf %4, %6 : vector<128x128xf32>
    %8 = vector.shape_cast %7 : vector<128x128xf32> to vector<1x128x128xf32>
    %c0_7 = arith.constant 0 : index
    %c0_8 = arith.constant 0 : index
    %c0_9 = arith.constant 0 : index
    %9 = vector.load %arg5[%c0_7, %c0_8, %c0_9] : memref<1x128x128xf32, #tpu.memory_space<vmem>>, vector<1x128x128xf32>
    tpu.vector_store %arg5[%c0_7, %c0_8, %c0_9], %8 {strides = array<i32>} : memref<1x128x128xf32, #tpu.memory_space<vmem>>, vector<1x128x128xf32>,
    %cst_10 = arith.constant dense<0.000000e+00> : vector<128xf32>
    %10 = vector.multi_reduction <add>, %7, %cst_10 [0] : vector<128x128xf32> to vector<128xf32>
    %11 = vector.shape_cast %10 : vector<128xf32> to vector<1x128xf32>
    %12 = arith.mulf %7, %7 : vector<128x128xf32>
    %cst_11 = arith.constant dense<0.000000e+00> : vector<128xf32>
    %13 = vector.multi_reduction <add>, %12, %cst_11 [0] : vector<128x128xf32> to vector<128xf32>
    %14 = vector.shape_cast %13 : vector<128xf32> to vector<1x128xf32>
    %15 = tpu.concatenate %11, %14 in 0 : vector<1x128xf32>, vector<1x128xf32> -> vector<2x128xf32>
    %16 = vector.shape_cast %15 : vector<2x128xf32> to vector<1x1x2x128xf32>
    %c0_12 = arith.constant 0 : index
    %c0_13 = arith.constant 0 : index
    %c0_14 = arith.constant 0 : index
    %c0_15 = arith.constant 0 : index
    %17 = vector.load %arg6[%c0_12, %c0_13, %c0_14, %c0_15] : memref<1x1x2x128xf32, #tpu.memory_space<vmem>>, vector<1x1x2x128xf32>
    tpu.vector_store %arg6[%c0_12, %c0_13, %c0_14, %c0_15], %16 {strides = array<i32>} : memref<1x1x2x128xf32, #tpu.memory_space<vmem>>, vector<1x1x2x128xf32>,
    return
  }
  func.func @transform_0(%arg0: i32, %arg1: i32) -> (i32, i32, i32) {
    %c0_i32 = arith.constant 0 : i32
    %c0_i32_0 = arith.constant 0 : i32
    return %arg0, %arg1, %c0_i32 : i32, i32, i32
  }
  func.func @transform_1(%arg0: i32, %arg1: i32) -> (i32, i32, i32) {
    %c0_i32 = arith.constant 0 : i32
    %c0_i32_0 = arith.constant 0 : i32
    %c0_i32_1 = arith.constant 0 : i32
    return %arg0, %c0_i32, %c0_i32_0 : i32, i32, i32
  }
  func.func @transform_2(%arg0: i32, %arg1: i32) -> (i32, i32) {
    %c0_i32 = arith.constant 0 : i32
    %c0_i32_0 = arith.constant 0 : i32
    %c0_i32_1 = arith.constant 0 : i32
    return %c0_i32, %c0_i32_0 : i32, i32
  }
  func.func @transform_3(%arg0: i32, %arg1: i32) -> (i32, i32, i32) {
    %c0_i32 = arith.constant 0 : i32
    %c0_i32_0 = arith.constant 0 : i32
    return %arg0, %arg1, %c0_i32 : i32, i32, i32
  }
  func.func @transform_4(%arg0: i32, %arg1: i32) -> (i32, i32, i32, i32) {
    %c0_i32 = arith.constant 0 : i32
    %c0_i32_0 = arith.constant 0 : i32
    %c0_i32_1 = arith.constant 0 : i32
    return %arg0, %arg1, %c0_i32, %c0_i32_0 : i32, i32, i32, i32
  }
}

module attributes {stable_mosaic.version = 11 : i64} {
  func.func @_bn_lrelu_kernel(%arg0: i32, %arg1: i32, %arg2: memref<1x128x128xf32, #tpu.memory_space<vmem>>, %arg3: memref<1x128xf32, #tpu.memory_space<vmem>>, %arg4: memref<1x128xf32, #tpu.memory_space<vmem>>, %arg5: memref<1x128x128xbf16, #tpu.memory_space<vmem>>) attributes {dimension_semantics = [#tpu.dimension_semantics<parallel>, #tpu.dimension_semantics<parallel>], iteration_bounds = array<i64: 4, 1>, scalar_prefetch = 0 : i64, scratch_operands = 0 : i64, tpu.core_type = #tpu.core_type<tc>, window_params = [{transform_indices = @transform_0, window_bounds = array<i64: 1, 128, 128>}, {pipeline_mode = #tpu.pipeline_mode<synchronous>, transform_indices = @transform_1, window_bounds = array<i64: 1, 128>}, {pipeline_mode = #tpu.pipeline_mode<synchronous>, transform_indices = @transform_2, window_bounds = array<i64: 1, 128>}, {transform_indices = @transform_3, window_bounds = array<i64: 1, 128, 128>}]} {
    %c0 = arith.constant 0 : index
    %c0_0 = arith.constant 0 : index
    %c0_1 = arith.constant 0 : index
    %0 = vector.load %arg2[%c0, %c0_0, %c0_1] : memref<1x128x128xf32, #tpu.memory_space<vmem>>, vector<1x128x128xf32>
    %1 = vector.shape_cast %0 : vector<1x128x128xf32> to vector<128x128xf32>
    %c0_2 = arith.constant 0 : index
    %c0_3 = arith.constant 0 : index
    %2 = vector.load %arg3[%c0_2, %c0_3] : memref<1x128xf32, #tpu.memory_space<vmem>>, vector<1x128xf32>
    %3 = vector.broadcast %2 : vector<1x128xf32> to vector<128x128xf32>
    %4 = arith.mulf %1, %3 : vector<128x128xf32>
    %c0_4 = arith.constant 0 : index
    %c0_5 = arith.constant 0 : index
    %5 = vector.load %arg4[%c0_4, %c0_5] : memref<1x128xf32, #tpu.memory_space<vmem>>, vector<1x128xf32>
    %6 = vector.broadcast %5 : vector<1x128xf32> to vector<128x128xf32>
    %7 = arith.addf %4, %6 : vector<128x128xf32>
    %cst = arith.constant 2.000000e-01 : f32
    %8 = vector.broadcast %cst : f32 to vector<128x128xf32>
    %9 = arith.mulf %8, %7 : vector<128x128xf32>
    %10 = arith.maximumf %7, %9 : vector<128x128xf32>
    %11 = arith.truncf %10 : vector<128x128xf32> to vector<128x128xbf16>
    %12 = vector.shape_cast %11 : vector<128x128xbf16> to vector<1x128x128xbf16>
    %c0_6 = arith.constant 0 : index
    %c0_7 = arith.constant 0 : index
    %c0_8 = arith.constant 0 : index
    %13 = vector.load %arg5[%c0_6, %c0_7, %c0_8] : memref<1x128x128xbf16, #tpu.memory_space<vmem>>, vector<1x128x128xbf16>
    tpu.vector_store %arg5[%c0_6, %c0_7, %c0_8], %12 {strides = array<i32>} : memref<1x128x128xbf16, #tpu.memory_space<vmem>>, vector<1x128x128xbf16>,
    return
  }
  func.func @transform_0(%arg0: i32, %arg1: i32) -> (i32, i32, i32) {
    %c0_i32 = arith.constant 0 : i32
    %c0_i32_0 = arith.constant 0 : i32
    return %arg0, %arg1, %c0_i32 : i32, i32, i32
  }
  func.func @transform_1(%arg0: i32, %arg1: i32) -> (i32, i32) {
    %c0_i32 = arith.constant 0 : i32
    %c0_i32_0 = arith.constant 0 : i32
    %c0_i32_1 = arith.constant 0 : i32
    return %c0_i32, %c0_i32_0 : i32, i32
  }
  func.func @transform_2(%arg0: i32, %arg1: i32) -> (i32, i32) {
    %c0_i32 = arith.constant 0 : i32
    %c0_i32_0 = arith.constant 0 : i32
    %c0_i32_1 = arith.constant 0 : i32
    return %c0_i32, %c0_i32_0 : i32, i32
  }
  func.func @transform_3(%arg0: i32, %arg1: i32) -> (i32, i32, i32) {
    %c0_i32 = arith.constant 0 : i32
    %c0_i32_0 = arith.constant 0 : i32
    return %arg0, %arg1, %c0_i32 : i32, i32, i32
  }
}

module attributes {stable_mosaic.version = 11 : i64} {
  func.func @_matmul_bias_stats_kernel(%arg0: i32, %arg1: i32, %arg2: memref<1x512x128xbf16, #tpu.memory_space<vmem>>, %arg3: memref<1x128x128xbf16, #tpu.memory_space<vmem>>, %arg4: memref<1x128xf32, #tpu.memory_space<vmem>>, %arg5: memref<1x512x128xf32, #tpu.memory_space<vmem>>, %arg6: memref<1x1x2x128xf32, #tpu.memory_space<vmem>>) attributes {dimension_semantics = [#tpu.dimension_semantics<parallel>, #tpu.dimension_semantics<parallel>], iteration_bounds = array<i64: 4, 1>, scalar_prefetch = 0 : i64, scratch_operands = 0 : i64, tpu.core_type = #tpu.core_type<tc>, window_params = [{transform_indices = @transform_0, window_bounds = array<i64: 1, 512, 128>}, {transform_indices = @transform_1, window_bounds = array<i64: 1, 128, 128>}, {pipeline_mode = #tpu.pipeline_mode<synchronous>, transform_indices = @transform_2, window_bounds = array<i64: 1, 128>}, {transform_indices = @transform_3, window_bounds = array<i64: 1, 512, 128>}, {transform_indices = @transform_4, window_bounds = array<i64: 1, 1, 2, 128>}]} {
    %c0 = arith.constant 0 : index
    %c0_0 = arith.constant 0 : index
    %c0_1 = arith.constant 0 : index
    %0 = vector.load %arg2[%c0, %c0_0, %c0_1] : memref<1x512x128xbf16, #tpu.memory_space<vmem>>, vector<1x512x128xbf16>
    %1 = vector.shape_cast %0 : vector<1x512x128xbf16> to vector<512x128xbf16>
    %c0_2 = arith.constant 0 : index
    %c0_3 = arith.constant 0 : index
    %c0_4 = arith.constant 0 : index
    %2 = vector.load %arg3[%c0_2, %c0_3, %c0_4] : memref<1x128x128xbf16, #tpu.memory_space<vmem>>, vector<1x128x128xbf16>
    %3 = vector.shape_cast %2 : vector<1x128x128xbf16> to vector<128x128xbf16>
    %cst = arith.constant dense<0.000000e+00> : vector<512x128xf32>
    %4 = tpu.matmul %1, %3, %cst {dimension_numbers = #tpu.dot_dimension_numbers<[1], [0], [0], [1], [0, 0, 1, 1], [], []>} : vector<512x128xbf16>, vector<128x128xbf16>, vector<512x128xf32> -> vector<512x128xf32>
    %c0_5 = arith.constant 0 : index
    %c0_6 = arith.constant 0 : index
    %5 = vector.load %arg4[%c0_5, %c0_6] : memref<1x128xf32, #tpu.memory_space<vmem>>, vector<1x128xf32>
    %6 = vector.broadcast %5 : vector<1x128xf32> to vector<512x128xf32>
    %7 = arith.addf %4, %6 : vector<512x128xf32>
    %8 = vector.shape_cast %7 : vector<512x128xf32> to vector<1x512x128xf32>
    %c0_7 = arith.constant 0 : index
    %c0_8 = arith.constant 0 : index
    %c0_9 = arith.constant 0 : index
    %9 = vector.load %arg5[%c0_7, %c0_8, %c0_9] : memref<1x512x128xf32, #tpu.memory_space<vmem>>, vector<1x512x128xf32>
    tpu.vector_store %arg5[%c0_7, %c0_8, %c0_9], %8 {strides = array<i32>} : memref<1x512x128xf32, #tpu.memory_space<vmem>>, vector<1x512x128xf32>,
    %cst_10 = arith.constant dense<0.000000e+00> : vector<128xf32>
    %10 = vector.multi_reduction <add>, %7, %cst_10 [0] : vector<512x128xf32> to vector<128xf32>
    %11 = vector.shape_cast %10 : vector<128xf32> to vector<1x128xf32>
    %12 = arith.mulf %7, %7 : vector<512x128xf32>
    %cst_11 = arith.constant dense<0.000000e+00> : vector<128xf32>
    %13 = vector.multi_reduction <add>, %12, %cst_11 [0] : vector<512x128xf32> to vector<128xf32>
    %14 = vector.shape_cast %13 : vector<128xf32> to vector<1x128xf32>
    %15 = tpu.concatenate %11, %14 in 0 : vector<1x128xf32>, vector<1x128xf32> -> vector<2x128xf32>
    %16 = vector.shape_cast %15 : vector<2x128xf32> to vector<1x1x2x128xf32>
    %c0_12 = arith.constant 0 : index
    %c0_13 = arith.constant 0 : index
    %c0_14 = arith.constant 0 : index
    %c0_15 = arith.constant 0 : index
    %17 = vector.load %arg6[%c0_12, %c0_13, %c0_14, %c0_15] : memref<1x1x2x128xf32, #tpu.memory_space<vmem>>, vector<1x1x2x128xf32>
    tpu.vector_store %arg6[%c0_12, %c0_13, %c0_14, %c0_15], %16 {strides = array<i32>} : memref<1x1x2x128xf32, #tpu.memory_space<vmem>>, vector<1x1x2x128xf32>,
    return
  }
  func.func @transform_0(%arg0: i32, %arg1: i32) -> (i32, i32, i32) {
    %c0_i32 = arith.constant 0 : i32
    %c0_i32_0 = arith.constant 0 : i32
    return %arg0, %arg1, %c0_i32 : i32, i32, i32
  }
  func.func @transform_1(%arg0: i32, %arg1: i32) -> (i32, i32, i32) {
    %c0_i32 = arith.constant 0 : i32
    %c0_i32_0 = arith.constant 0 : i32
    %c0_i32_1 = arith.constant 0 : i32
    return %arg0, %c0_i32, %c0_i32_0 : i32, i32, i32
  }
  func.func @transform_2(%arg0: i32, %arg1: i32) -> (i32, i32) {
    %c0_i32 = arith.constant 0 : i32
    %c0_i32_0 = arith.constant 0 : i32
    %c0_i32_1 = arith.constant 0 : i32
    return %c0_i32, %c0_i32_0 : i32, i32
  }
  func.func @transform_3(%arg0: i32, %arg1: i32) -> (i32, i32, i32) {
    %c0_i32 = arith.constant 0 : i32
    %c0_i32_0 = arith.constant 0 : i32
    return %arg0, %arg1, %c0_i32 : i32, i32, i32
  }
  func.func @transform_4(%arg0: i32, %arg1: i32) -> (i32, i32, i32, i32) {
    %c0_i32 = arith.constant 0 : i32
    %c0_i32_0 = arith.constant 0 : i32
    %c0_i32_1 = arith.constant 0 : i32
    return %arg0, %arg1, %c0_i32, %c0_i32_0 : i32, i32, i32, i32
  }
}

module attributes {stable_mosaic.version = 11 : i64} {
  func.func @_bn_lrelu_kernel(%arg0: i32, %arg1: i32, %arg2: memref<1x512x128xf32, #tpu.memory_space<vmem>>, %arg3: memref<1x128xf32, #tpu.memory_space<vmem>>, %arg4: memref<1x128xf32, #tpu.memory_space<vmem>>, %arg5: memref<1x512x128xbf16, #tpu.memory_space<vmem>>) attributes {dimension_semantics = [#tpu.dimension_semantics<parallel>, #tpu.dimension_semantics<parallel>], iteration_bounds = array<i64: 4, 1>, scalar_prefetch = 0 : i64, scratch_operands = 0 : i64, tpu.core_type = #tpu.core_type<tc>, window_params = [{transform_indices = @transform_0, window_bounds = array<i64: 1, 512, 128>}, {pipeline_mode = #tpu.pipeline_mode<synchronous>, transform_indices = @transform_1, window_bounds = array<i64: 1, 128>}, {pipeline_mode = #tpu.pipeline_mode<synchronous>, transform_indices = @transform_2, window_bounds = array<i64: 1, 128>}, {transform_indices = @transform_3, window_bounds = array<i64: 1, 512, 128>}]} {
    %c0 = arith.constant 0 : index
    %c0_0 = arith.constant 0 : index
    %c0_1 = arith.constant 0 : index
    %0 = vector.load %arg2[%c0, %c0_0, %c0_1] : memref<1x512x128xf32, #tpu.memory_space<vmem>>, vector<1x512x128xf32>
    %1 = vector.shape_cast %0 : vector<1x512x128xf32> to vector<512x128xf32>
    %c0_2 = arith.constant 0 : index
    %c0_3 = arith.constant 0 : index
    %2 = vector.load %arg3[%c0_2, %c0_3] : memref<1x128xf32, #tpu.memory_space<vmem>>, vector<1x128xf32>
    %3 = vector.broadcast %2 : vector<1x128xf32> to vector<512x128xf32>
    %4 = arith.mulf %1, %3 : vector<512x128xf32>
    %c0_4 = arith.constant 0 : index
    %c0_5 = arith.constant 0 : index
    %5 = vector.load %arg4[%c0_4, %c0_5] : memref<1x128xf32, #tpu.memory_space<vmem>>, vector<1x128xf32>
    %6 = vector.broadcast %5 : vector<1x128xf32> to vector<512x128xf32>
    %7 = arith.addf %4, %6 : vector<512x128xf32>
    %cst = arith.constant 2.000000e-01 : f32
    %8 = vector.broadcast %cst : f32 to vector<512x128xf32>
    %9 = arith.mulf %8, %7 : vector<512x128xf32>
    %10 = arith.maximumf %7, %9 : vector<512x128xf32>
    %11 = arith.truncf %10 : vector<512x128xf32> to vector<512x128xbf16>
    %12 = vector.shape_cast %11 : vector<512x128xbf16> to vector<1x512x128xbf16>
    %c0_6 = arith.constant 0 : index
    %c0_7 = arith.constant 0 : index
    %c0_8 = arith.constant 0 : index
    %13 = vector.load %arg5[%c0_6, %c0_7, %c0_8] : memref<1x512x128xbf16, #tpu.memory_space<vmem>>, vector<1x512x128xbf16>
    tpu.vector_store %arg5[%c0_6, %c0_7, %c0_8], %12 {strides = array<i32>} : memref<1x512x128xbf16, #tpu.memory_space<vmem>>, vector<1x512x128xbf16>,
    return
  }
  func.func @transform_0(%arg0: i32, %arg1: i32) -> (i32, i32, i32) {
    %c0_i32 = arith.constant 0 : i32
    %c0_i32_0 = arith.constant 0 : i32
    return %arg0, %arg1, %c0_i32 : i32, i32, i32
  }
  func.func @transform_1(%arg0: i32, %arg1: i32) -> (i32, i32) {
    %c0_i32 = arith.constant 0 : i32
    %c0_i32_0 = arith.constant 0 : i32
    %c0_i32_1 = arith.constant 0 : i32
    return %c0_i32, %c0_i32_0 : i32, i32
  }
  func.func @transform_2(%arg0: i32, %arg1: i32) -> (i32, i32) {
    %c0_i32 = arith.constant 0 : i32
    %c0_i32_0 = arith.constant 0 : i32
    %c0_i32_1 = arith.constant 0 : i32
    return %c0_i32, %c0_i32_0 : i32, i32
  }
  func.func @transform_3(%arg0: i32, %arg1: i32) -> (i32, i32, i32) {
    %c0_i32 = arith.constant 0 : i32
    %c0_i32_0 = arith.constant 0 : i32
    return %arg0, %arg1, %c0_i32 : i32, i32, i32
  }
}

module attributes {stable_mosaic.version = 11 : i64} {
  func.func @_matmul_bias_sigmoid_kernel(%arg0: i32, %arg1: i32, %arg2: memref<1x512x64xbf16, #tpu.memory_space<vmem>>, %arg3: memref<1x64x128xbf16, #tpu.memory_space<vmem>>, %arg4: memref<1x128xf32, #tpu.memory_space<vmem>>, %arg5: memref<1x512x128xf32, #tpu.memory_space<vmem>>) attributes {dimension_semantics = [#tpu.dimension_semantics<parallel>, #tpu.dimension_semantics<parallel>], iteration_bounds = array<i64: 4, 4>, scalar_prefetch = 0 : i64, scratch_operands = 0 : i64, tpu.core_type = #tpu.core_type<tc>, window_params = [{transform_indices = @transform_0, window_bounds = array<i64: 1, 512, 64>}, {transform_indices = @transform_1, window_bounds = array<i64: 1, 64, 128>}, {pipeline_mode = #tpu.pipeline_mode<synchronous>, transform_indices = @transform_2, window_bounds = array<i64: 1, 128>}, {transform_indices = @transform_3, window_bounds = array<i64: 1, 512, 128>}]} {
    %c0 = arith.constant 0 : index
    %c0_0 = arith.constant 0 : index
    %c0_1 = arith.constant 0 : index
    %0 = vector.load %arg2[%c0, %c0_0, %c0_1] : memref<1x512x64xbf16, #tpu.memory_space<vmem>>, vector<1x512x64xbf16>
    %1 = vector.shape_cast %0 : vector<1x512x64xbf16> to vector<512x64xbf16>
    %c0_2 = arith.constant 0 : index
    %c0_3 = arith.constant 0 : index
    %c0_4 = arith.constant 0 : index
    %2 = vector.load %arg3[%c0_2, %c0_3, %c0_4] : memref<1x64x128xbf16, #tpu.memory_space<vmem>>, vector<1x64x128xbf16>
    %3 = vector.shape_cast %2 : vector<1x64x128xbf16> to vector<64x128xbf16>
    %cst = arith.constant dense<0.000000e+00> : vector<512x128xf32>
    %4 = tpu.matmul %1, %3, %cst {dimension_numbers = #tpu.dot_dimension_numbers<[1], [0], [0], [1], [0, 0, 1, 1], [], []>} : vector<512x64xbf16>, vector<64x128xbf16>, vector<512x128xf32> -> vector<512x128xf32>
    %c0_5 = arith.constant 0 : index
    %c0_6 = arith.constant 0 : index
    %5 = vector.load %arg4[%c0_5, %c0_6] : memref<1x128xf32, #tpu.memory_space<vmem>>, vector<1x128xf32>
    %6 = vector.broadcast %5 : vector<1x128xf32> to vector<512x128xf32>
    %7 = arith.addf %4, %6 : vector<512x128xf32>
    %8 = arith.negf %7 : vector<512x128xf32>
    %9 = math.exp %8 : vector<512x128xf32>
    %cst_7 = arith.constant 1.000000e+00 : f32
    %10 = vector.broadcast %cst_7 : f32 to vector<512x128xf32>
    %11 = arith.addf %10, %9 : vector<512x128xf32>
    %12 = arith.divf %10, %11 : vector<512x128xf32>
    %13 = vector.shape_cast %12 : vector<512x128xf32> to vector<1x512x128xf32>
    %c0_8 = arith.constant 0 : index
    %c0_9 = arith.constant 0 : index
    %c0_10 = arith.constant 0 : index
    %14 = vector.load %arg5[%c0_8, %c0_9, %c0_10] : memref<1x512x128xf32, #tpu.memory_space<vmem>>, vector<1x512x128xf32>
    tpu.vector_store %arg5[%c0_8, %c0_9, %c0_10], %13 {strides = array<i32>} : memref<1x512x128xf32, #tpu.memory_space<vmem>>, vector<1x512x128xf32>,
    return
  }
  func.func @transform_0(%arg0: i32, %arg1: i32) -> (i32, i32, i32) {
    %c0_i32 = arith.constant 0 : i32
    %c0_i32_0 = arith.constant 0 : i32
    return %arg0, %arg1, %c0_i32 : i32, i32, i32
  }
  func.func @transform_1(%arg0: i32, %arg1: i32) -> (i32, i32, i32) {
    %c0_i32 = arith.constant 0 : i32
    %c0_i32_0 = arith.constant 0 : i32
    %c0_i32_1 = arith.constant 0 : i32
    return %arg0, %c0_i32, %c0_i32_0 : i32, i32, i32
  }
  func.func @transform_2(%arg0: i32, %arg1: i32) -> (i32, i32) {
    %c0_i32 = arith.constant 0 : i32
    %c0_i32_0 = arith.constant 0 : i32
    %c0_i32_1 = arith.constant 0 : i32
    return %c0_i32, %c0_i32_0 : i32, i32
  }
  func.func @transform_3(%arg0: i32, %arg1: i32) -> (i32, i32, i32) {
    %c0_i32 = arith.constant 0 : i32
    %c0_i32_0 = arith.constant 0 : i32
    return %arg0, %arg1, %c0_i32 : i32, i32, i32
  }
}

</mosaic_0001>

<bundles_post_ra>
// kernel: dcgan_decoder_forward.10
= control target key start
LH: loop header
LB: loop body
LE: loop exit
PB: predicated region body
PF: predicated region fallthrough
CT: control target
= control target key end

     0   :  { %s137_s0 = inlined_call_operand.vmem [shape: f32[1,32,128], index: 0, kind: input, shape index: {}]   ;;  %s138_s1 = inlined_call_operand.vmem [shape: f32[1,128], index: 1, kind: input, shape index: {}]   ;;  %s139_s2 = inlined_call_operand.vmem [shape: f32[1,128], index: 2, kind: input, shape index: {}]   ;;  %s140_s3 = inlined_call_operand.vmem [shape: bf16[1,32,128], index: 3, kind: output, shape index: {}]  }
   0x1   :  { %v14_v0 = vld [vmem:[%s137_s0] sm:$0xff]  ;;  %v15_v1 = vld [vmem:[%s137_s0 + $0x8] sm:$0xff]  ;;  %v16_v6 = vld [vmem:[%s137_s0 + $0x10] sm:$0xff] }
   0x2   :  { %v72_v2 = vld [vmem:[%s138_s1] ss:$0 sm:$0xff]  ;;  %v17_v7 = vld [vmem:[%s137_s0 + $0x18] sm:$0xff] }
   0x3   :  { %v25_v3 = vmul.f32 %v72_v2, %v14_v0  ;;  %v26_v4 = vmul.f32 %v72_v2, %v15_v1  ;;  %v73_v5 = vld [vmem:[%s139_s2] ss:$0 sm:$0xff]  ;;  %v27_v8 = vmul.f32 %v72_v2, %v16_v6  ;;  %v28_v9 = vmul.f32 %v72_v2, %v17_v7 }
   0x5   :  { %v36_v10 = vadd.f32 %v73_v5, %v25_v3  ;;  %v37_v11 = vadd.f32 %v73_v5, %v26_v4  ;;  %v38_v12 = vadd.f32 %v73_v5, %v27_v8  ;;  %v39_v13 = vadd.f32 %v73_v5, %v28_v9 }
   0x7   :  { %v40_v14 = vmul.f32 0.2, %v36_v10  ;;  %v41_v15 = vmul.f32 0.2, %v37_v11  ;;  %v42_v16 = vmul.f32 0.2, %v38_v12 }
   0x8   :  { %v43_v17 = vmul.f32 0.2, %v39_v13 }
   0x9   :  { %v44_v18 = vmax.f32 %v36_v10, %v40_v14  ;;  %v45_v19 = vmax.f32 %v37_v11, %v41_v15  ;;  %v46_v20 = vmax.f32 %v38_v12, %v42_v16 }
   0xa   :  { %v47_v21 = vmax.f32 %v39_v13, %v43_v17 }
   0xb   :  { %v85_v22 = vpack.c.bf16 %v45_v19, %v44_v18 }
   0xc   :  { %v90_v23 = vpack.c.bf16 %v47_v21, %v46_v20 }
   0xd   :  { %86 = vst [vmem:[%s140_s3] sm:$0xff] %v85_v22  }
   0xe   :  { %92 = vst [vmem:[%s140_s3 + $0x8] sm:$0xff] %v90_v23  }

// kernel: dcgan_decoder_forward.9
= control target key start
LH: loop header
LB: loop body
LE: loop exit
PB: predicated region body
PF: predicated region fallthrough
CT: control target
= control target key end

     0   :  { %10 = vsyncpa [#allocation3], 0  ;;  %s509_s0 = inlined_call_operand.vmem [shape: bf16[1,32,256], index: 0, kind: input, shape index: {}]   ;;  %s510_s1 = inlined_call_operand.hbm [shape: bf16[1,256,128], index: 1, kind: input, shape index: {}]   ;;  %s511_s2 = inlined_call_operand.hbm [shape: f32[1,128], index: 2, kind: input, shape index: {}]   ;;  %s512_s3 = inlined_call_operand.vmem [shape: f32[1,32,128], index: 3, kind: output, shape index: {0}]   ;;  %s513_s4 = inlined_call_operand.vmem [shape: f32[1,1,2,128], index: 4, kind: output, shape index: {1}]  }
   0x1   :  { %11 = vsyncpa [#allocation5], 0  ;;  %s429_s15 = smov [#allocation2]   ;;  %s381_s19 = scalar_lea.hbm %s510_s1, 2048 }
   0x2   :  { %s19_s16 = sshll.u32 %s429_s15, 4  ;;  %p382_p0 = scmp.ne.s32.totalorder %s510_s1, %s381_s19  ;;  %s20_s16 = int_to_ptr.vmem [resolvable:$true] %s19_s16 }
   0x3   :  { %p385_p1 = scmp.lt.u32.totalorder %s381_s19, %s510_s1 }
   0x5   :  { %p387_p2 = pnand %p385_p1, %p382_p0 }
   0x7   :  { %390 = shalt.err (!%p387_p2)
}
   0x8   :  { %s391_s24 = scalar_lea.vmem %s20_s16, 2048  ;;  %p396_p4 = scmp.lt.s32.totalorder %s20_s16, %s20_s16 }
   0x9   :  { %p392_p3 = scmp.ne.s32.totalorder %s20_s16, %s391_s24  ;;  %p397_p5 = scmp.lt.s32.totalorder %s391_s24, %s391_s24 }
   0xb   :  { %p398_p6 = por %p397_p5, %p396_p4 }
   0xd   :  { %p399_p7 = pnand %p398_p6, %p392_p3 }
   0xf   :  { %402 = shalt.err (!%p399_p7)
}
  0x10   :  { %s430_s25 = smov 64   ;;  %s431_s26 = smov 4  }
  0x11   :  { %25 = dma.hbm_to_vmem [thread:$0]  %s510_s1, 2048, %s20_s16, [#allocation3], %s430_s25, %s430_s25, %s431_s26  }
  0x12   :  { %s432_s29 = smov [#allocation4]   ;;  %s403_s7 = scalar_lea.hbm %s511_s2, 16 }
  0x13   :  { %s32_s30 = sshll.u32 %s432_s29, 4  ;;  %p404_p8 = scmp.ne.s32.totalorder %s511_s2, %s403_s7  ;;  %s33_s30 = int_to_ptr.vmem [resolvable:$true] %s32_s30 }
  0x14   :  { %p407_p9 = scmp.lt.u32.totalorder %s403_s7, %s511_s2 }
  0x16   :  { %p409_p10 = pnand %p407_p9, %p404_p8 }
  0x18   :  { %412 = shalt.err (!%p409_p10)
}
  0x19   :  { %s413_s12 = scalar_lea.vmem %s33_s30, 16  ;;  %s417_s1 = scalar_lea.vmem %s33_s30, 32 }
  0x1a   :  { %p414_p11 = scmp.ne.s32.totalorder %s33_s30, %s413_s12  ;;  %p418_p12 = scmp.lt.s32.totalorder %s33_s30, %s33_s30 }
  0x1b   :  { %p419_p13 = scmp.lt.s32.totalorder %s417_s1, %s413_s12 }
  0x1d   :  { %p420_p0 = por %p419_p13, %p418_p12 }
  0x1f   :  { %p421_p1 = pnand %p420_p0, %p414_p11 }
  0x21   :  { %424 = shalt.err (!%p421_p1)
}
  0x22   :  { %35 = dma.hbm_to_vmem [thread:$0]  %s511_s2, 16, %s33_s30, [#allocation5]  }
  0x23   :  { %425 = dma.done.wait [#allocation3], 2048  }
  0x24   :  { %426 = vsyncadd [#allocation3], 4294965248 }
  0x25   :  { %427 = dma.done.wait [#allocation5], 16  }
  0x26   :  { %428 = vsyncadd [#allocation5], 4294967280  ;;  %v359_v0 = vld [vmem:[#allocation2 + $0x40] sm:$0xff]   ;;  %v361_v2 = vld [vmem:[#allocation2 + $0x48] sm:$0xff]   ;;  %vm277_vm0 = vcmask 1040384  }
  0x27   :  { %v360_v1 = vld [vmem:[#allocation2] sm:$0xff]   ;;  %311 = vmatprep.subr.bf16.mxu0 %v359_v0  ;;  %339 = vmatprep.subr.bf16.mxu1 %v359_v0  ;;  %v362_v3 = vld [vmem:[#allocation2 + $0x8] sm:$0xff]   ;;  %v363_v4 = vld [vmem:[#allocation2 + $0x50] sm:$0xff]  }
  0x28   :  { %312 = vmatpush3.bf16.msra.mxu0 %v360_v1  ;;  %347 = vmatpush3.bf16.msra.mxu1 %v360_v1  ;;  %v364_v5 = vld [vmem:[#allocation2 + $0x10] sm:$0xff]   ;;  %v365_v6 = vld [vmem:[#allocation2 + $0x58] sm:$0xff]   ;;  %v367_v8 = vld [vmem:[#allocation2 + $0x60] sm:$0xff]  }
  0x29   :  { %313 = vmatprep.subr.bf16.mxu0 %v361_v2  ;;  %340 = vmatprep.subr.bf16.mxu1 %v361_v2  ;;  %v366_v7 = vld [vmem:[#allocation2 + $0x18] sm:$0xff]   ;;  %v368_v9 = vld [vmem:[#allocation2 + $0x20] sm:$0xff]   ;;  %v369_v10 = vld [vmem:[#allocation2 + $0x68] sm:$0xff]  }
  0x2a   :  { %v377_v11 = vld [vmem:[%s509_s0 + $0x4] ss:$8 sps:$4 sm:$0xff]   ;;  %v380_v12 = vld [vmem:[%s509_s0 + $0x14] ss:$8 sps:$4 sm:$0xff]   ;;  %v375_v18 = vld [vmem:[%s509_s0] ss:$8 sps:$4 sm:$0xff]  }
  0x2b   :  { %v370_v13 = vld [vmem:[#allocation2 + $0x28] sm:$0xff]   ;;  %v371_v14 = vld [vmem:[#allocation2 + $0x70] sm:$0xff]   ;;  %234 = vmatprep.mubr.bf16.mxu0 %v377_v11  ;;  %242 = vmatprep.mubr.bf16.mxu1 %v380_v12  ;;  %v373_v16 = vld [vmem:[#allocation2 + $0x78] sm:$0xff]  }
  0x2c   :  { %314 = vmatpush3.bf16.msra.mxu0 %v362_v3  ;;  %348 = vmatpush3.bf16.msra.mxu1 %v362_v3  ;;  %v372_v15 = vld [vmem:[#allocation2 + $0x30] sm:$0xff]   ;;  %v374_v17 = vld [vmem:[#allocation2 + $0x38] sm:$0xff]   ;;  %v290_v22 = vld [vmem:[#allocation4] ss:$0 sm:$0xff] }
  0x2d   :  { %315 = vmatprep.subr.bf16.mxu0 %v363_v4  ;;  %341 = vmatprep.subr.bf16.mxu1 %v363_v4  ;;  %v378_v19 = vld [vmem:[%s509_s0 + $0x10] ss:$8 sps:$4 sm:$0xff]  }
  0x30   :  { %316 = vmatpush3.bf16.msra.mxu0 %v364_v5  ;;  %349 = vmatpush3.bf16.msra.mxu1 %v364_v5 }
  0x31   :  { %317 = vmatprep.subr.bf16.mxu0 %v365_v6  ;;  %342 = vmatprep.subr.bf16.mxu1 %v365_v6 }
  0x34   :  { %318 = vmatpush3.bf16.msra.mxu0 %v366_v7  ;;  %350 = vmatpush3.bf16.msra.mxu1 %v366_v7 }
  0x35   :  { %319 = vmatprep.subr.bf16.mxu0 %v367_v8  ;;  %343 = vmatprep.subr.bf16.mxu1 %v367_v8 }
  0x38   :  { %320 = vmatpush3.bf16.msra.mxu0 %v368_v9  ;;  %351 = vmatpush3.bf16.msra.mxu1 %v368_v9 }
  0x39   :  { %321 = vmatprep.subr.bf16.mxu0 %v369_v10  ;;  %344 = vmatprep.subr.bf16.mxu1 %v369_v10 }
  0x3c   :  { %322 = vmatpush3.bf16.msra.mxu0 %v370_v13  ;;  %352 = vmatpush3.bf16.msra.mxu1 %v370_v13 }
  0x3d   :  { %323 = vmatprep.subr.bf16.mxu0 %v371_v14  ;;  %345 = vmatprep.subr.bf16.mxu1 %v371_v14 }
  0x40   :  { %324 = vmatpush3.bf16.msra.mxu0 %v372_v15  ;;  %353 = vmatpush3.bf16.msra.mxu1 %v372_v15 }
  0x41   :  { %325 = vmatprep.subr.bf16.mxu0 %v373_v16  ;;  %346 = vmatprep.subr.bf16.mxu1 %v373_v16 }
  0x44   :  { %326 = vmatpush3.bf16.msra.mxu0 %v374_v17  ;;  %354 = vmatpush3.bf16.msra.mxu1 %v374_v17 }
  0x47   :  { %235 = vmatmul.mubr.bf16.vlgmr.msra.gmra.mrb[0].mxu0 %v375_v18  ;;  %243 = vmatmul.mubr.bf16.vlgmr.msra.gmra.mrb[0].mxu1 %v378_v19 }
 0x11a   :  { %v327_v20 = vpop.f32.mrb[0].mxu0  ;;  %v333_v21 = vpop.f32.mrb[0].mxu1 }
 0x11b   :  { %v328_v23 = vpop.f32.mrb[1].mxu0  ;;  %v334_v24 = vpop.f32.mrb[1].mxu1 }
 0x11c   :  { %v329_v25 = vadd.f32 %v328_v23, %v327_v20  ;;  %v330_v26 = vpop.f32.mrb[2].mxu0  ;;  %v335_v27 = vadd.f32 %v334_v24, %v333_v21  ;;  %v336_v28 = vpop.f32.mrb[2].mxu1 }
 0x11d   :  { %v331_v29 = vpop.f32.mrb[3].mxu0  ;;  %v337_v30 = vpop.f32.mrb[3].mxu1 }
 0x11e   :  { %v237_v31 = vadd.f32 %v329_v25, %v290_v22  ;;  %v245_v32 = vadd.f32 %v335_v27, %v290_v22  ;;  %v332_v33 = vadd.f32 %v331_v29, %v330_v26  ;;  %v338_v34 = vadd.f32 %v337_v30, %v336_v28 }
 0x120   :  { %251 = vst [vmem:[%s512_s3] sm:$0xff] %v237_v31  ;;  %253 = vst [vmem:[%s512_s3 + $0x10] sm:$0xff] %v245_v32  ;;  %v240_v35 = vadd.f32 %v332_v33, %v290_v22  ;;  %v248_v36 = vadd.f32 %v338_v34, %v290_v22  ;;  %v264_v37 = vmul.f32 %v237_v31, %v237_v31 }
 0x121   :  { %v266_v38 = vmul.f32 %v245_v32, %v245_v32 }
 0x122   :  { %252 = vst [vmem:[%s512_s3 + $0x8] sm:$0xff] %v240_v35  ;;  %v255_v39 = vadd.f32 %v240_v35, %v237_v31  ;;  %v265_v40 = vmul.f32 %v240_v35, %v240_v35  ;;  %254 = vst [vmem:[%s512_s3 + $0x18] sm:$0xff] %v248_v36  ;;  %v267_v44 = vmul.f32 %v248_v36, %v248_v36 }
 0x124   :  { %v268_v41 = vadd.f32 %v265_v40, %v264_v37  ;;  %v256_v42 = vadd.f32 %v255_v39, %v245_v32 }
 0x126   :  { %v257_v43 = vadd.f32 %v256_v42, %v248_v36  ;;  %v269_v45 = vadd.f32 %v268_v41, %v266_v38 }
 0x128   :  { %v258_v46 = vrot.slane %v257_v43, 4  ;;  %v270_v47 = vadd.f32 %v269_v45, %v267_v44 }
 0x12a   :  { %v259_v48 = vadd.f32 %v258_v46, %v257_v43  ;;  %v271_v49 = vrot.slane %v270_v47, 4 }
 0x12c   :  { %v260_v50 = vrot.slane %v259_v48, 2  ;;  %v272_v51 = vadd.f32 %v271_v49, %v270_v47 }
 0x12e   :  { %v261_v52 = vadd.f32 %v260_v50, %v259_v48  ;;  %v273_v53 = vrot.slane %v272_v51, 2 }
 0x130   :  { %v262_v54 = vrot.slane %v261_v52, 1  ;;  %v274_v55 = vadd.f32 %v273_v53, %v272_v51 }
 0x132   :  { %v275_v56 = vrot.slane %v274_v55, 1  ;;  %v263_v57 = vadd.f32 %v262_v54, %v261_v52 }
 0x134   :  { %v276_v58 = vadd.f32 %v275_v56, %v274_v55 }
 0x136   :  { %v278_v59 = vsel %vm277_vm0, %v263_v57, %v276_v58 }
 0x137   :  { %279 = vst [vmem:[%s513_s4] sm:$0x3] %v278_v59 }
 0x138   :  { %288 = vsyncpa [#allocation3], 1 }
 0x139   :  { %289 = vsyncpa [#allocation5], 1 }

// kernel: dcgan_decoder_forward.11
= control target key start
LH: loop header
LB: loop body
LE: loop exit
PB: predicated region body
PF: predicated region fallthrough
CT: control target
= control target key end

     0   :  { %10 = vsyncpa [#allocation3], 0  ;;  %s1509_s0 = inlined_call_operand.vmem [shape: bf16[4,32,512], index: 0, kind: input, shape index: {}]   ;;  %s1510_s1 = inlined_call_operand.hbm [shape: bf16[4,512,128], index: 1, kind: input, shape index: {}]   ;;  %s1511_s2 = inlined_call_operand.hbm [shape: f32[1,128], index: 2, kind: input, shape index: {}]   ;;  %s1512_s3 = inlined_call_operand.vmem [shape: f32[4,32,128], index: 3, kind: output, shape index: {0}]   ;;  %s1513_s4 = inlined_call_operand.vmem [shape: f32[4,1,2,128], index: 4, kind: output, shape index: {1}]  }
   0x1   :  { %12 = vsyncpa [#allocation3 + $0x1], 0 }
   0x2   :  { %13 = vsyncpa [#allocation5], 0  ;;  %s1288_s15 = smov 0   ;;  %s1290_s16 = smov 0  }
   0x3   :  { %s1292_s17 = smov 0   ;;  %s1294_s18 = smov 0  }
   0x4   :  { %s1296_s19 = smov 0   ;;  %s1298_s20 = smov 0  }
   0x5 LB: > { %s915_s21 = sadd.s32 4294967295, %s1257_s20   ;;  %s66_s22 = sadd.s32 1, %s1245_s17  ;;  %s1257_s20 = sphi %s1298_s20, %s19_s20   ;;  %s1253_s19 = sphi %s1296_s19, %s1533_s19   ;;  %s1249_s18 = sphi %s1294_s18, %s1532_s18   ;;  %s1245_s17 = sphi %s1292_s17, %s1531_s17   ;;  %s1241_s16 = sphi %s1290_s16, %s1530_s16   ;;  %s1237_s15 = sphi %s1288_s15, %s1529_s15  }
   0x6   : > { %p73_p0 = scmp.ne.s32.totalorder %s1245_s17, %s1241_s16  ;;  %p74_p1 = scmp.eq.s32.totalorder %s1257_s20, 0 }
   0x7   : > { %p79_p2 = scmp.ne.s32.totalorder %s1241_s16, %s1237_s15  ;;  %p1322_p3 = scmp.eq.s32.totalorder %s915_s21, 0 }
   0x8   : > { %p75_p4 = por %p74_p1, %p73_p0  ;;  %p917_p5 = scmp.ge.s32.totalorder %s1257_s20, 1 }
   0x9   : > { %s1519_s23 = scalar_select %p1322_p3, 1, 0 }
   0xa   : > { %p1329_p6 = por %p1322_p3, %p79_p2  ;;  %p167_p7 = scmp.lt.s32.totalorder %s1257_s20, 5 }
   0xb   : > { %s1259_s26 = smov [#allocation4]   ;;  %p1048_p10 = scmp.lt.s32.totalorder %s1257_s20, 4 }
   0xc   : > { %s1520_s24 = scalar_select %p1329_p6, 1, 0 }
   0xd   : > { %p1334_p8 = pnand %p917_p5, %p167_p7  ;;  %s180_s27 = sshll.u32 %s1259_s26, 4  ;;  %s181_s27 = int_to_ptr.vmem [resolvable:$true] %s180_s27 }
   0xe   : > { %s205_s28 = sand.u32 1, %s1245_s17   ;;  %p1348_p12 = pnand %p1048_p10, %p75_p4 }
   0xf   : > { %s1521_s25 = scalar_select %p1334_p8, 1, 0 }
  0x10   : > { %p1039_p9 = pneg %p1334_p8  ;;  %s1145_s7 = scalar_lea.hbm %s1511_s2, 16 }
  0x11   : > { %s1523_s30 = scalar_select %p1348_p12, 1, 0 }
  0x12   : > { %p1344_p11 = pnand %p1039_p9, %p1322_p3  ;;  %p1146_p13 = scmp.ne.s32.totalorder %s1511_s2, %s1145_s7 }
  0x13   : > { %p1152_p5 = scmp.lt.u32.totalorder %s1145_s7, %s1511_s2 }
  0x14   : > { %p1147_p0 = pneg %p1344_p11 }
  0x16   : > { %p1148_p1 = pnand %p1147_p0, %p1146_p13 }
  0x18   : > { %p1149_p2 = pneg %p1148_p1 }
  0x1a   : > { %p1154_p4 = pnand %p1152_p5, %p1149_p2 }
  0x1c   : > { %1157 = shalt.err (!%p1154_p4)
}
  0x1d   : > { %s1158_s12 = scalar_lea.vmem %s181_s27, 16  ;;  %s1165_s13 = scalar_lea.vmem %s181_s27, 32 }
  0x1e   : > { %p1159_p7 = scmp.ne.s32.totalorder %s181_s27, %s1158_s12  ;;  %p1166_p3 = scmp.lt.s32.totalorder %s181_s27, %s181_s27 }
  0x1f   : > { %p1167_p6 = scmp.lt.s32.totalorder %s1165_s13, %s1158_s12 }
  0x20   : > { %p1161_p9 = pnand %p1159_p7, %p1147_p0 }
  0x21   : > { %p1168_p8 = por %p1167_p6, %p1166_p3 }
  0x22   : > { %p1162_p10 = pneg %p1161_p9 }
  0x24   : > { %p1169_p12 = pnand %p1168_p8, %p1162_p10 }
  0x26   : > { %1172 = shalt.err (!%p1169_p12)
}
  0x27   : > { %1042 = dma.hbm_to_vmem [thread:$0]  (!%p1344_p11), %s1511_s2, 16, %s181_s27, [#allocation5]  }
  0x28   : > { %s31_s21 = sadd.s32 1, %s1253_s19  ;;  %s920_s26 = sshll.u32 %s205_s28, 8 }
  0x29   : > { %p33_p13 = scmp.ge.s32.totalorder %s31_s21, 4  ;;  %s974_s5 = sshll.u32 %s1253_s19, 12 }
  0x2a   : > { %s209_s6 = scalar_lea.vmem [#allocation2], %s920_s26  ;;  %s1377_s9 = scalar_lea.hbm %s1510_s1, %s974_s5 }
  0x2b   : > { %s216_s7 = sshll.u32 %s209_s6, 4  ;;  %s1535_s21 = smov (%p33_p13, %s31_s21), 0  ;;  %s1379_s7 = int_to_ptr.vmem [resolvable:$true] %s216_s7 }
  0x2c   : > { %s63_s27 = ssub.s32 %s1253_s19, %s1535_s21  ;;  %s1389_s11 = scalar_lea.sflag [#allocation3], %s205_s28 }
  0x2d   : > { %p1383_p3 = scmp.eq.s32.totalorder %s63_s27, 0  ;;  %s1173_s12 = scalar_lea.hbm %s1377_s9, 4096 }
  0x2e   : > { %p1174_p6 = scmp.ne.s32.totalorder %s1377_s9, %s1173_s12  ;;  %p1525_p8 = scmp.ne.s32.totalorder %s1523_s30, 0 }
  0x2f   : > { %s1178_s15 = scalar_lea.hbm %s1510_s1, 16384  ;;  %p1179_p1 = scmp.lt.u32.totalorder %s1377_s9, %s1510_s1 }
  0x30   : > { %p1175_p11 = pneg %p1525_p8  ;;  %p1180_p2 = scmp.lt.u32.totalorder %s1178_s15, %s1173_s12 }
  0x31   : > { %p1182_p4 = scmp.lt.u32.totalorder %s1173_s12, %s1377_s9 }
  0x32   : > { %p1176_p12 = pnand %p1175_p11, %p1174_p6  ;;  %p1181_p5 = por %p1180_p2, %p1179_p1 }
  0x34   : > { %p1177_p0 = pneg %p1176_p12  ;;  %p1183_p7 = por %p1182_p4, %p1181_p5 }
  0x36   : > { %p1184_p9 = pnand %p1183_p7, %p1177_p0 }
  0x38   : > { %1187 = shalt.err (!%p1184_p9)
}
  0x39   : > { %s1188_s28 = scalar_lea.vmem %s1379_s7, 4096  ;;  %s1260_s6 = smov [#allocation2]  }
  0x3a   : > { %p1189_p10 = scmp.ne.s32.totalorder %s1379_s7, %s1188_s28  ;;  %s1193_s29 = sshll.u32 %s1260_s6, 4  ;;  %s1194_s29 = int_to_ptr.vmem [resolvable:$false] %s1193_s29 }
  0x3b   : > { %s1195_s8 = scalar_lea.vmem %s1194_s29, 8192  ;;  %p1196_p12 = scmp.lt.s32.totalorder %s1379_s7, %s1194_s29 }
  0x3c   : > { %p1191_p13 = pnand %p1189_p10, %p1175_p11  ;;  %p1197_p1 = scmp.lt.s32.totalorder %s1195_s8, %s1188_s28 }
  0x3e   : > { %p1192_p6 = pneg %p1191_p13  ;;  %p1198_p2 = por %p1197_p1, %p1196_p12 }
  0x40   : > { %p1199_p5 = pnand %p1198_p2, %p1192_p6 }
  0x42   : > { %1202 = shalt.err (!%p1199_p5)
}
  0x43   : > { %s1261_s27 = smov 64   ;;  %s1262_s12 = smov 4  }
  0x44   : > { %1046 = dma.hbm_to_vmem [thread:$0]  (!%p1525_p8), %s1377_s9, 4096, %s1379_s7, %s1389_s11, %s1261_s27, %s1261_s27, %s1262_s12  }
  0x45   : > { %s1422_s13 = scalar_select %p1383_p3, %s1245_s17, %s66_s22  }
  0x46   : > { %p1526_p11 = scmp.ne.s32.totalorder %s1521_s25, 0 }
  0x47   : > { %s230_s14 = sand.u32 (!%p1526_p11), 1, %s1241_s16   ;;  %p1527_p0 = scmp.ne.s32.totalorder (!%p1526_p11), %s1520_s24, 0 }
  0x48   : > { %228 = sbr.rel (%p1526_p11) target bundleno = 364 (0x16c), region = 32  ;;  %s924_s15 = sshll.u32 (!%p1526_p11), %s230_s14, 8 }
  0x49   : > { %s231_s26 = scalar_lea.sflag (!%p1526_p11), [#allocation3], %s230_s14  ;;  %s1427_s5 = scalar_lea.vmem (!%p1526_p11), [#allocation2], %s924_s15 }
  0x4f   : > { %1228 = dma.done.wait (%p1527_p0), %s231_s26, 4096  }
  0x50   : > { %1230 = vsyncadd (%p1527_p0), %s231_s26, 4294963200  ;;  %p1528_p8 = scmp.ne.s32.totalorder %s1519_s23, 0 }
  0x52   : > { %1232 = dma.done.wait (%p1528_p8), [#allocation5], 16  }
  0x53   : > { %1234 = vsyncadd (%p1528_p8), [#allocation5], 4294967280  ;;  %v1101_v0 = vld [vmem:[%s1427_s5 + $0x40] sm:$0xff]   ;;  %v1105_v4 = vld [vmem:[%s1427_s5 + $0x48] sm:$0xff]   ;;  %p285_p3 = scmp.lt.s32.totalorder %s1249_s18, 3  ;;  %vm748_vm0 = vcmask 1040384  }
  0x54   : > { %v1102_v1 = vld [vmem:[%s1427_s5 + $0xc0] sm:$0xff]   ;;  %977 = vmatprep.subr.bf16.mxu0 %v1101_v0  ;;  %v1106_v5 = vld [vmem:[%s1427_s5 + $0xc8] sm:$0xff]   ;;  %v1109_v8 = vld [vmem:[%s1427_s5 + $0x50] sm:$0xff]  }
  0x55   : > { %v1103_v2 = vld [vmem:[%s1427_s5] sm:$0xff]   ;;  %1005 = vmatprep.subr.bf16.mxu1 %v1102_v1  ;;  %v1107_v6 = vld [vmem:[%s1427_s5 + $0x8] sm:$0xff]   ;;  %v1110_v9 = vld [vmem:[%s1427_s5 + $0xd0] sm:$0xff]   ;;  %s1537_s18 = smov (!%p285_p3, %s1249_s18), 3 }
  0x56   : > { %v1104_v3 = vld [vmem:[%s1427_s5 + $0x80] sm:$0xff]   ;;  %978 = vmatpush3.bf16.msra.mxu0 %v1103_v2  ;;  %v1108_v7 = vld [vmem:[%s1427_s5 + $0x88] sm:$0xff]   ;;  %v1111_v10 = vld [vmem:[%s1427_s5 + $0x10] sm:$0xff]   ;;  %s975_s22 = sshll.u32 %s1537_s18, 6  ;;  %s976_s30 = sshll.u32 %s1537_s18, 5 }
  0x57   : > { %1006 = vmatpush3.bf16.msra.mxu1 %v1104_v3  ;;  %979 = vmatprep.subr.bf16.mxu0 %v1105_v4  ;;  %v1112_v11 = vld [vmem:[%s1427_s5 + $0x90] sm:$0xff]   ;;  %v1113_v12 = vld [vmem:[%s1427_s5 + $0x58] sm:$0xff]   ;;  %v1117_v16 = vld [vmem:[%s1427_s5 + $0x60] sm:$0xff]   ;;  %s293_s25 = scalar_lea.vmem %s1509_s0, %s975_s22  ;;  %s1481_s10 = scalar_lea.vmem %s1512_s3, %s976_s30 }
  0x58   : > { %1007 = vmatprep.subr.bf16.mxu1 %v1106_v5  ;;  %v1114_v13 = vld [vmem:[%s1427_s5 + $0xd8] sm:$0xff]   ;;  %v1118_v17 = vld [vmem:[%s1427_s5 + $0xe0] sm:$0xff]   ;;  %v1121_v20 = vld [vmem:[%s1427_s5 + $0x68] sm:$0xff]   ;;  %s930_s11 = sshll.u32 %s1537_s18, 1 }
  0x59   : > { %v1115_v14 = vld [vmem:[%s1427_s5 + $0x18] sm:$0xff]   ;;  %v1119_v18 = vld [vmem:[%s1427_s5 + $0x20] sm:$0xff]   ;;  %v1122_v21 = vld [vmem:[%s1427_s5 + $0xe8] sm:$0xff]   ;;  %s311_s29 = scalar_lea.vmem %s1513_s4, %s930_s11 }
  0x5a   : > { %980 = vmatpush3.bf16.msra.mxu0 %v1107_v6  ;;  %v1116_v15 = vld [vmem:[%s1427_s5 + $0x98] sm:$0xff]   ;;  %v1120_v19 = vld [vmem:[%s1427_s5 + $0xa0] sm:$0xff]   ;;  %v1123_v22 = vld [vmem:[%s1427_s5 + $0x28] sm:$0xff]  }
  0x5b   : > { %1008 = vmatpush3.bf16.msra.mxu1 %v1108_v7  ;;  %981 = vmatprep.subr.bf16.mxu0 %v1109_v8  ;;  %v1124_v23 = vld [vmem:[%s1427_s5 + $0xa8] sm:$0xff]   ;;  %v1125_v24 = vld [vmem:[%s1427_s5 + $0x70] sm:$0xff]   ;;  %v1129_v28 = vld [vmem:[%s1427_s5 + $0x78] sm:$0xff]  }
  0x5c   : > { %1009 = vmatprep.subr.bf16.mxu1 %v1110_v9  ;;  %v1126_v25 = vld [vmem:[%s1427_s5 + $0xf0] sm:$0xff]   ;;  %v1130_v29 = vld [vmem:[%s1427_s5 + $0xf8] sm:$0xff]   ;;  %v931_v42 = vld [vmem:[#allocation4] ss:$0 sm:$0xff] }
  0x5d   : > { %v1127_v26 = vld [vmem:[%s1427_s5 + $0x30] sm:$0xff]   ;;  %v1131_v30 = vld [vmem:[%s1427_s5 + $0x38] sm:$0xff]  }
  0x5e   : > { %982 = vmatpush3.bf16.msra.mxu0 %v1111_v10  ;;  %v1128_v27 = vld [vmem:[%s1427_s5 + $0xb0] sm:$0xff]   ;;  %v1132_v31 = vld [vmem:[%s1427_s5 + $0xb8] sm:$0xff]  }
  0x5f   : > { %1010 = vmatpush3.bf16.msra.mxu1 %v1112_v11  ;;  %983 = vmatprep.subr.bf16.mxu0 %v1113_v12  ;;  %v1133_v32 = vld [vmem:[%s293_s25] ss:$16 sps:$4 sm:$0xff]   ;;  %v1135_v33 = vld [vmem:[%s293_s25 + $0x4] ss:$16 sps:$4 sm:$0xff]   ;;  %v1136_v34 = vld [vmem:[%s293_s25 + $0x8] ss:$16 sps:$4 sm:$0xff]  }
  0x60   : > { %1011 = vmatprep.subr.bf16.mxu1 %v1114_v13  ;;  %v1138_v35 = vld [vmem:[%s293_s25 + $0xc] ss:$16 sps:$4 sm:$0xff]   ;;  %656 = vmatprep.mubr.bf16.mxu0 %v1135_v33  ;;  %v1139_v36 = vld [vmem:[%s293_s25 + $0x24] ss:$16 sps:$4 sm:$0xff]   ;;  %v1143_v38 = vld [vmem:[%s293_s25 + $0x20] ss:$16 sps:$4 sm:$0xff]  }
  0x61   : > { %705 = vmatprep.mubr.bf16.mxu1 %v1138_v35  ;;  %v1141_v37 = vld [vmem:[%s293_s25 + $0x2c] ss:$16 sps:$4 sm:$0xff]   ;;  %v1144_v39 = vld [vmem:[%s293_s25 + $0x28] ss:$16 sps:$4 sm:$0xff]  }
  0x62   : > { %984 = vmatpush3.bf16.msra.mxu0 %v1115_v14 }
  0x63   : > { %1012 = vmatpush3.bf16.msra.mxu1 %v1116_v15  ;;  %985 = vmatprep.subr.bf16.mxu0 %v1117_v16 }
  0x64   : > { %1013 = vmatprep.subr.bf16.mxu1 %v1118_v17 }
  0x66   : > { %986 = vmatpush3.bf16.msra.mxu0 %v1119_v18 }
  0x67   : > { %1014 = vmatpush3.bf16.msra.mxu1 %v1120_v19  ;;  %987 = vmatprep.subr.bf16.mxu0 %v1121_v20 }
  0x68   : > { %1015 = vmatprep.subr.bf16.mxu1 %v1122_v21 }
  0x6a   : > { %988 = vmatpush3.bf16.msra.mxu0 %v1123_v22 }
  0x6b   : > { %1016 = vmatpush3.bf16.msra.mxu1 %v1124_v23  ;;  %989 = vmatprep.subr.bf16.mxu0 %v1125_v24 }
  0x6c   : > { %1017 = vmatprep.subr.bf16.mxu1 %v1126_v25 }
  0x6e   : > { %990 = vmatpush3.bf16.msra.mxu0 %v1127_v26 }
  0x6f   : > { %1018 = vmatpush3.bf16.msra.mxu1 %v1128_v27  ;;  %991 = vmatprep.subr.bf16.mxu0 %v1129_v28 }
  0x70   : > { %1019 = vmatprep.subr.bf16.mxu1 %v1130_v29 }
  0x72   : > { %992 = vmatpush3.bf16.msra.mxu0 %v1131_v30 }
  0x73   : > { %1020 = vmatpush3.bf16.msra.mxu1 %v1132_v31 }
  0x75   : > { %657 = vmatmul.mubr.bf16.vlgmr.msra.gmra.mrb[0].mxu0 %v1133_v32 }
  0x76   : > { %706 = vmatmul.mubr.bf16.vlgmr.msra.gmra.mrb[0].mxu1 %v1136_v34  ;;  %664 = vmatprep.mubr.bf16.mxu0 %v1139_v36 }
  0x77   : > { %713 = vmatprep.mubr.bf16.mxu1 %v1141_v37 }
  0x7d   : > { %665 = vmatmul.mubr.bf16.gmra.mrb[4].mxu0 %v1143_v38 }
  0x7e   : > { %714 = vmatmul.mubr.bf16.gmra.mrb[4].mxu1 %v1144_v39 }
 0x148   : > { %v993_v40 = vpop.f32.mrb[0].mxu0 }
 0x149   : > { %v1021_v41 = vpop.f32.mrb[0].mxu1  ;;  %v994_v43 = vpop.f32.mrb[1].mxu0 }
 0x14a   : > { %v995_v44 = vadd.f32 %v994_v43, %v993_v40  ;;  %v1022_v45 = vpop.f32.mrb[1].mxu1  ;;  %v996_v46 = vpop.f32.mrb[2].mxu0 }
 0x14b   : > { %v1023_v47 = vadd.f32 %v1022_v45, %v1021_v41  ;;  %v1024_v48 = vpop.f32.mrb[2].mxu1  ;;  %v997_v49 = vpop.f32.mrb[3].mxu0 }
 0x14c   : > { %v659_v50 = vadd.f32 %v995_v44, %v931_v42  ;;  %v998_v51 = vadd.f32 %v997_v49, %v996_v46  ;;  %v1025_v52 = vpop.f32.mrb[3].mxu1 }
 0x14d   : > { %v1026_v53 = vadd.f32 %v1025_v52, %v1024_v48 }
 0x14e   : > { %v708_v54 = vadd.f32 %v1023_v47, %v659_v50  ;;  %v662_v55 = vadd.f32 %v998_v51, %v931_v42 }
 0x150   : > { %722 = vst [vmem:[%s1481_s10] sm:$0xff] %v708_v54  ;;  %v711_v56 = vadd.f32 %v1026_v53, %v662_v55  ;;  %v999_v57 = vpop.f32.mrb[4].mxu0  ;;  %v735_v60 = vmul.f32 %v708_v54, %v708_v54 }
 0x151   : > { %v1027_v58 = vpop.f32.mrb[4].mxu1  ;;  %v1000_v59 = vpop.f32.mrb[5].mxu0 }
 0x152   : > { %723 = vst [vmem:[%s1481_s10 + $0x8] sm:$0xff] %v711_v56  ;;  %v726_v61 = vadd.f32 %v711_v56, %v708_v54  ;;  %v736_v62 = vmul.f32 %v711_v56, %v711_v56  ;;  %v1001_v63 = vadd.f32 %v1000_v59, %v999_v57  ;;  %v1028_v0 = vpop.f32.mrb[5].mxu1  ;;  %v1002_v1 = vpop.f32.mrb[6].mxu0 }
 0x153   : > { %v1029_v2 = vadd.f32 %v1028_v0, %v1027_v58  ;;  %v1030_v3 = vpop.f32.mrb[6].mxu1  ;;  %v1003_v4 = vpop.f32.mrb[7].mxu0 }
 0x154   : > { %v739_v5 = vadd.f32 %v736_v62, %v735_v60  ;;  %v667_v6 = vadd.f32 %v1001_v63, %v931_v42  ;;  %v1004_v7 = vadd.f32 %v1003_v4, %v1002_v1  ;;  %v1031_v8 = vpop.f32.mrb[7].mxu1 }
 0x155   : > { %v1032_v9 = vadd.f32 %v1031_v8, %v1030_v3 }
 0x156   : > { %v716_v10 = vadd.f32 %v1029_v2, %v667_v6  ;;  %v670_v11 = vadd.f32 %v1004_v7, %v931_v42 }
 0x158   : > { %724 = vst [vmem:[%s1481_s10 + $0x10] sm:$0xff] %v716_v10  ;;  %v727_v12 = vadd.f32 %v726_v61, %v716_v10  ;;  %v737_v13 = vmul.f32 %v716_v10, %v716_v10  ;;  %v719_v14 = vadd.f32 %v1032_v9, %v670_v11 }
 0x15a   : > { %v740_v15 = vadd.f32 %v739_v5, %v737_v13  ;;  %725 = vst [vmem:[%s1481_s10 + $0x18] sm:$0xff] %v719_v14  ;;  %v728_v16 = vadd.f32 %v727_v12, %v719_v14  ;;  %v738_v17 = vmul.f32 %v719_v14, %v719_v14 }
 0x15c   : > { %v729_v18 = vrot.slane %v728_v16, 4  ;;  %v741_v19 = vadd.f32 %v740_v15, %v738_v17 }
 0x15e   : > { %v730_v20 = vadd.f32 %v729_v18, %v728_v16  ;;  %v742_v21 = vrot.slane %v741_v19, 4 }
 0x160   : > { %v731_v22 = vrot.slane %v730_v20, 2  ;;  %v743_v23 = vadd.f32 %v742_v21, %v741_v19 }
 0x162   : > { %v732_v24 = vadd.f32 %v731_v22, %v730_v20  ;;  %v744_v25 = vrot.slane %v743_v23, 2 }
 0x164   : > { %v733_v26 = vrot.slane %v732_v24, 1  ;;  %v745_v27 = vadd.f32 %v744_v25, %v743_v23 }
 0x166   : > { %v746_v28 = vrot.slane %v745_v27, 1  ;;  %v734_v29 = vadd.f32 %v733_v26, %v732_v24 }
 0x168   : > { %v747_v30 = vadd.f32 %v746_v28, %v745_v27 }
 0x16a   : > { %v749_v31 = vsel %vm748_vm0, %v734_v29, %v747_v30 }
 0x16b   : > { %750 = vst [vmem:[%s311_s29] sm:$0x3] %v749_v31 }
 0x16c PF: > { %s19_s20 = sadd.s32 1, %s1257_s20   ;;  %s1529_s15 = smov %s1241_s16 }
 0x16d   : > { %p16_p4 = scmp.ge.s32.totalorder %s19_s20, 6   ;;  %s1530_s16 = smov %s1245_s17 }
 0x16e   : > { %s1531_s17 = smov %s1422_s13  ;;  %s1532_s18 = smov %s1253_s19 }
 0x16f   : > { %s1533_s19 = smov %s1535_s21  ;;  %18 = sbr.rel (!%p16_p4) target bundleno = 5 (0x5), region = 91 }
 0x176   :  { %801 = vsyncpa [#allocation3], 1 }
 0x177   :  { %803 = vsyncpa [#allocation3 + $0x1], 1 }
 0x178   :  { %804 = vsyncpa [#allocation5], 1 }

// kernel: dcgan_decoder_forward.12
= control target key start
LH: loop header
LB: loop body
LE: loop exit
PB: predicated region body
PF: predicated region fallthrough
CT: control target
= control target key end

     0   :  { %s453_s12 = smov 0   ;;  %s455_s13 = smov 0   ;;  %s492_s0 = inlined_call_operand.vmem [shape: f32[4,32,128], index: 0, kind: input, shape index: {}]   ;;  %s493_s1 = inlined_call_operand.vmem [shape: f32[1,128], index: 1, kind: input, shape index: {}]   ;;  %s494_s2 = inlined_call_operand.vmem [shape: f32[1,128], index: 2, kind: input, shape index: {}]   ;;  %s495_s3 = inlined_call_operand.vmem [shape: bf16[4,32,128], index: 3, kind: output, shape index: {}]  }
   0x1   :  { %s457_s14 = smov 0  }
   0x2 LB: > { %s25_s15 = sadd.s32 1, %s427_s13  ;;  %p355_p0 = scmp.ge.s32.totalorder %s431_s14, 1  ;;  %s431_s14 = sphi %s457_s14, %s13_s14   ;;  %s427_s13 = sphi %s455_s13, %s497_s13   ;;  %s423_s12 = sphi %s453_s12, %s496_s12  }
   0x3   : > { %p27_p1 = scmp.ge.s32.totalorder %s25_s15, 4  ;;  %p158_p2 = scmp.lt.s32.totalorder %s431_s14, 5 }
   0x5   : > { %s499_s15 = smov (%p27_p1, %s25_s15), 0  ;;  %p159_p3 = pnand %p355_p0, %p158_p2 }
   0x6   : > { %p191_p4 = scmp.lt.s32.totalorder (!%p159_p3), %s423_s12, 3  ;;  %v360_v0 = vld [vmem:[%s493_s1] ss:$0 sm:$0xff] (!%p159_p3) }
   0x7   : > { %162 = sbr.rel (%p159_p3) target bundleno = 30 (0x1e), region = 32  ;;  %v361_v1 = vld [vmem:[%s494_s2] ss:$0 sm:$0xff] (!%p159_p3) }
   0xe   : > { %s501_s12 = smov (!%p191_p4, %s423_s12), 3 }
   0xf   : > { %s368_s16 = sshll.u32 %s501_s12, 5  ;;  %s369_s24 = sshll.u32 %s501_s12, 4 }
  0x10   : > { %s198_s21 = scalar_lea.vmem %s492_s0, %s368_s16  ;;  %s208_s27 = scalar_lea.vmem %s495_s3, %s369_s24 }
  0x11   : > { %v210_v2 = vld [vmem:[%s198_s21] sm:$0xff]  ;;  %v211_v3 = vld [vmem:[%s198_s21 + $0x8] sm:$0xff]  ;;  %v212_v4 = vld [vmem:[%s198_s21 + $0x10] sm:$0xff] }
  0x12   : > { %v221_v5 = vmul.f32 %v360_v0, %v210_v2  ;;  %v222_v6 = vmul.f32 %v360_v0, %v211_v3  ;;  %v213_v7 = vld [vmem:[%s198_s21 + $0x18] sm:$0xff]  ;;  %v223_v8 = vmul.f32 %v360_v0, %v212_v4 }
  0x13   : > { %v224_v9 = vmul.f32 %v360_v0, %v213_v7 }
  0x14   : > { %v232_v10 = vadd.f32 %v361_v1, %v221_v5  ;;  %v233_v11 = vadd.f32 %v361_v1, %v222_v6  ;;  %v234_v12 = vadd.f32 %v361_v1, %v223_v8 }
  0x15   : > { %v235_v13 = vadd.f32 %v361_v1, %v224_v9 }
  0x16   : > { %v236_v14 = vmul.f32 0.2, %v232_v10  ;;  %v237_v15 = vmul.f32 0.2, %v233_v11  ;;  %v238_v16 = vmul.f32 0.2, %v234_v12 }
  0x17   : > { %v239_v17 = vmul.f32 0.2, %v235_v13 }
  0x18   : > { %v240_v18 = vmax.f32 %v232_v10, %v236_v14  ;;  %v241_v19 = vmax.f32 %v233_v11, %v237_v15  ;;  %v242_v20 = vmax.f32 %v234_v12, %v238_v16 }
  0x19   : > { %v243_v21 = vmax.f32 %v235_v13, %v239_v17 }
  0x1a   : > { %v377_v22 = vpack.c.bf16 %v241_v19, %v240_v18 }
  0x1b   : > { %v382_v23 = vpack.c.bf16 %v243_v21, %v242_v20 }
  0x1c   : > { %378 = vst [vmem:[%s208_s27] sm:$0xff] %v377_v22  }
  0x1d   : > { %384 = vst [vmem:[%s208_s27 + $0x8] sm:$0xff] %v382_v23  }
  0x1e PF: > { %s13_s14 = sadd.s32 1, %s431_s14   ;;  %s496_s12 = smov %s427_s13 }
  0x1f   : > { %p10_p5 = scmp.ge.s32.totalorder %s13_s14, 6   ;;  %s497_s13 = smov %s499_s15 }
  0x21   :  { %12 = sbr.rel (!%p10_p5) target bundleno = 2 (0x2), region = 62 }

// kernel: dcgan_decoder_forward.13
= control target key start
LH: loop header
LB: loop body
LE: loop exit
PB: predicated region body
PF: predicated region fallthrough
CT: control target
= control target key end

     0   :  { %s1071_s15 = smov 0   ;;  %s1073_s16 = smov 0   ;;  %s1218_s0 = inlined_call_operand.vmem [shape: bf16[4,128,256], index: 0, kind: input, shape index: {}]   ;;  %s1219_s1 = inlined_call_operand.vmem [shape: bf16[4,256,128], index: 1, kind: input, shape index: {}]   ;;  %s1220_s2 = inlined_call_operand.vmem [shape: f32[1,128], index: 2, kind: input, shape index: {}]   ;;  %s1221_s3 = inlined_call_operand.vmem [shape: f32[4,128,128], index: 3, kind: output, shape index: {0}]   ;;  %s1222_s4 = inlined_call_operand.vmem [shape: f32[4,1,2,128], index: 4, kind: output, shape index: {1}]  }
   0x1   :  { %s1075_s17 = smov 0  }
   0x2 LB: > { %s27_s18 = sadd.s32 1, %s1040_s16  ;;  %p832_p0 = scmp.ge.s32.totalorder %s1044_s17, 1  ;;  %s1044_s17 = sphi %s1075_s17, %s15_s17   ;;  %s1040_s16 = sphi %s1073_s16, %s1224_s16   ;;  %s1036_s15 = sphi %s1071_s15, %s1223_s15  }
   0x3   : > { %p29_p1 = scmp.ge.s32.totalorder %s27_s18, 4  ;;  %p199_p2 = scmp.lt.s32.totalorder %s1044_s17, 5 }
   0x5   : > { %s1226_s18 = smov (%p29_p1, %s27_s18), 0  ;;  %p200_p3 = pnand %p832_p0, %p199_p2 }
   0x6   : > { %p247_p4 = scmp.lt.s32.totalorder (!%p200_p3), %s1036_s15, 3  ;;  %v1141_v34 = vld [vmem:[%s1220_s2] ss:$0 sm:$0xff] (!%p200_p3)  ;;  %vm682_vm0 = vcmask (!%p200_p3), 1040384  }
   0x7   : > { %203 = sbr.rel (%p200_p3) target bundleno = 327 (0x147), region = 32 }
   0xe   : > { %s1228_s15 = smov (!%p247_p4, %s1036_s15), 3 }
   0xf   : > { %s1092_s19 = sshll.u32 %s1228_s15, 7  ;;  %s839_s5 = sshll.u32 %s1228_s15, 1 }
  0x10   : > { %s1098_s22 = scalar_lea.vmem %s1219_s1, %s1092_s19  ;;  %s1113_s25 = scalar_lea.vmem %s1218_s0, %s1092_s19 }
  0x11   : > { %v982_v0 = vld [vmem:[%s1098_s22 + $0x40] sm:$0xff]   ;;  %v984_v2 = vld [vmem:[%s1098_s22 + $0x48] sm:$0xff]   ;;  %v986_v4 = vld [vmem:[%s1098_s22 + $0x50] sm:$0xff]   ;;  %s1147_s30 = scalar_lea.vmem %s1221_s3, %s1092_s19  ;;  %s278_s8 = scalar_lea.vmem %s1222_s4, %s839_s5 }
  0x12   : > { %v983_v1 = vld [vmem:[%s1098_s22] sm:$0xff]   ;;  %878 = vmatprep.subr.bf16.mxu0 %v982_v0  ;;  %942 = vmatprep.subr.bf16.mxu1 %v982_v0  ;;  %v985_v3 = vld [vmem:[%s1098_s22 + $0x8] sm:$0xff]   ;;  %v987_v5 = vld [vmem:[%s1098_s22 + $0x10] sm:$0xff]  }
  0x13   : > { %879 = vmatpush3.bf16.msra.mxu0 %v983_v1  ;;  %950 = vmatpush3.bf16.msra.mxu1 %v983_v1  ;;  %v988_v6 = vld [vmem:[%s1098_s22 + $0x58] sm:$0xff]   ;;  %v990_v8 = vld [vmem:[%s1098_s22 + $0x60] sm:$0xff]   ;;  %v992_v10 = vld [vmem:[%s1098_s22 + $0x68] sm:$0xff]  }
  0x14   : > { %880 = vmatprep.subr.bf16.mxu0 %v984_v2  ;;  %943 = vmatprep.subr.bf16.mxu1 %v984_v2  ;;  %v989_v7 = vld [vmem:[%s1098_s22 + $0x18] sm:$0xff]   ;;  %v991_v9 = vld [vmem:[%s1098_s22 + $0x20] sm:$0xff]   ;;  %v993_v12 = vld [vmem:[%s1098_s22 + $0x28] sm:$0xff]  }
  0x15   : > { %v1000_v11 = vld [vmem:[%s1113_s25 + $0x4] ss:$8 sps:$4 sm:$0xff]   ;;  %v994_v14 = vld [vmem:[%s1098_s22 + $0x70] sm:$0xff]   ;;  %v996_v16 = vld [vmem:[%s1098_s22 + $0x78] sm:$0xff]  }
  0x16   : > { %v1006_v13 = vld [vmem:[%s1113_s25 + $0x44] ss:$8 sps:$4 sm:$0xff]   ;;  %543 = vmatprep.mubr.bf16.mxu0 %v1000_v11  ;;  %v995_v15 = vld [vmem:[%s1098_s22 + $0x30] sm:$0xff]   ;;  %v997_v17 = vld [vmem:[%s1098_s22 + $0x38] sm:$0xff]  }
  0x17   : > { %881 = vmatpush3.bf16.msra.mxu0 %v985_v3  ;;  %951 = vmatpush3.bf16.msra.mxu1 %v985_v3  ;;  %v998_v18 = vld [vmem:[%s1113_s25] ss:$8 sps:$4 sm:$0xff]   ;;  %v1001_v20 = vld [vmem:[%s1113_s25 + $0x14] ss:$8 sps:$4 sm:$0xff]   ;;  %v1003_v22 = vld [vmem:[%s1113_s25 + $0x10] ss:$8 sps:$4 sm:$0xff]  }
  0x18   : > { %882 = vmatprep.subr.bf16.mxu0 %v986_v4  ;;  %944 = vmatprep.subr.bf16.mxu1 %v986_v4  ;;  %v1004_v19 = vld [vmem:[%s1113_s25 + $0x40] ss:$8 sps:$4 sm:$0xff]   ;;  %v1010_v21 = vld [vmem:[%s1113_s25 + $0x54] ss:$8 sps:$4 sm:$0xff]   ;;  %v1012_v23 = vld [vmem:[%s1113_s25 + $0x50] ss:$8 sps:$4 sm:$0xff]  }
  0x19   : > { %575 = vmatprep.mubr.bf16.mxu1 %v1006_v13  ;;  %v1007_v24 = vld [vmem:[%s1113_s25 + $0x24] ss:$8 sps:$4 sm:$0xff]   ;;  %v1009_v26 = vld [vmem:[%s1113_s25 + $0x20] ss:$8 sps:$4 sm:$0xff]   ;;  %v1013_v28 = vld [vmem:[%s1113_s25 + $0x34] ss:$8 sps:$4 sm:$0xff]  }
  0x1a   : > { %v1016_v25 = vld [vmem:[%s1113_s25 + $0x64] ss:$8 sps:$4 sm:$0xff]   ;;  %v1018_v27 = vld [vmem:[%s1113_s25 + $0x60] ss:$8 sps:$4 sm:$0xff]   ;;  %v1019_v29 = vld [vmem:[%s1113_s25 + $0x74] ss:$8 sps:$4 sm:$0xff]  }
  0x1b   : > { %883 = vmatpush3.bf16.msra.mxu0 %v987_v5  ;;  %952 = vmatpush3.bf16.msra.mxu1 %v987_v5  ;;  %v1015_v30 = vld [vmem:[%s1113_s25 + $0x30] ss:$8 sps:$4 sm:$0xff]  }
  0x1c   : > { %884 = vmatprep.subr.bf16.mxu0 %v988_v6  ;;  %945 = vmatprep.subr.bf16.mxu1 %v988_v6  ;;  %v1021_v31 = vld [vmem:[%s1113_s25 + $0x70] ss:$8 sps:$4 sm:$0xff]  }
  0x1f   : > { %885 = vmatpush3.bf16.msra.mxu0 %v989_v7  ;;  %953 = vmatpush3.bf16.msra.mxu1 %v989_v7 }
  0x20   : > { %886 = vmatprep.subr.bf16.mxu0 %v990_v8  ;;  %946 = vmatprep.subr.bf16.mxu1 %v990_v8 }
  0x23   : > { %887 = vmatpush3.bf16.msra.mxu0 %v991_v9  ;;  %954 = vmatpush3.bf16.msra.mxu1 %v991_v9 }
  0x24   : > { %888 = vmatprep.subr.bf16.mxu0 %v992_v10  ;;  %947 = vmatprep.subr.bf16.mxu1 %v992_v10 }
  0x27   : > { %889 = vmatpush3.bf16.msra.mxu0 %v993_v12  ;;  %955 = vmatpush3.bf16.msra.mxu1 %v993_v12 }
  0x28   : > { %890 = vmatprep.subr.bf16.mxu0 %v994_v14  ;;  %948 = vmatprep.subr.bf16.mxu1 %v994_v14 }
  0x2b   : > { %891 = vmatpush3.bf16.msra.mxu0 %v995_v15  ;;  %956 = vmatpush3.bf16.msra.mxu1 %v995_v15 }
  0x2c   : > { %892 = vmatprep.subr.bf16.mxu0 %v996_v16  ;;  %949 = vmatprep.subr.bf16.mxu1 %v996_v16 }
  0x2f   : > { %893 = vmatpush3.bf16.msra.mxu0 %v997_v17  ;;  %957 = vmatpush3.bf16.msra.mxu1 %v997_v17 }
  0x32   : > { %544 = vmatmul.mubr.bf16.vlgmr.msra.gmra.mrb[0].mxu0 %v998_v18  ;;  %576 = vmatmul.mubr.bf16.vlgmr.msra.gmra.mrb[0].mxu1 %v1004_v19 }
  0x33   : > { %551 = vmatprep.mubr.bf16.mxu0 %v1001_v20  ;;  %583 = vmatprep.mubr.bf16.mxu1 %v1010_v21 }
  0x3a   : > { %552 = vmatmul.mubr.bf16.gmra.mrb[4].mxu0 %v1003_v22  ;;  %584 = vmatmul.mubr.bf16.gmra.mrb[4].mxu1 %v1012_v23 }
  0x3b   : > { %559 = vmatprep.mubr.bf16.mxu0 %v1007_v24  ;;  %591 = vmatprep.mubr.bf16.mxu1 %v1016_v25 }
  0x42   : > { %560 = vmatmul.mubr.bf16.gmra.mrb[8].mxu0 %v1009_v26  ;;  %592 = vmatmul.mubr.bf16.gmra.mrb[8].mxu1 %v1018_v27 }
  0x43   : > { %567 = vmatprep.mubr.bf16.mxu0 %v1013_v28  ;;  %599 = vmatprep.mubr.bf16.mxu1 %v1019_v29 }
  0x4a   : > { %568 = vmatmul.mubr.bf16.gmra.mrb[12].mxu0 %v1015_v30  ;;  %600 = vmatmul.mubr.bf16.gmra.mrb[12].mxu1 %v1021_v31 }
 0x105   : > { %v894_v32 = vpop.f32.mrb[0].mxu0  ;;  %v918_v33 = vpop.f32.mrb[0].mxu1 }
 0x106   : > { %v895_v35 = vpop.f32.mrb[1].mxu0  ;;  %v919_v36 = vpop.f32.mrb[1].mxu1 }
 0x107   : > { %v896_v37 = vadd.f32 %v895_v35, %v894_v32  ;;  %v897_v38 = vpop.f32.mrb[2].mxu0  ;;  %v920_v39 = vadd.f32 %v919_v36, %v918_v33  ;;  %v921_v40 = vpop.f32.mrb[2].mxu1 }
 0x108   : > { %v898_v41 = vpop.f32.mrb[3].mxu0  ;;  %v922_v42 = vpop.f32.mrb[3].mxu1 }
 0x109   : > { %v546_v43 = vadd.f32 %v896_v37, %v1141_v34  ;;  %v899_v44 = vadd.f32 %v898_v41, %v897_v38  ;;  %v1151_v45 = vadd.f32 %v920_v39, %v1141_v34  ;;  %v923_v46 = vadd.f32 %v922_v42, %v921_v40 }
 0x10b   : > { %608 = vst [vmem:[%s1147_s30] sm:$0xff] %v546_v43  ;;  %v549_v47 = vadd.f32 %v899_v44, %v1141_v34  ;;  %616 = vst [vmem:[%s1147_s30 + $0x40] sm:$0xff] %v1151_v45  ;;  %v1158_v48 = vadd.f32 %v923_v46, %v1141_v34  ;;  %v645_v49 = vmul.f32 %v546_v43, %v546_v43 }
 0x10d   : > { %609 = vst [vmem:[%s1147_s30 + $0x8] sm:$0xff] %v549_v47  ;;  %v624_v50 = vadd.f32 %v549_v47, %v546_v43  ;;  %v646_v51 = vmul.f32 %v549_v47, %v549_v47  ;;  %v900_v52 = vpop.f32.mrb[4].mxu0  ;;  %617 = vst [vmem:[%s1147_s30 + $0x48] sm:$0xff] %v1158_v48  ;;  %v924_v53 = vpop.f32.mrb[4].mxu1 }
 0x10e   : > { %v901_v54 = vpop.f32.mrb[5].mxu0  ;;  %v925_v55 = vpop.f32.mrb[5].mxu1 }
 0x10f   : > { %v661_v56 = vadd.f32 %v646_v51, %v645_v49  ;;  %v902_v57 = vadd.f32 %v901_v54, %v900_v52  ;;  %v903_v58 = vpop.f32.mrb[6].mxu0  ;;  %v926_v59 = vadd.f32 %v925_v55, %v924_v53  ;;  %v927_v60 = vpop.f32.mrb[6].mxu1 }
 0x110   : > { %v904_v61 = vpop.f32.mrb[7].mxu0  ;;  %v928_v62 = vpop.f32.mrb[7].mxu1 }
 0x111   : > { %v554_v63 = vadd.f32 %v902_v57, %v1141_v34  ;;  %v905_v0 = vadd.f32 %v904_v61, %v903_v58  ;;  %v1165_v1 = vadd.f32 %v926_v59, %v1141_v34  ;;  %v929_v2 = vadd.f32 %v928_v62, %v927_v60 }
 0x112   : > { %v653_v57 = vmul.f32 %v1151_v45, %v1151_v45  ;;  %v654_v60 = vmul.f32 %v1158_v48, %v1158_v48 }
 0x113   : > { %610 = vst [vmem:[%s1147_s30 + $0x10] sm:$0xff] %v554_v63  ;;  %v625_v3 = vadd.f32 %v624_v50, %v554_v63  ;;  %v647_v4 = vmul.f32 %v554_v63, %v554_v63  ;;  %v557_v5 = vadd.f32 %v905_v0, %v1141_v34  ;;  %618 = vst [vmem:[%s1147_s30 + $0x50] sm:$0xff] %v1165_v1 }
 0x114   : > { %v1172_v6 = vadd.f32 %v929_v2, %v1141_v34 }
 0x115   : > { %v662_v7 = vadd.f32 %v661_v56, %v647_v4  ;;  %611 = vst [vmem:[%s1147_s30 + $0x18] sm:$0xff] %v557_v5  ;;  %v626_v8 = vadd.f32 %v625_v3, %v557_v5  ;;  %v648_v9 = vmul.f32 %v557_v5, %v557_v5  ;;  %v906_v10 = vpop.f32.mrb[8].mxu0  ;;  %v930_v11 = vpop.f32.mrb[8].mxu1 }
 0x116   : > { %v907_v12 = vpop.f32.mrb[9].mxu0  ;;  %619 = vst [vmem:[%s1147_s30 + $0x58] sm:$0xff] %v1172_v6  ;;  %v931_v13 = vpop.f32.mrb[9].mxu1  ;;  %v656_v2 = vmul.f32 %v1172_v6, %v1172_v6 }
 0x117   : > { %v663_v14 = vadd.f32 %v662_v7, %v648_v9  ;;  %v908_v15 = vadd.f32 %v907_v12, %v906_v10  ;;  %v909_v16 = vpop.f32.mrb[10].mxu0  ;;  %v932_v17 = vadd.f32 %v931_v13, %v930_v11  ;;  %v933_v18 = vpop.f32.mrb[10].mxu1 }
 0x118   : > { %v910_v19 = vpop.f32.mrb[11].mxu0  ;;  %v934_v20 = vpop.f32.mrb[11].mxu1 }
 0x119   : > { %v562_v21 = vadd.f32 %v908_v15, %v1141_v34  ;;  %v911_v22 = vadd.f32 %v910_v19, %v909_v16  ;;  %v594_v23 = vadd.f32 %v932_v17, %v1141_v34  ;;  %v935_v24 = vadd.f32 %v934_v20, %v933_v18 }
 0x11b   : > { %612 = vst [vmem:[%s1147_s30 + $0x20] sm:$0xff] %v562_v21  ;;  %v627_v25 = vadd.f32 %v626_v8, %v562_v21  ;;  %v649_v26 = vmul.f32 %v562_v21, %v562_v21  ;;  %v565_v27 = vadd.f32 %v911_v22, %v1141_v34  ;;  %620 = vst [vmem:[%s1147_s30 + $0x60] sm:$0xff] %v594_v23 }
 0x11c   : > { %v597_v28 = vadd.f32 %v935_v24, %v1141_v34  ;;  %v657_v5 = vmul.f32 %v594_v23, %v594_v23 }
 0x11d   : > { %v664_v29 = vadd.f32 %v663_v14, %v649_v26  ;;  %613 = vst [vmem:[%s1147_s30 + $0x28] sm:$0xff] %v565_v27  ;;  %v628_v30 = vadd.f32 %v627_v25, %v565_v27  ;;  %v650_v31 = vmul.f32 %v565_v27, %v565_v27  ;;  %v912_v32 = vpop.f32.mrb[12].mxu0  ;;  %v936_v33 = vpop.f32.mrb[12].mxu1 }
 0x11e   : > { %v913_v35 = vpop.f32.mrb[13].mxu0  ;;  %621 = vst [vmem:[%s1147_s30 + $0x68] sm:$0xff] %v597_v28  ;;  %v937_v36 = vpop.f32.mrb[13].mxu1  ;;  %v658_v10 = vmul.f32 %v597_v28, %v597_v28 }
 0x11f   : > { %v665_v37 = vadd.f32 %v664_v29, %v650_v31  ;;  %v914_v38 = vadd.f32 %v913_v35, %v912_v32  ;;  %v915_v39 = vpop.f32.mrb[14].mxu0  ;;  %v938_v40 = vadd.f32 %v937_v36, %v936_v33  ;;  %v939_v41 = vpop.f32.mrb[14].mxu1 }
 0x120   : > { %v916_v42 = vpop.f32.mrb[15].mxu0  ;;  %v940_v43 = vpop.f32.mrb[15].mxu1 }
 0x121   : > { %v570_v44 = vadd.f32 %v914_v38, %v1141_v34  ;;  %v917_v46 = vadd.f32 %v916_v42, %v915_v39  ;;  %v602_v47 = vadd.f32 %v938_v40, %v1141_v34  ;;  %v941_v49 = vadd.f32 %v940_v43, %v939_v41 }
 0x123   : > { %614 = vst [vmem:[%s1147_s30 + $0x30] sm:$0xff] %v570_v44  ;;  %v629_v50 = vadd.f32 %v628_v30, %v570_v44  ;;  %v651_v51 = vmul.f32 %v570_v44, %v570_v44  ;;  %v573_v52 = vadd.f32 %v917_v46, %v1141_v34  ;;  %622 = vst [vmem:[%s1147_s30 + $0x70] sm:$0xff] %v602_v47 }
 0x124   : > { %v605_v53 = vadd.f32 %v941_v49, %v1141_v34  ;;  %v655_v34 = vmul.f32 %v1165_v1, %v1165_v1 }
 0x125   : > { %v666_v54 = vadd.f32 %v665_v37, %v651_v51  ;;  %615 = vst [vmem:[%s1147_s30 + $0x38] sm:$0xff] %v573_v52  ;;  %v630_v55 = vadd.f32 %v629_v50, %v573_v52  ;;  %v652_v56 = vmul.f32 %v573_v52, %v573_v52 }
 0x126   : > { %623 = vst [vmem:[%s1147_s30 + $0x78] sm:$0xff] %v605_v53  ;;  %v660_v15 = vmul.f32 %v605_v53, %v605_v53 }
 0x127   : > { %v631_v58 = vadd.f32 %v630_v55, %v1151_v45  ;;  %v667_v59 = vadd.f32 %v666_v54, %v652_v56 }
 0x129   : > { %v632_v61 = vadd.f32 %v631_v58, %v1158_v48  ;;  %v668_v62 = vadd.f32 %v667_v59, %v653_v57  ;;  %v659_v48 = vmul.f32 %v602_v47, %v602_v47 }
 0x12b   : > { %v669_v63 = vadd.f32 %v668_v62, %v654_v60  ;;  %v633_v0 = vadd.f32 %v632_v61, %v1165_v1 }
 0x12d   : > { %v634_v3 = vadd.f32 %v633_v0, %v1172_v6  ;;  %v670_v4 = vadd.f32 %v669_v63, %v655_v34 }
 0x12f   : > { %v635_v45 = vadd.f32 %v634_v3, %v594_v23  ;;  %v671_v7 = vadd.f32 %v670_v4, %v656_v2 }
 0x131   : > { %v672_v8 = vadd.f32 %v671_v7, %v657_v5  ;;  %v636_v9 = vadd.f32 %v635_v45, %v597_v28 }
 0x133   : > { %v673_v11 = vadd.f32 %v672_v8, %v658_v10  ;;  %v637_v12 = vadd.f32 %v636_v9, %v602_v47 }
 0x135   : > { %v674_v13 = vadd.f32 %v673_v11, %v659_v48  ;;  %v638_v14 = vadd.f32 %v637_v12, %v605_v53 }
 0x137   : > { %v639_v1 = vrot.slane %v638_v14, 4  ;;  %v675_v16 = vadd.f32 %v674_v13, %v660_v15 }
 0x139   : > { %v640_v17 = vadd.f32 %v639_v1, %v638_v14  ;;  %v676_v18 = vrot.slane %v675_v16, 4 }
 0x13b   : > { %v641_v19 = vrot.slane %v640_v17, 2  ;;  %v677_v6 = vadd.f32 %v676_v18, %v675_v16 }
 0x13d   : > { %v642_v20 = vadd.f32 %v641_v19, %v640_v17  ;;  %v678_v21 = vrot.slane %v677_v6, 2 }
 0x13f   : > { %v643_v22 = vrot.slane %v642_v20, 1  ;;  %v679_v23 = vadd.f32 %v678_v21, %v677_v6 }
 0x141   : > { %v680_v24 = vrot.slane %v679_v23, 1  ;;  %v644_v25 = vadd.f32 %v643_v22, %v642_v20 }
 0x143   : > { %v681_v26 = vadd.f32 %v680_v24, %v679_v23 }
 0x145   : > { %v683_v27 = vsel %vm682_vm0, %v644_v25, %v681_v26 }
 0x146   : > { %684 = vst [vmem:[%s278_s8] sm:$0x3] %v683_v27 }
 0x147 PF: > { %s15_s17 = sadd.s32 1, %s1044_s17   ;;  %s1223_s15 = smov %s1040_s16 }
 0x148   : > { %p12_p5 = scmp.ge.s32.totalorder %s15_s17, 6   ;;  %s1224_s16 = smov %s1226_s18 }
 0x14a   :  { %14 = sbr.rel (!%p12_p5) target bundleno = 2 (0x2), region = 77 }

// kernel: dcgan_decoder_forward.14
= control target key start
LH: loop header
LB: loop body
LE: loop exit
PB: predicated region body
PF: predicated region fallthrough
CT: control target
= control target key end

     0   :  { %s633_s12 = smov 0   ;;  %s635_s13 = smov 0   ;;  %s740_s0 = inlined_call_operand.vmem [shape: f32[4,128,128], index: 0, kind: input, shape index: {}]   ;;  %s741_s1 = inlined_call_operand.vmem [shape: f32[1,128], index: 1, kind: input, shape index: {}]   ;;  %s742_s2 = inlined_call_operand.vmem [shape: f32[1,128], index: 2, kind: input, shape index: {}]   ;;  %s743_s3 = inlined_call_operand.vmem [shape: bf16[4,128,128], index: 3, kind: output, shape index: {}]  }
   0x1   :  { %s637_s14 = smov 0  }
   0x2 LB: > { %s25_s15 = sadd.s32 1, %s607_s13  ;;  %p475_p0 = scmp.ge.s32.totalorder %s611_s14, 1  ;;  %s611_s14 = sphi %s637_s14, %s13_s14   ;;  %s607_s13 = sphi %s635_s13, %s745_s13   ;;  %s603_s12 = sphi %s633_s12, %s744_s12  }
   0x3   : > { %p27_p1 = scmp.ge.s32.totalorder %s25_s15, 4  ;;  %p158_p2 = scmp.lt.s32.totalorder %s611_s14, 5 }
   0x5   : > { %s747_s15 = smov (%p27_p1, %s25_s15), 0  ;;  %p159_p3 = pnand %p475_p0, %p158_p2 }
   0x6   : > { %p191_p4 = scmp.lt.s32.totalorder (!%p159_p3), %s603_s12, 3  ;;  %v657_v0 = vld [vmem:[%s741_s1] ss:$0 sm:$0xff] (!%p159_p3) }
   0x7   : > { %162 = sbr.rel (%p159_p3) target bundleno = 42 (0x2a), region = 32  ;;  %v667_v1 = vld [vmem:[%s742_s2] ss:$0 sm:$0xff] (!%p159_p3) }
   0xe   : > { %s749_s12 = smov (!%p191_p4, %s603_s12), 3 }
   0xf   : > { %s500_s16 = sshll.u32 %s749_s12, 7  ;;  %s501_s24 = sshll.u32 %s749_s12, 6 }
  0x10   : > { %s662_s21 = scalar_lea.vmem %s740_s0, %s500_s16  ;;  %s700_s27 = scalar_lea.vmem %s743_s3, %s501_s24 }
  0x11   : > { %v210_v2 = vld [vmem:[%s662_s21] sm:$0xff]  ;;  %v211_v3 = vld [vmem:[%s662_s21 + $0x8] sm:$0xff]  ;;  %v212_v4 = vld [vmem:[%s662_s21 + $0x10] sm:$0xff] }
  0x12   : > { %v233_v5 = vmul.f32 %v657_v0, %v210_v2  ;;  %v234_v6 = vmul.f32 %v657_v0, %v211_v3  ;;  %v213_v7 = vld [vmem:[%s662_s21 + $0x18] sm:$0xff]  ;;  %v235_v8 = vmul.f32 %v657_v0, %v212_v4  ;;  %v214_v9 = vld [vmem:[%s662_s21 + $0x20] sm:$0xff]  ;;  %v215_v10 = vld [vmem:[%s662_s21 + $0x28] sm:$0xff] }
  0x13   : > { %v236_v11 = vmul.f32 %v657_v0, %v213_v7  ;;  %v237_v12 = vmul.f32 %v657_v0, %v214_v9  ;;  %v238_v13 = vmul.f32 %v657_v0, %v215_v10  ;;  %v216_v14 = vld [vmem:[%s662_s21 + $0x30] sm:$0xff]  ;;  %v217_v15 = vld [vmem:[%s662_s21 + $0x38] sm:$0xff]  ;;  %v218_v24 = vld [vmem:[%s662_s21 + $0x40] sm:$0xff] }
  0x14   : > { %v256_v16 = vadd.f32 %v667_v1, %v233_v5  ;;  %v257_v17 = vadd.f32 %v667_v1, %v234_v6  ;;  %v258_v18 = vadd.f32 %v667_v1, %v235_v8  ;;  %v239_v19 = vmul.f32 %v657_v0, %v216_v14  ;;  %v219_v25 = vld [vmem:[%s662_s21 + $0x48] sm:$0xff]  ;;  %v220_v38 = vld [vmem:[%s662_s21 + $0x50] sm:$0xff]  ;;  %v221_v43 = vld [vmem:[%s662_s21 + $0x58] sm:$0xff] }
  0x15   : > { %v259_v20 = vadd.f32 %v667_v1, %v236_v11  ;;  %v260_v21 = vadd.f32 %v667_v1, %v237_v12  ;;  %v261_v22 = vadd.f32 %v667_v1, %v238_v13  ;;  %v240_v23 = vmul.f32 %v657_v0, %v217_v15  ;;  %v222_v44 = vld [vmem:[%s662_s21 + $0x60] sm:$0xff]  ;;  %v223_v49 = vld [vmem:[%s662_s21 + $0x68] sm:$0xff]  ;;  %v224_v50 = vld [vmem:[%s662_s21 + $0x70] sm:$0xff] }
  0x16   : > { %v272_v26 = vmul.f32 0.2, %v256_v16  ;;  %v273_v27 = vmul.f32 0.2, %v257_v17  ;;  %v274_v28 = vmul.f32 0.2, %v258_v18  ;;  %v262_v29 = vadd.f32 %v667_v1, %v239_v19 }
  0x17   : > { %v275_v30 = vmul.f32 0.2, %v259_v20  ;;  %v276_v31 = vmul.f32 0.2, %v260_v21  ;;  %v277_v32 = vmul.f32 0.2, %v261_v22  ;;  %v263_v33 = vadd.f32 %v667_v1, %v240_v23 }
  0x18   : > { %v288_v34 = vmax.f32 %v256_v16, %v272_v26  ;;  %v289_v35 = vmax.f32 %v257_v17, %v273_v27  ;;  %v290_v36 = vmax.f32 %v258_v18, %v274_v28  ;;  %v278_v37 = vmul.f32 0.2, %v262_v29  ;;  %v225_v59 = vld [vmem:[%s662_s21 + $0x78] sm:$0xff] }
  0x19   : > { %v291_v39 = vmax.f32 %v259_v20, %v275_v30  ;;  %v292_v40 = vmax.f32 %v260_v21, %v276_v31  ;;  %v293_v41 = vmax.f32 %v261_v22, %v277_v32  ;;  %v279_v42 = vmul.f32 0.2, %v263_v33 }
  0x1a   : > { %v521_v45 = vpack.c.bf16 %v289_v35, %v288_v34  ;;  %v294_v46 = vmax.f32 %v262_v29, %v278_v37  ;;  %v241_v47 = vmul.f32 %v657_v0, %v218_v24  ;;  %v242_v48 = vmul.f32 %v657_v0, %v219_v25 }
  0x1b   : > { %v526_v51 = vpack.c.bf16 %v291_v39, %v290_v36  ;;  %v531_v52 = vpack.c.bf16 %v293_v41, %v292_v40  ;;  %v295_v53 = vmax.f32 %v263_v33, %v279_v42  ;;  %v243_v54 = vmul.f32 %v657_v0, %v220_v38 }
  0x1c   : > { %522 = vst [vmem:[%s700_s27] sm:$0xff] %v521_v45   ;;  %v264_v55 = vadd.f32 %v667_v1, %v241_v47  ;;  %v265_v56 = vadd.f32 %v667_v1, %v242_v48  ;;  %v244_v57 = vmul.f32 %v657_v0, %v221_v43  ;;  %v245_v58 = vmul.f32 %v657_v0, %v222_v44 }
  0x1d   : > { %558 = vst [vmem:[%s700_s27 + $0x8] sm:$0xff] %v526_v51   ;;  %559 = vst [vmem:[%s700_s27 + $0x10] sm:$0xff] %v531_v52   ;;  %v536_v60 = vpack.c.bf16 %v295_v53, %v294_v46  ;;  %v266_v61 = vadd.f32 %v667_v1, %v243_v54  ;;  %v246_v62 = vmul.f32 %v657_v0, %v223_v49 }
  0x1e   : > { %v247_v63 = vmul.f32 %v657_v0, %v224_v50  ;;  %v280_v2 = vmul.f32 0.2, %v264_v55  ;;  %v281_v3 = vmul.f32 0.2, %v265_v56  ;;  %v267_v4 = vadd.f32 %v667_v1, %v244_v57 }
  0x1f   : > { %v268_v5 = vadd.f32 %v667_v1, %v245_v58  ;;  %560 = vst [vmem:[%s700_s27 + $0x18] sm:$0xff] %v536_v60   ;;  %v282_v6 = vmul.f32 0.2, %v266_v61  ;;  %v269_v7 = vadd.f32 %v667_v1, %v246_v62  ;;  %v248_v8 = vmul.f32 %v657_v0, %v225_v59 }
  0x20   : > { %v270_v9 = vadd.f32 %v667_v1, %v247_v63  ;;  %v296_v10 = vmax.f32 %v264_v55, %v280_v2  ;;  %v297_v11 = vmax.f32 %v265_v56, %v281_v3  ;;  %v283_v12 = vmul.f32 0.2, %v267_v4 }
  0x21   : > { %v284_v13 = vmul.f32 0.2, %v268_v5  ;;  %v298_v14 = vmax.f32 %v266_v61, %v282_v6  ;;  %v285_v15 = vmul.f32 0.2, %v269_v7  ;;  %v271_v16 = vadd.f32 %v667_v1, %v248_v8 }
  0x22   : > { %v286_v17 = vmul.f32 0.2, %v270_v9  ;;  %v541_v18 = vpack.c.bf16 %v297_v11, %v296_v10  ;;  %v299_v19 = vmax.f32 %v267_v4, %v283_v12 }
  0x23   : > { %v300_v20 = vmax.f32 %v268_v5, %v284_v13  ;;  %v301_v21 = vmax.f32 %v269_v7, %v285_v15  ;;  %v287_v0 = vmul.f32 0.2, %v271_v16 }
  0x24   : > { %v302_v22 = vmax.f32 %v270_v9, %v286_v17  ;;  %561 = vst [vmem:[%s700_s27 + $0x20] sm:$0xff] %v541_v18   ;;  %v546_v23 = vpack.c.bf16 %v299_v19, %v298_v14 }
  0x25   : > { %v551_v24 = vpack.c.bf16 %v301_v21, %v300_v20  ;;  %v303_v25 = vmax.f32 %v271_v16, %v287_v0 }
  0x26   : > { %562 = vst [vmem:[%s700_s27 + $0x28] sm:$0xff] %v546_v23  }
  0x27   : > { %563 = vst [vmem:[%s700_s27 + $0x30] sm:$0xff] %v551_v24   ;;  %v556_v26 = vpack.c.bf16 %v303_v25, %v302_v22 }
  0x29   : > { %564 = vst [vmem:[%s700_s27 + $0x38] sm:$0xff] %v556_v26  }
  0x2a PF: > { %s13_s14 = sadd.s32 1, %s611_s14   ;;  %s744_s12 = smov %s607_s13 }
  0x2b   : > { %p10_p5 = scmp.ge.s32.totalorder %s13_s14, 6   ;;  %s745_s13 = smov %s747_s15 }
  0x2d   :  { %12 = sbr.rel (!%p10_p5) target bundleno = 2 (0x2), region = 62 }

// kernel: dcgan_decoder_forward.15
= control target key start
LH: loop header
LB: loop body
LE: loop exit
PB: predicated region body
PF: predicated region fallthrough
CT: control target
= control target key end

     0   :  { %s1609_s15 = smov 0   ;;  %s1611_s16 = smov 0   ;;  %s2025_s0 = inlined_call_operand.vmem [shape: bf16[4,512,128], index: 0, kind: input, shape index: {}]   ;;  %s2026_s1 = inlined_call_operand.vmem [shape: bf16[4,128,128], index: 1, kind: input, shape index: {}]   ;;  %s2027_s2 = inlined_call_operand.vmem [shape: f32[1,128], index: 2, kind: input, shape index: {}]   ;;  %s2028_s3 = inlined_call_operand.vmem [shape: f32[4,512,128], index: 3, kind: output, shape index: {0}]   ;;  %s2029_s4 = inlined_call_operand.vmem [shape: f32[4,1,2,128], index: 4, kind: output, shape index: {1}]  }
   0x1   :  { %s1613_s17 = smov 0  }
   0x2 LB: > { %s27_s18 = sadd.s32 1, %s1578_s16  ;;  %p1306_p0 = scmp.ge.s32.totalorder %s1582_s17, 1  ;;  %s1582_s17 = sphi %s1613_s17, %s15_s17   ;;  %s1578_s16 = sphi %s1611_s16, %s2031_s16   ;;  %s1574_s15 = sphi %s1609_s15, %s2030_s15  }
   0x3   : > { %p29_p1 = scmp.ge.s32.totalorder %s27_s18, 4  ;;  %p198_p2 = scmp.lt.s32.totalorder %s1582_s17, 5 }
   0x5   : > { %s2033_s18 = smov (%p29_p1, %s27_s18), 0  ;;  %p199_p3 = pnand %p1306_p0, %p198_p2 }
   0x6   : > { %p245_p4 = scmp.lt.s32.totalorder (!%p199_p3), %s1574_s15, 3  ;;  %v1685_v40 = vld [vmem:[%s2027_s2] ss:$0 sm:$0xff] (!%p199_p3)  ;;  %vm1159_vm0 = vcmask (!%p199_p3), 1040384  }
   0x7   : > { %202 = sbr.rel (%p199_p3) target bundleno = 409 (0x199), region = 32 }
   0xe   : > { %s2035_s15 = smov (!%p245_p4, %s1574_s15), 3 }
   0xf   : > { %s1358_s19 = sshll.u32 %s2035_s15, 6  ;;  %s1357_s23 = sshll.u32 %s2035_s15, 8 }
  0x10   : > { %s1633_s22 = scalar_lea.vmem %s2026_s1, %s1358_s19  ;;  %s1642_s26 = scalar_lea.vmem %s2025_s0, %s1357_s23 }
  0x11   : > { %v1520_v0 = vld [vmem:[%s1633_s22] sm:$0xff]   ;;  %v1521_v1 = vld [vmem:[%s1633_s22 + $0x8] sm:$0xff]   ;;  %v1522_v2 = vld [vmem:[%s1633_s22 + $0x10] sm:$0xff]   ;;  %s1359_s27 = sshll.u32 %s2035_s15, 9  ;;  %s1313_s7 = sshll.u32 %s2035_s15, 1 }
  0x12   : > { %1400 = vmatprep.subr.bf16.mxu0 %v1520_v0  ;;  %1480 = vmatprep.subr.bf16.mxu1 %v1520_v0  ;;  %v1523_v3 = vld [vmem:[%s1633_s22 + $0x18] sm:$0xff]   ;;  %v1528_v4 = vld [vmem:[%s1642_s26] sm:$0xff]   ;;  %v1525_v6 = vld [vmem:[%s1633_s22 + $0x28] sm:$0xff]   ;;  %s1690_s6 = scalar_lea.vmem %s2028_s3, %s1359_s27  ;;  %s275_s10 = scalar_lea.vmem %s2029_s4, %s1313_s7 }
  0x13   : > { %1401 = vmatpush3.bf16.msra.mxu0 %v1520_v0  ;;  %1488 = vmatpush3.bf16.msra.mxu1 %v1520_v0  ;;  %v1524_v5 = vld [vmem:[%s1633_s22 + $0x20] sm:$0xff]   ;;  %v1526_v7 = vld [vmem:[%s1633_s22 + $0x30] sm:$0xff]   ;;  %v1527_v8 = vld [vmem:[%s1633_s22 + $0x38] sm:$0xff]  }
  0x14   : > { %1402 = vmatprep.subr.bf16.mxu0 %v1521_v1  ;;  %1481 = vmatprep.subr.bf16.mxu1 %v1521_v1  ;;  %v1544_v9 = vld [vmem:[%s1642_s26 + $0x80] sm:$0xff]   ;;  %v1529_v10 = vld [vmem:[%s1642_s26 + $0x8] sm:$0xff]   ;;  %v1530_v11 = vld [vmem:[%s1642_s26 + $0x10] sm:$0xff]  }
  0x15   : > { %1416 = vmatprep.mubr.bf16.mxu0 %v1528_v4  ;;  %1448 = vmatprep.mubr.bf16.mxu1 %v1544_v9  ;;  %v1545_v12 = vld [vmem:[%s1642_s26 + $0x88] sm:$0xff]   ;;  %v1546_v13 = vld [vmem:[%s1642_s26 + $0x90] sm:$0xff]   ;;  %v1531_v14 = vld [vmem:[%s1642_s26 + $0x18] sm:$0xff]  }
  0x16   : > { %v1532_v15 = vld [vmem:[%s1642_s26 + $0x20] sm:$0xff]   ;;  %v1547_v16 = vld [vmem:[%s1642_s26 + $0x98] sm:$0xff]   ;;  %v1533_v18 = vld [vmem:[%s1642_s26 + $0x28] sm:$0xff]  }
  0x17   : > { %1403 = vmatpush3.bf16.msra.mxu0 %v1521_v1  ;;  %1489 = vmatpush3.bf16.msra.mxu1 %v1521_v1  ;;  %v1548_v17 = vld [vmem:[%s1642_s26 + $0xa0] sm:$0xff]   ;;  %v1549_v19 = vld [vmem:[%s1642_s26 + $0xa8] sm:$0xff]   ;;  %v1534_v20 = vld [vmem:[%s1642_s26 + $0x30] sm:$0xff]  }
  0x18   : > { %1404 = vmatprep.subr.bf16.mxu0 %v1522_v2  ;;  %1482 = vmatprep.subr.bf16.mxu1 %v1522_v2  ;;  %v1550_v21 = vld [vmem:[%s1642_s26 + $0xb0] sm:$0xff]   ;;  %v1535_v22 = vld [vmem:[%s1642_s26 + $0x38] sm:$0xff]   ;;  %v1536_v24 = vld [vmem:[%s1642_s26 + $0x40] sm:$0xff]  }
  0x19   : > { %v1551_v23 = vld [vmem:[%s1642_s26 + $0xb8] sm:$0xff]   ;;  %v1552_v25 = vld [vmem:[%s1642_s26 + $0xc0] sm:$0xff]   ;;  %v1537_v26 = vld [vmem:[%s1642_s26 + $0x48] sm:$0xff]  }
  0x1a   : > { %v1553_v27 = vld [vmem:[%s1642_s26 + $0xc8] sm:$0xff]   ;;  %v1538_v28 = vld [vmem:[%s1642_s26 + $0x50] sm:$0xff]   ;;  %v1539_v30 = vld [vmem:[%s1642_s26 + $0x58] sm:$0xff]  }
  0x1b   : > { %1405 = vmatpush3.bf16.msra.mxu0 %v1522_v2  ;;  %1490 = vmatpush3.bf16.msra.mxu1 %v1522_v2  ;;  %v1554_v29 = vld [vmem:[%s1642_s26 + $0xd0] sm:$0xff]   ;;  %v1555_v31 = vld [vmem:[%s1642_s26 + $0xd8] sm:$0xff]   ;;  %v1540_v32 = vld [vmem:[%s1642_s26 + $0x60] sm:$0xff]  }
  0x1c   : > { %1406 = vmatprep.subr.bf16.mxu0 %v1523_v3  ;;  %1483 = vmatprep.subr.bf16.mxu1 %v1523_v3  ;;  %v1556_v33 = vld [vmem:[%s1642_s26 + $0xe0] sm:$0xff]   ;;  %v1541_v34 = vld [vmem:[%s1642_s26 + $0x68] sm:$0xff]   ;;  %v1542_v36 = vld [vmem:[%s1642_s26 + $0x70] sm:$0xff]  }
  0x1d   : > { %v1557_v35 = vld [vmem:[%s1642_s26 + $0xe8] sm:$0xff]   ;;  %v1558_v37 = vld [vmem:[%s1642_s26 + $0xf0] sm:$0xff]   ;;  %v1543_v38 = vld [vmem:[%s1642_s26 + $0x78] sm:$0xff]  }
  0x1e   : > { %v1559_v39 = vld [vmem:[%s1642_s26 + $0xf8] sm:$0xff]  }
  0x1f   : > { %1407 = vmatpush3.bf16.msra.mxu0 %v1523_v3  ;;  %1491 = vmatpush3.bf16.msra.mxu1 %v1523_v3 }
  0x20   : > { %1408 = vmatprep.subr.bf16.mxu0 %v1524_v5  ;;  %1484 = vmatprep.subr.bf16.mxu1 %v1524_v5 }
  0x23   : > { %1409 = vmatpush3.bf16.msra.mxu0 %v1524_v5  ;;  %1492 = vmatpush3.bf16.msra.mxu1 %v1524_v5 }
  0x24   : > { %1410 = vmatprep.subr.bf16.mxu0 %v1525_v6  ;;  %1485 = vmatprep.subr.bf16.mxu1 %v1525_v6 }
  0x27   : > { %1411 = vmatpush3.bf16.msra.mxu0 %v1525_v6  ;;  %1493 = vmatpush3.bf16.msra.mxu1 %v1525_v6 }
  0x28   : > { %1412 = vmatprep.subr.bf16.mxu0 %v1526_v7  ;;  %1486 = vmatprep.subr.bf16.mxu1 %v1526_v7 }
  0x2b   : > { %1413 = vmatpush3.bf16.msra.mxu0 %v1526_v7  ;;  %1494 = vmatpush3.bf16.msra.mxu1 %v1526_v7 }
  0x2c   : > { %1414 = vmatprep.subr.bf16.mxu0 %v1527_v8  ;;  %1487 = vmatprep.subr.bf16.mxu1 %v1527_v8 }
  0x2f   : > { %1415 = vmatpush3.bf16.msra.mxu0 %v1527_v8  ;;  %1495 = vmatpush3.bf16.msra.mxu1 %v1527_v8 }
  0x32   : > { %1417 = vmatmul.mubr.bf16.vlgmr.msra.gmra.mrb[0].mxu0 %v1529_v10  ;;  %1449 = vmatmul.mubr.bf16.vlgmr.msra.gmra.mrb[0].mxu1 %v1545_v12 }
  0x33   : > { %1420 = vmatprep.mubr.bf16.mxu0 %v1530_v11  ;;  %1452 = vmatprep.mubr.bf16.mxu1 %v1546_v13 }
  0x3a   : > { %1421 = vmatmul.mubr.bf16.gmra.mrb[4].mxu0 %v1531_v14  ;;  %1453 = vmatmul.mubr.bf16.gmra.mrb[4].mxu1 %v1547_v16 }
  0x3b   : > { %1424 = vmatprep.mubr.bf16.mxu0 %v1532_v15  ;;  %1456 = vmatprep.mubr.bf16.mxu1 %v1548_v17 }
  0x42   : > { %1425 = vmatmul.mubr.bf16.gmra.mrb[8].mxu0 %v1533_v18  ;;  %1457 = vmatmul.mubr.bf16.gmra.mrb[8].mxu1 %v1549_v19 }
  0x43   : > { %1428 = vmatprep.mubr.bf16.mxu0 %v1534_v20  ;;  %1460 = vmatprep.mubr.bf16.mxu1 %v1550_v21 }
  0x4a   : > { %1429 = vmatmul.mubr.bf16.gmra.mrb[12].mxu0 %v1535_v22  ;;  %1461 = vmatmul.mubr.bf16.gmra.mrb[12].mxu1 %v1551_v23 }
  0x4b   : > { %1432 = vmatprep.mubr.bf16.mxu0 %v1536_v24  ;;  %1464 = vmatprep.mubr.bf16.mxu1 %v1552_v25 }
  0x52   : > { %1433 = vmatmul.mubr.bf16.gmra.mrb[16].mxu0 %v1537_v26  ;;  %1465 = vmatmul.mubr.bf16.gmra.mrb[16].mxu1 %v1553_v27 }
  0x53   : > { %1436 = vmatprep.mubr.bf16.mxu0 %v1538_v28  ;;  %1468 = vmatprep.mubr.bf16.mxu1 %v1554_v29 }
  0x5a   : > { %1437 = vmatmul.mubr.bf16.gmra.mrb[20].mxu0 %v1539_v30  ;;  %1469 = vmatmul.mubr.bf16.gmra.mrb[20].mxu1 %v1555_v31 }
  0x5b   : > { %1440 = vmatprep.mubr.bf16.mxu0 %v1540_v32  ;;  %1472 = vmatprep.mubr.bf16.mxu1 %v1556_v33 }
  0x62   : > { %1441 = vmatmul.mubr.bf16.gmra.mrb[24].mxu0 %v1541_v34  ;;  %1473 = vmatmul.mubr.bf16.gmra.mrb[24].mxu1 %v1557_v35 }
  0x63   : > { %1444 = vmatprep.mubr.bf16.mxu0 %v1542_v36  ;;  %1476 = vmatprep.mubr.bf16.mxu1 %v1558_v37 }
  0x6a   : > { %1445 = vmatmul.mubr.bf16.gmra.mrb[28].mxu0 %v1543_v38  ;;  %1477 = vmatmul.mubr.bf16.gmra.mrb[28].mxu1 %v1559_v39 }
 0x105   : > { %v1418_v41 = vpop.f32.mrb[0].mxu0  ;;  %v1450_v42 = vpop.f32.mrb[0].mxu1 }
 0x106   : > { %v647_v43 = vadd.f32 %v1418_v41, %v1685_v40  ;;  %v638_v44 = vpop.f32.mrb[1].mxu0  ;;  %v1694_v45 = vadd.f32 %v1450_v42, %v1685_v40  ;;  %v766_v46 = vpop.f32.mrb[1].mxu1 }
 0x107   : > { %v639_v47 = vadd.f32 %v1685_v40, %v638_v44  ;;  %v1419_v48 = vpop.f32.mrb[2].mxu0  ;;  %v1698_v49 = vadd.f32 %v1685_v40, %v766_v46  ;;  %v1451_v50 = vpop.f32.mrb[2].mxu1 }
 0x108   : > { %895 = vst [vmem:[%s1690_s6 + $0x10] sm:$0xff] %v647_v43  ;;  %v650_v51 = vadd.f32 %v1419_v48, %v1685_v40  ;;  %v641_v52 = vpop.f32.mrb[3].mxu0  ;;  %927 = vst [vmem:[%s1690_s6 + $0x110] sm:$0xff] %v1694_v45  ;;  %v1705_v53 = vadd.f32 %v1451_v50, %v1685_v40  ;;  %v769_v54 = vpop.f32.mrb[3].mxu1  ;;  %v1028_v60 = vmul.f32 %v647_v43, %v647_v43 }
 0x109   : > { %893 = vst [vmem:[%s1690_s6] sm:$0xff] %v639_v47  ;;  %v642_v55 = vadd.f32 %v1685_v40, %v641_v52  ;;  %925 = vst [vmem:[%s1690_s6 + $0x100] sm:$0xff] %v1698_v49  ;;  %v1712_v56 = vadd.f32 %v1685_v40, %v769_v54  ;;  %v1026_v57 = vmul.f32 %v639_v47, %v639_v47 }
 0x10a   : > { %896 = vst [vmem:[%s1690_s6 + $0x18] sm:$0xff] %v650_v51  ;;  %928 = vst [vmem:[%s1690_s6 + $0x118] sm:$0xff] %v1705_v53  ;;  %v1029_v1 = vmul.f32 %v650_v51, %v650_v51 }
 0x10b   : > { %894 = vst [vmem:[%s1690_s6 + $0x8] sm:$0xff] %v642_v55  ;;  %v957_v58 = vadd.f32 %v642_v55, %v639_v47  ;;  %v1027_v59 = vmul.f32 %v642_v55, %v642_v55  ;;  %926 = vst [vmem:[%s1690_s6 + $0x108] sm:$0xff] %v1712_v56 }
 0x10d   : > { %v958_v61 = vadd.f32 %v957_v58, %v647_v43  ;;  %v1090_v62 = vadd.f32 %v1027_v59, %v1026_v57  ;;  %v1422_v63 = vpop.f32.mrb[4].mxu0  ;;  %v1454_v0 = vpop.f32.mrb[4].mxu1 }
 0x10e   : > { %v663_v2 = vadd.f32 %v1422_v63, %v1685_v40  ;;  %v654_v3 = vpop.f32.mrb[5].mxu0  ;;  %v1722_v4 = vadd.f32 %v1454_v0, %v1685_v40  ;;  %v782_v5 = vpop.f32.mrb[5].mxu1 }
 0x10f   : > { %v1091_v6 = vadd.f32 %v1090_v62, %v1028_v60  ;;  %v655_v7 = vadd.f32 %v1685_v40, %v654_v3  ;;  %v959_v8 = vadd.f32 %v958_v61, %v650_v51  ;;  %v1423_v9 = vpop.f32.mrb[6].mxu0  ;;  %v1726_v10 = vadd.f32 %v1685_v40, %v782_v5  ;;  %v1455_v11 = vpop.f32.mrb[6].mxu1 }
 0x110   : > { %899 = vst [vmem:[%s1690_s6 + $0x30] sm:$0xff] %v663_v2  ;;  %v666_v12 = vadd.f32 %v1423_v9, %v1685_v40  ;;  %v657_v13 = vpop.f32.mrb[7].mxu0  ;;  %931 = vst [vmem:[%s1690_s6 + $0x130] sm:$0xff] %v1722_v4  ;;  %v1733_v14 = vadd.f32 %v1455_v11, %v1685_v40  ;;  %v785_v15 = vpop.f32.mrb[7].mxu1  ;;  %v1032_v24 = vmul.f32 %v663_v2, %v663_v2 }
 0x111   : > { %897 = vst [vmem:[%s1690_s6 + $0x20] sm:$0xff] %v655_v7  ;;  %v960_v16 = vadd.f32 %v959_v8, %v655_v7  ;;  %v1030_v17 = vmul.f32 %v655_v7, %v655_v7  ;;  %v1092_v18 = vadd.f32 %v1091_v6, %v1029_v1  ;;  %v658_v19 = vadd.f32 %v1685_v40, %v657_v13 }
 0x112   : > { %929 = vst [vmem:[%s1690_s6 + $0x120] sm:$0xff] %v1726_v10  ;;  %900 = vst [vmem:[%s1690_s6 + $0x38] sm:$0xff] %v666_v12  ;;  %v1743_v20 = vadd.f32 %v1685_v40, %v785_v15  ;;  %v1033_v29 = vmul.f32 %v666_v12, %v666_v12 }
 0x113   : > { %932 = vst [vmem:[%s1690_s6 + $0x138] sm:$0xff] %v1733_v14  ;;  %v1093_v21 = vadd.f32 %v1092_v18, %v1030_v17  ;;  %898 = vst [vmem:[%s1690_s6 + $0x28] sm:$0xff] %v658_v19  ;;  %v961_v22 = vadd.f32 %v960_v16, %v658_v19  ;;  %v1031_v23 = vmul.f32 %v658_v19, %v658_v19 }
 0x114   : > { %930 = vst [vmem:[%s1690_s6 + $0x128] sm:$0xff] %v1743_v20 }
 0x115   : > { %v962_v25 = vadd.f32 %v961_v22, %v663_v2  ;;  %v1094_v26 = vadd.f32 %v1093_v21, %v1031_v23  ;;  %v1426_v27 = vpop.f32.mrb[8].mxu0  ;;  %v1458_v28 = vpop.f32.mrb[8].mxu1 }
 0x116   : > { %v679_v30 = vadd.f32 %v1426_v27, %v1685_v40  ;;  %v670_v31 = vpop.f32.mrb[9].mxu0  ;;  %v1750_v32 = vadd.f32 %v1458_v28, %v1685_v40  ;;  %v798_v33 = vpop.f32.mrb[9].mxu1 }
 0x117   : > { %v1095_v34 = vadd.f32 %v1094_v26, %v1032_v24  ;;  %v671_v35 = vadd.f32 %v1685_v40, %v670_v31  ;;  %v963_v36 = vadd.f32 %v962_v25, %v666_v12  ;;  %v1427_v37 = vpop.f32.mrb[10].mxu0  ;;  %v1754_v38 = vadd.f32 %v1685_v40, %v798_v33  ;;  %v1459_v39 = vpop.f32.mrb[10].mxu1 }
 0x118   : > { %903 = vst [vmem:[%s1690_s6 + $0x50] sm:$0xff] %v679_v30  ;;  %v682_v41 = vadd.f32 %v1427_v37, %v1685_v40  ;;  %v673_v42 = vpop.f32.mrb[11].mxu0  ;;  %935 = vst [vmem:[%s1690_s6 + $0x150] sm:$0xff] %v1750_v32  ;;  %v1761_v43 = vadd.f32 %v1459_v39, %v1685_v40  ;;  %v801_v44 = vpop.f32.mrb[11].mxu1  ;;  %v1036_v57 = vmul.f32 %v679_v30, %v679_v30 }
 0x119   : > { %901 = vst [vmem:[%s1690_s6 + $0x40] sm:$0xff] %v671_v35  ;;  %v964_v46 = vadd.f32 %v963_v36, %v671_v35  ;;  %v1034_v47 = vmul.f32 %v671_v35, %v671_v35  ;;  %v1096_v48 = vadd.f32 %v1095_v34, %v1033_v29  ;;  %v674_v50 = vadd.f32 %v1685_v40, %v673_v42 }
 0x11a   : > { %933 = vst [vmem:[%s1690_s6 + $0x140] sm:$0xff] %v1754_v38  ;;  %904 = vst [vmem:[%s1690_s6 + $0x58] sm:$0xff] %v682_v41  ;;  %v1771_v51 = vadd.f32 %v1685_v40, %v801_v44  ;;  %v1037_v62 = vmul.f32 %v682_v41, %v682_v41 }
 0x11b   : > { %936 = vst [vmem:[%s1690_s6 + $0x158] sm:$0xff] %v1761_v43  ;;  %v1097_v52 = vadd.f32 %v1096_v48, %v1034_v47  ;;  %902 = vst [vmem:[%s1690_s6 + $0x48] sm:$0xff] %v674_v50  ;;  %v965_v54 = vadd.f32 %v964_v46, %v674_v50  ;;  %v1035_v55 = vmul.f32 %v674_v50, %v674_v50 }
 0x11c   : > { %934 = vst [vmem:[%s1690_s6 + $0x148] sm:$0xff] %v1771_v51 }
 0x11d   : > { %v966_v58 = vadd.f32 %v965_v54, %v679_v30  ;;  %v1098_v59 = vadd.f32 %v1097_v52, %v1035_v55  ;;  %v1430_v60 = vpop.f32.mrb[12].mxu0  ;;  %v1462_v61 = vpop.f32.mrb[12].mxu1 }
 0x11e   : > { %v695_v63 = vadd.f32 %v1430_v60, %v1685_v40  ;;  %v686_v0 = vpop.f32.mrb[13].mxu0  ;;  %v1778_v1 = vadd.f32 %v1462_v61, %v1685_v40  ;;  %v814_v2 = vpop.f32.mrb[13].mxu1 }
 0x11f   : > { %v1099_v3 = vadd.f32 %v1098_v59, %v1036_v57  ;;  %v687_v5 = vadd.f32 %v1685_v40, %v686_v0  ;;  %v967_v6 = vadd.f32 %v966_v58, %v682_v41  ;;  %v1431_v7 = vpop.f32.mrb[14].mxu0  ;;  %v1782_v8 = vadd.f32 %v1685_v40, %v814_v2  ;;  %v1463_v9 = vpop.f32.mrb[14].mxu1 }
 0x120   : > { %907 = vst [vmem:[%s1690_s6 + $0x70] sm:$0xff] %v695_v63  ;;  %v698_v11 = vadd.f32 %v1431_v7, %v1685_v40  ;;  %v689_v12 = vpop.f32.mrb[15].mxu0  ;;  %939 = vst [vmem:[%s1690_s6 + $0x170] sm:$0xff] %v1778_v1  ;;  %v1789_v13 = vadd.f32 %v1463_v9, %v1685_v40  ;;  %v817_v15 = vpop.f32.mrb[15].mxu1  ;;  %v1040_v25 = vmul.f32 %v695_v63, %v695_v63 }
 0x121   : > { %905 = vst [vmem:[%s1690_s6 + $0x60] sm:$0xff] %v687_v5  ;;  %v968_v16 = vadd.f32 %v967_v6, %v687_v5  ;;  %v1038_v17 = vmul.f32 %v687_v5, %v687_v5  ;;  %v1100_v18 = vadd.f32 %v1099_v3, %v1037_v62  ;;  %v690_v19 = vadd.f32 %v1685_v40, %v689_v12 }
 0x122   : > { %937 = vst [vmem:[%s1690_s6 + $0x160] sm:$0xff] %v1782_v8  ;;  %908 = vst [vmem:[%s1690_s6 + $0x78] sm:$0xff] %v698_v11  ;;  %v1799_v21 = vadd.f32 %v1685_v40, %v817_v15  ;;  %v1041_v30 = vmul.f32 %v698_v11, %v698_v11 }
 0x123   : > { %940 = vst [vmem:[%s1690_s6 + $0x178] sm:$0xff] %v1789_v13  ;;  %v1101_v22 = vadd.f32 %v1100_v18, %v1038_v17  ;;  %906 = vst [vmem:[%s1690_s6 + $0x68] sm:$0xff] %v690_v19  ;;  %v969_v23 = vadd.f32 %v968_v16, %v690_v19  ;;  %v1039_v24 = vmul.f32 %v690_v19, %v690_v19 }
 0x124   : > { %938 = vst [vmem:[%s1690_s6 + $0x168] sm:$0xff] %v1799_v21 }
 0x125   : > { %v970_v26 = vadd.f32 %v969_v23, %v695_v63  ;;  %v1102_v27 = vadd.f32 %v1101_v22, %v1039_v24  ;;  %v1434_v28 = vpop.f32.mrb[16].mxu0  ;;  %v1466_v29 = vpop.f32.mrb[16].mxu1 }
 0x126   : > { %v711_v31 = vadd.f32 %v1434_v28, %v1685_v40  ;;  %v702_v33 = vpop.f32.mrb[17].mxu0  ;;  %v1806_v34 = vadd.f32 %v1466_v29, %v1685_v40  ;;  %v830_v35 = vpop.f32.mrb[17].mxu1 }
 0x127   : > { %v1103_v36 = vadd.f32 %v1102_v27, %v1040_v25  ;;  %v703_v37 = vadd.f32 %v1685_v40, %v702_v33  ;;  %v971_v39 = vadd.f32 %v970_v26, %v698_v11  ;;  %v1435_v41 = vpop.f32.mrb[18].mxu0  ;;  %v1810_v42 = vadd.f32 %v1685_v40, %v830_v35  ;;  %v1467_v44 = vpop.f32.mrb[18].mxu1 }
 0x128   : > { %911 = vst [vmem:[%s1690_s6 + $0x90] sm:$0xff] %v711_v31  ;;  %v714_v46 = vadd.f32 %v1435_v41, %v1685_v40  ;;  %v705_v47 = vpop.f32.mrb[19].mxu0  ;;  %943 = vst [vmem:[%s1690_s6 + $0x190] sm:$0xff] %v1806_v34  ;;  %v1817_v48 = vadd.f32 %v1467_v44, %v1685_v40  ;;  %v833_v50 = vpop.f32.mrb[19].mxu1  ;;  %v1044_v62 = vmul.f32 %v711_v31, %v711_v31 }
 0x129   : > { %909 = vst [vmem:[%s1690_s6 + $0x80] sm:$0xff] %v703_v37  ;;  %v972_v52 = vadd.f32 %v971_v39, %v703_v37  ;;  %v1042_v54 = vmul.f32 %v703_v37, %v703_v37  ;;  %v1104_v55 = vadd.f32 %v1103_v36, %v1041_v30  ;;  %v706_v57 = vadd.f32 %v1685_v40, %v705_v47 }
 0x12a   : > { %941 = vst [vmem:[%s1690_s6 + $0x180] sm:$0xff] %v1810_v42  ;;  %912 = vst [vmem:[%s1690_s6 + $0x98] sm:$0xff] %v714_v46  ;;  %v1827_v58 = vadd.f32 %v1685_v40, %v833_v50  ;;  %v1045_v5 = vmul.f32 %v714_v46, %v714_v46 }
 0x12b   : > { %944 = vst [vmem:[%s1690_s6 + $0x198] sm:$0xff] %v1817_v48  ;;  %v1105_v59 = vadd.f32 %v1104_v55, %v1042_v54  ;;  %910 = vst [vmem:[%s1690_s6 + $0x88] sm:$0xff] %v706_v57  ;;  %v973_v60 = vadd.f32 %v972_v52, %v706_v57  ;;  %v1043_v61 = vmul.f32 %v706_v57, %v706_v57 }
 0x12c   : > { %942 = vst [vmem:[%s1690_s6 + $0x188] sm:$0xff] %v1827_v58 }
 0x12d   : > { %v974_v63 = vadd.f32 %v973_v60, %v711_v31  ;;  %v1106_v0 = vadd.f32 %v1105_v59, %v1043_v61  ;;  %v1438_v2 = vpop.f32.mrb[20].mxu0  ;;  %v1470_v3 = vpop.f32.mrb[20].mxu1 }
 0x12e   : > { %v727_v6 = vadd.f32 %v1438_v2, %v1685_v40  ;;  %v718_v7 = vpop.f32.mrb[21].mxu0  ;;  %v1834_v9 = vadd.f32 %v1470_v3, %v1685_v40  ;;  %v846_v11 = vpop.f32.mrb[21].mxu1 }
 0x12f   : > { %v1107_v12 = vadd.f32 %v1106_v0, %v1044_v62  ;;  %v719_v15 = vadd.f32 %v1685_v40, %v718_v7  ;;  %v975_v16 = vadd.f32 %v974_v63, %v714_v46  ;;  %v1439_v17 = vpop.f32.mrb[22].mxu0  ;;  %v1838_v18 = vadd.f32 %v1685_v40, %v846_v11  ;;  %v1471_v19 = vpop.f32.mrb[22].mxu1 }
 0x130   : > { %915 = vst [vmem:[%s1690_s6 + $0xb0] sm:$0xff] %v727_v6  ;;  %v730_v22 = vadd.f32 %v1439_v17, %v1685_v40  ;;  %v721_v23 = vpop.f32.mrb[23].mxu0  ;;  %947 = vst [vmem:[%s1690_s6 + $0x1b0] sm:$0xff] %v1834_v9  ;;  %v1845_v24 = vadd.f32 %v1471_v19, %v1685_v40  ;;  %v849_v25 = vpop.f32.mrb[23].mxu1  ;;  %v1048_v36 = vmul.f32 %v727_v6, %v727_v6 }
 0x131   : > { %913 = vst [vmem:[%s1690_s6 + $0xa0] sm:$0xff] %v719_v15  ;;  %v976_v26 = vadd.f32 %v975_v16, %v719_v15  ;;  %v1046_v27 = vmul.f32 %v719_v15, %v719_v15  ;;  %v1108_v28 = vadd.f32 %v1107_v12, %v1045_v5  ;;  %v722_v29 = vadd.f32 %v1685_v40, %v721_v23 }
 0x132   : > { %945 = vst [vmem:[%s1690_s6 + $0x1a0] sm:$0xff] %v1838_v18  ;;  %916 = vst [vmem:[%s1690_s6 + $0xb8] sm:$0xff] %v730_v22  ;;  %v1855_v30 = vadd.f32 %v1685_v40, %v849_v25  ;;  %v1049_v46 = vmul.f32 %v730_v22, %v730_v22 }
 0x133   : > { %948 = vst [vmem:[%s1690_s6 + $0x1b8] sm:$0xff] %v1845_v24  ;;  %v1109_v31 = vadd.f32 %v1108_v28, %v1046_v27  ;;  %914 = vst [vmem:[%s1690_s6 + $0xa8] sm:$0xff] %v722_v29  ;;  %v977_v33 = vadd.f32 %v976_v26, %v722_v29  ;;  %v1047_v35 = vmul.f32 %v722_v29, %v722_v29 }
 0x134   : > { %946 = vst [vmem:[%s1690_s6 + $0x1a8] sm:$0xff] %v1855_v30 }
 0x135   : > { %v978_v37 = vadd.f32 %v977_v33, %v727_v6  ;;  %v1110_v39 = vadd.f32 %v1109_v31, %v1047_v35  ;;  %v1442_v41 = vpop.f32.mrb[24].mxu0  ;;  %v1474_v44 = vpop.f32.mrb[24].mxu1 }
 0x136   : > { %v743_v47 = vadd.f32 %v1442_v41, %v1685_v40  ;;  %v734_v50 = vpop.f32.mrb[25].mxu0  ;;  %v1862_v52 = vadd.f32 %v1474_v44, %v1685_v40  ;;  %v862_v54 = vpop.f32.mrb[25].mxu1 }
 0x137   : > { %v1111_v55 = vadd.f32 %v1110_v39, %v1048_v36  ;;  %v735_v57 = vadd.f32 %v1685_v40, %v734_v50  ;;  %v979_v59 = vadd.f32 %v978_v37, %v730_v22  ;;  %v1443_v60 = vpop.f32.mrb[26].mxu0  ;;  %v1866_v61 = vadd.f32 %v1685_v40, %v862_v54  ;;  %v1475_v62 = vpop.f32.mrb[26].mxu1 }
 0x138   : > { %919 = vst [vmem:[%s1690_s6 + $0xd0] sm:$0xff] %v743_v47  ;;  %v746_v63 = vadd.f32 %v1443_v60, %v1685_v40  ;;  %v737_v0 = vpop.f32.mrb[27].mxu0  ;;  %951 = vst [vmem:[%s1690_s6 + $0x1d0] sm:$0xff] %v1862_v52  ;;  %v1873_v2 = vadd.f32 %v1475_v62, %v1685_v40  ;;  %v865_v3 = vpop.f32.mrb[27].mxu1  ;;  %v1052_v19 = vmul.f32 %v743_v47, %v743_v47 }
 0x139   : > { %917 = vst [vmem:[%s1690_s6 + $0xc0] sm:$0xff] %v735_v57  ;;  %v980_v5 = vadd.f32 %v979_v59, %v735_v57  ;;  %v1050_v6 = vmul.f32 %v735_v57, %v735_v57  ;;  %v1112_v7 = vadd.f32 %v1111_v55, %v1049_v46  ;;  %v738_v11 = vadd.f32 %v1685_v40, %v737_v0 }
 0x13a   : > { %949 = vst [vmem:[%s1690_s6 + $0x1c0] sm:$0xff] %v1866_v61  ;;  %920 = vst [vmem:[%s1690_s6 + $0xd8] sm:$0xff] %v746_v63  ;;  %v1883_v12 = vadd.f32 %v1685_v40, %v865_v3  ;;  %v1053_v27 = vmul.f32 %v746_v63, %v746_v63 }
 0x13b   : > { %952 = vst [vmem:[%s1690_s6 + $0x1d8] sm:$0xff] %v1873_v2  ;;  %v1113_v15 = vadd.f32 %v1112_v7, %v1050_v6  ;;  %918 = vst [vmem:[%s1690_s6 + $0xc8] sm:$0xff] %v738_v11  ;;  %v981_v16 = vadd.f32 %v980_v5, %v738_v11  ;;  %v1051_v17 = vmul.f32 %v738_v11, %v738_v11 }
 0x13c   : > { %950 = vst [vmem:[%s1690_s6 + $0x1c8] sm:$0xff] %v1883_v12 }
 0x13d   : > { %v982_v22 = vadd.f32 %v981_v16, %v743_v47  ;;  %v1114_v23 = vadd.f32 %v1113_v15, %v1051_v17  ;;  %v1446_v25 = vpop.f32.mrb[28].mxu0  ;;  %v1478_v26 = vpop.f32.mrb[28].mxu1  ;;  %v1058_v17 = vmul.f32 %v1698_v49, %v1698_v49 }
 0x13e   : > { %v759_v28 = vadd.f32 %v1446_v25, %v1685_v40  ;;  %v750_v29 = vpop.f32.mrb[29].mxu0  ;;  %v1890_v31 = vadd.f32 %v1478_v26, %v1685_v40  ;;  %v878_v33 = vpop.f32.mrb[29].mxu1  ;;  %v1059_v25 = vmul.f32 %v1712_v56, %v1712_v56  ;;  %v1060_v26 = vmul.f32 %v1694_v45, %v1694_v45 }
 0x13f   : > { %v1115_v35 = vadd.f32 %v1114_v23, %v1052_v19  ;;  %v751_v36 = vadd.f32 %v1685_v40, %v750_v29  ;;  %v983_v37 = vadd.f32 %v982_v22, %v746_v63  ;;  %v1447_v39 = vpop.f32.mrb[30].mxu0  ;;  %v1894_v41 = vadd.f32 %v1685_v40, %v878_v33  ;;  %v1479_v44 = vpop.f32.mrb[30].mxu1 }
 0x140   : > { %923 = vst [vmem:[%s1690_s6 + $0xf0] sm:$0xff] %v759_v28  ;;  %v762_v46 = vadd.f32 %v1447_v39, %v1685_v40  ;;  %v753_v47 = vpop.f32.mrb[31].mxu0  ;;  %955 = vst [vmem:[%s1690_s6 + $0x1f0] sm:$0xff] %v1890_v31  ;;  %v1901_v50 = vadd.f32 %v1479_v44, %v1685_v40  ;;  %v881_v54 = vpop.f32.mrb[31].mxu1  ;;  %v1056_v5 = vmul.f32 %v759_v28, %v759_v28 }
 0x141   : > { %921 = vst [vmem:[%s1690_s6 + $0xe0] sm:$0xff] %v751_v36  ;;  %v984_v55 = vadd.f32 %v983_v37, %v751_v36  ;;  %v1054_v57 = vmul.f32 %v751_v36, %v751_v36  ;;  %v1116_v59 = vadd.f32 %v1115_v35, %v1053_v27  ;;  %v754_v60 = vadd.f32 %v1685_v40, %v753_v47 }
 0x142   : > { %953 = vst [vmem:[%s1690_s6 + $0x1e0] sm:$0xff] %v1894_v41  ;;  %924 = vst [vmem:[%s1690_s6 + $0xf8] sm:$0xff] %v762_v46  ;;  %v1911_v62 = vadd.f32 %v1685_v40, %v881_v54  ;;  %v1057_v11 = vmul.f32 %v762_v46, %v762_v46  ;;  %v1061_v29 = vmul.f32 %v1705_v53, %v1705_v53 }
 0x143   : > { %956 = vst [vmem:[%s1690_s6 + $0x1f8] sm:$0xff] %v1901_v50  ;;  %v1117_v63 = vadd.f32 %v1116_v59, %v1054_v57  ;;  %922 = vst [vmem:[%s1690_s6 + $0xe8] sm:$0xff] %v754_v60  ;;  %v985_v0 = vadd.f32 %v984_v55, %v754_v60  ;;  %v1055_v3 = vmul.f32 %v754_v60, %v754_v60 }
 0x144   : > { %954 = vst [vmem:[%s1690_s6 + $0x1e8] sm:$0xff] %v1911_v62  ;;  %v1063_v44 = vmul.f32 %v1743_v20, %v1743_v20 }
 0x145   : > { %v986_v6 = vadd.f32 %v985_v0, %v759_v28  ;;  %v1118_v7 = vadd.f32 %v1117_v63, %v1055_v3  ;;  %v1067_v63 = vmul.f32 %v1771_v51, %v1771_v51 }
 0x147   : > { %v1119_v15 = vadd.f32 %v1118_v7, %v1056_v5  ;;  %v987_v16 = vadd.f32 %v986_v6, %v762_v46 }
 0x149   : > { %v988_v19 = vadd.f32 %v987_v16, %v1698_v49  ;;  %v1120_v22 = vadd.f32 %v1119_v15, %v1057_v11  ;;  %v1062_v49 = vmul.f32 %v1726_v10, %v1726_v10  ;;  %v1071_v16 = vmul.f32 %v1799_v21, %v1799_v21 }
 0x14b   : > { %v1121_v40 = vadd.f32 %v1120_v22, %v1058_v17  ;;  %v989_v23 = vadd.f32 %v988_v19, %v1712_v56 }
 0x14d   : > { %v990_v27 = vadd.f32 %v989_v23, %v1694_v45  ;;  %v1122_v28 = vadd.f32 %v1121_v40, %v1059_v25  ;;  %v1064_v45 = vmul.f32 %v1722_v4, %v1722_v4 }
 0x14f   : > { %v1123_v33 = vadd.f32 %v1122_v28, %v1060_v26  ;;  %v991_v35 = vadd.f32 %v990_v27, %v1705_v53  ;;  %v1065_v53 = vmul.f32 %v1733_v14, %v1733_v14  ;;  %v1075_v27 = vmul.f32 %v1827_v58, %v1827_v58 }
 0x151   : > { %v992_v36 = vadd.f32 %v991_v35, %v1726_v10  ;;  %v1124_v37 = vadd.f32 %v1123_v33, %v1061_v29  ;;  %v1066_v10 = vmul.f32 %v1754_v38, %v1754_v38 }
 0x153   : > { %v1125_v39 = vadd.f32 %v1124_v37, %v1062_v49  ;;  %v993_v56 = vadd.f32 %v992_v36, %v1743_v20 }
 0x155   : > { %v994_v46 = vadd.f32 %v993_v56, %v1722_v4  ;;  %v1126_v47 = vadd.f32 %v1125_v39, %v1063_v44  ;;  %v1068_v4 = vmul.f32 %v1750_v32, %v1750_v32  ;;  %v1079_v39 = vmul.f32 %v1855_v30, %v1855_v30 }
 0x157   : > { %v1127_v54 = vadd.f32 %v1126_v47, %v1064_v45  ;;  %v995_v55 = vadd.f32 %v994_v46, %v1733_v14  ;;  %v1069_v14 = vmul.f32 %v1761_v43, %v1761_v43 }
 0x159   : > { %v996_v57 = vadd.f32 %v995_v55, %v1754_v38  ;;  %v1128_v59 = vadd.f32 %v1127_v54, %v1065_v53  ;;  %v1070_v38 = vmul.f32 %v1782_v8, %v1782_v8  ;;  %v1083_v55 = vmul.f32 %v1883_v12, %v1883_v12 }
 0x15b   : > { %v1129_v60 = vadd.f32 %v1128_v59, %v1066_v10  ;;  %v997_v20 = vadd.f32 %v996_v57, %v1771_v51 }
 0x15d   : > { %v998_v0 = vadd.f32 %v997_v20, %v1750_v32  ;;  %v1130_v3 = vadd.f32 %v1129_v60, %v1067_v63  ;;  %v1072_v32 = vmul.f32 %v1778_v1, %v1778_v1 }
 0x15f   : > { %v1131_v5 = vadd.f32 %v1130_v3, %v1068_v4  ;;  %v999_v6 = vadd.f32 %v998_v0, %v1761_v43  ;;  %v1073_v43 = vmul.f32 %v1789_v13, %v1789_v13  ;;  %v1087_v0 = vmul.f32 %v1911_v62, %v1911_v62 }
 0x161   : > { %v1000_v7 = vadd.f32 %v999_v6, %v1782_v8  ;;  %v1132_v11 = vadd.f32 %v1131_v5, %v1069_v14  ;;  %v1074_v8 = vmul.f32 %v1810_v42, %v1810_v42 }
 0x163   : > { %v1133_v15 = vadd.f32 %v1132_v11, %v1070_v38  ;;  %v1001_v51 = vadd.f32 %v1000_v7, %v1799_v21 }
 0x165   : > { %v1002_v17 = vadd.f32 %v1001_v51, %v1778_v1  ;;  %v1134_v19 = vadd.f32 %v1133_v15, %v1071_v16  ;;  %v1076_v1 = vmul.f32 %v1806_v34, %v1806_v34 }
 0x167   : > { %v1135_v22 = vadd.f32 %v1134_v19, %v1072_v32  ;;  %v1003_v40 = vadd.f32 %v1002_v17, %v1789_v13  ;;  %v1077_v13 = vmul.f32 %v1817_v48, %v1817_v48 }
 0x169   : > { %v1004_v23 = vadd.f32 %v1003_v40, %v1810_v42  ;;  %v1136_v25 = vadd.f32 %v1135_v22, %v1073_v43  ;;  %v1078_v42 = vmul.f32 %v1838_v18, %v1838_v18 }
 0x16b   : > { %v1137_v26 = vadd.f32 %v1136_v25, %v1074_v8  ;;  %v1005_v21 = vadd.f32 %v1004_v23, %v1827_v58 }
 0x16d   : > { %v1006_v28 = vadd.f32 %v1005_v21, %v1806_v34  ;;  %v1138_v29 = vadd.f32 %v1137_v26, %v1075_v27  ;;  %v1080_v34 = vmul.f32 %v1834_v9, %v1834_v9 }
 0x16f   : > { %v1139_v33 = vadd.f32 %v1138_v29, %v1076_v1  ;;  %v1007_v35 = vadd.f32 %v1006_v28, %v1817_v48  ;;  %v1081_v48 = vmul.f32 %v1845_v24, %v1845_v24 }
 0x171   : > { %v1008_v49 = vadd.f32 %v1007_v35, %v1838_v18  ;;  %v1140_v36 = vadd.f32 %v1139_v33, %v1077_v13  ;;  %v1082_v18 = vmul.f32 %v1866_v61, %v1866_v61 }
 0x173   : > { %v1141_v37 = vadd.f32 %v1140_v36, %v1078_v42  ;;  %v1009_v58 = vadd.f32 %v1008_v49, %v1855_v30 }
 0x175   : > { %v1010_v56 = vadd.f32 %v1009_v58, %v1834_v9  ;;  %v1142_v44 = vadd.f32 %v1141_v37, %v1079_v39  ;;  %v1084_v9 = vmul.f32 %v1862_v52, %v1862_v52 }
 0x177   : > { %v1143_v45 = vadd.f32 %v1142_v44, %v1080_v34  ;;  %v1011_v46 = vadd.f32 %v1010_v56, %v1845_v24  ;;  %v1085_v24 = vmul.f32 %v1873_v2, %v1873_v2 }
 0x179   : > { %v1012_v47 = vadd.f32 %v1011_v46, %v1866_v61  ;;  %v1144_v53 = vadd.f32 %v1143_v45, %v1081_v48  ;;  %v1086_v61 = vmul.f32 %v1894_v41, %v1894_v41 }
 0x17b   : > { %v1145_v54 = vadd.f32 %v1144_v53, %v1082_v18  ;;  %v1013_v30 = vadd.f32 %v1012_v47, %v1883_v12 }
 0x17d   : > { %v1014_v10 = vadd.f32 %v1013_v30, %v1862_v52  ;;  %v1146_v57 = vadd.f32 %v1145_v54, %v1083_v55  ;;  %v1088_v52 = vmul.f32 %v1890_v31, %v1890_v31 }
 0x17f   : > { %v1147_v59 = vadd.f32 %v1146_v57, %v1084_v9  ;;  %v1015_v60 = vadd.f32 %v1014_v10, %v1873_v2  ;;  %v1089_v2 = vmul.f32 %v1901_v50, %v1901_v50 }
 0x181   : > { %v1016_v20 = vadd.f32 %v1015_v60, %v1894_v41  ;;  %v1148_v63 = vadd.f32 %v1147_v59, %v1085_v24 }
 0x183   : > { %v1149_v4 = vadd.f32 %v1148_v63, %v1086_v61  ;;  %v1017_v12 = vadd.f32 %v1016_v20, %v1911_v62 }
 0x185   : > { %v1018_v3 = vadd.f32 %v1017_v12, %v1890_v31  ;;  %v1150_v14 = vadd.f32 %v1149_v4, %v1087_v0 }
 0x187   : > { %v1019_v5 = vadd.f32 %v1018_v3, %v1901_v50  ;;  %v1151_v41 = vadd.f32 %v1150_v14, %v1088_v52 }
 0x189   : > { %v1020_v6 = vrot.slane %v1019_v5, 4  ;;  %v1152_v38 = vadd.f32 %v1151_v41, %v1089_v2 }
 0x18b   : > { %v1021_v7 = vadd.f32 %v1020_v6, %v1019_v5  ;;  %v1153_v11 = vrot.slane %v1152_v38, 4 }
 0x18d   : > { %v1022_v15 = vrot.slane %v1021_v7, 2  ;;  %v1154_v51 = vadd.f32 %v1153_v11, %v1152_v38 }
 0x18f   : > { %v1023_v62 = vadd.f32 %v1022_v15, %v1021_v7  ;;  %v1155_v16 = vrot.slane %v1154_v51, 2 }
 0x191   : > { %v1024_v32 = vrot.slane %v1023_v62, 1  ;;  %v1156_v17 = vadd.f32 %v1155_v16, %v1154_v51 }
 0x193   : > { %v1157_v19 = vrot.slane %v1156_v17, 1  ;;  %v1025_v31 = vadd.f32 %v1024_v32, %v1023_v62 }
 0x195   : > { %v1158_v50 = vadd.f32 %v1157_v19, %v1156_v17 }
 0x197   : > { %v1160_v43 = vsel %vm1159_vm0, %v1025_v31, %v1158_v50 }
 0x198   : > { %1161 = vst [vmem:[%s275_s10] sm:$0x3] %v1160_v43 }
 0x199 PF: > { %s15_s17 = sadd.s32 1, %s1582_s17   ;;  %s2030_s15 = smov %s1578_s16 }
 0x19a   : > { %p12_p5 = scmp.ge.s32.totalorder %s15_s17, 6   ;;  %s2031_s16 = smov %s2033_s18 }
 0x19c   :  { %14 = sbr.rel (!%p12_p5) target bundleno = 2 (0x2), region = 77 }

// kernel: dcgan_decoder_forward.16
= control target key start
LH: loop header
LB: loop body
LE: loop exit
PB: predicated region body
PF: predicated region fallthrough
CT: control target
= control target key end

     0   :  { %s1353_s12 = smov 0   ;;  %s1355_s13 = smov 0   ;;  %s1628_s0 = inlined_call_operand.vmem [shape: f32[4,512,128], index: 0, kind: input, shape index: {}]   ;;  %s1629_s1 = inlined_call_operand.vmem [shape: f32[1,128], index: 1, kind: input, shape index: {}]   ;;  %s1630_s2 = inlined_call_operand.vmem [shape: f32[1,128], index: 2, kind: input, shape index: {}]   ;;  %s1631_s3 = inlined_call_operand.vmem [shape: bf16[4,512,128], index: 3, kind: output, shape index: {}]  }
   0x1   :  { %s1357_s14 = smov 0  }
   0x2 LB: > { %s25_s15 = sadd.s32 1, %s1327_s13  ;;  %p955_p0 = scmp.ge.s32.totalorder %s1331_s14, 1  ;;  %s1331_s14 = sphi %s1357_s14, %s13_s14   ;;  %s1327_s13 = sphi %s1355_s13, %s1633_s13   ;;  %s1323_s12 = sphi %s1353_s12, %s1632_s12  }
   0x3   : > { %p27_p1 = scmp.ge.s32.totalorder %s25_s15, 4  ;;  %p158_p2 = scmp.lt.s32.totalorder %s1331_s14, 5 }
   0x5   : > { %s1635_s15 = smov (%p27_p1, %s25_s15), 0  ;;  %p159_p3 = pnand %p955_p0, %p158_p2 }
   0x6   : > { %p191_p4 = scmp.lt.s32.totalorder (!%p159_p3), %s1323_s12, 3  ;;  %v1377_v0 = vld [vmem:[%s1629_s1] ss:$0 sm:$0xff] (!%p159_p3) }
   0x7   : > { %162 = sbr.rel (%p159_p3) target bundleno = 97 (0x61), region = 32  ;;  %v1387_v1 = vld [vmem:[%s1630_s2] ss:$0 sm:$0xff] (!%p159_p3) }
   0xe   : > { %s1637_s12 = smov (!%p191_p4, %s1323_s12), 3 }
   0xf   : > { %s1028_s16 = sshll.u32 %s1637_s12, 9  ;;  %s1029_s24 = sshll.u32 %s1637_s12, 8 }
  0x10   : > { %s1382_s21 = scalar_lea.vmem %s1628_s0, %s1028_s16  ;;  %s1420_s27 = scalar_lea.vmem %s1631_s3, %s1029_s24 }
  0x11   : > { %v210_v2 = vld [vmem:[%s1382_s21] sm:$0xff]  ;;  %v211_v3 = vld [vmem:[%s1382_s21 + $0x8] sm:$0xff]  ;;  %v212_v4 = vld [vmem:[%s1382_s21 + $0x10] sm:$0xff] }
  0x12   : > { %v281_v5 = vmul.f32 %v1377_v0, %v210_v2  ;;  %v282_v6 = vmul.f32 %v1377_v0, %v211_v3  ;;  %v213_v7 = vld [vmem:[%s1382_s21 + $0x18] sm:$0xff]  ;;  %v283_v8 = vmul.f32 %v1377_v0, %v212_v4  ;;  %v214_v9 = vld [vmem:[%s1382_s21 + $0x20] sm:$0xff]  ;;  %v215_v10 = vld [vmem:[%s1382_s21 + $0x28] sm:$0xff] }
  0x13   : > { %v284_v11 = vmul.f32 %v1377_v0, %v213_v7  ;;  %v285_v12 = vmul.f32 %v1377_v0, %v214_v9  ;;  %v286_v13 = vmul.f32 %v1377_v0, %v215_v10  ;;  %v216_v14 = vld [vmem:[%s1382_s21 + $0x30] sm:$0xff]  ;;  %v217_v15 = vld [vmem:[%s1382_s21 + $0x38] sm:$0xff]  ;;  %v218_v24 = vld [vmem:[%s1382_s21 + $0x40] sm:$0xff] }
  0x14   : > { %v352_v16 = vadd.f32 %v1387_v1, %v281_v5  ;;  %v353_v17 = vadd.f32 %v1387_v1, %v282_v6  ;;  %v354_v18 = vadd.f32 %v1387_v1, %v283_v8  ;;  %v287_v19 = vmul.f32 %v1377_v0, %v216_v14  ;;  %v219_v25 = vld [vmem:[%s1382_s21 + $0x48] sm:$0xff]  ;;  %v220_v38 = vld [vmem:[%s1382_s21 + $0x50] sm:$0xff]  ;;  %v221_v43 = vld [vmem:[%s1382_s21 + $0x58] sm:$0xff] }
  0x15   : > { %v355_v20 = vadd.f32 %v1387_v1, %v284_v11  ;;  %v356_v21 = vadd.f32 %v1387_v1, %v285_v12  ;;  %v357_v22 = vadd.f32 %v1387_v1, %v286_v13  ;;  %v288_v23 = vmul.f32 %v1377_v0, %v217_v15  ;;  %v222_v44 = vld [vmem:[%s1382_s21 + $0x60] sm:$0xff]  ;;  %v223_v49 = vld [vmem:[%s1382_s21 + $0x68] sm:$0xff]  ;;  %v224_v50 = vld [vmem:[%s1382_s21 + $0x70] sm:$0xff] }
  0x16   : > { %v416_v26 = vmul.f32 0.2, %v352_v16  ;;  %v417_v27 = vmul.f32 0.2, %v353_v17  ;;  %v418_v28 = vmul.f32 0.2, %v354_v18  ;;  %v358_v29 = vadd.f32 %v1387_v1, %v287_v19 }
  0x17   : > { %v419_v30 = vmul.f32 0.2, %v355_v20  ;;  %v420_v31 = vmul.f32 0.2, %v356_v21  ;;  %v421_v32 = vmul.f32 0.2, %v357_v22  ;;  %v359_v33 = vadd.f32 %v1387_v1, %v288_v23 }
  0x18   : > { %v480_v34 = vmax.f32 %v352_v16, %v416_v26  ;;  %v481_v35 = vmax.f32 %v353_v17, %v417_v27  ;;  %v482_v36 = vmax.f32 %v354_v18, %v418_v28  ;;  %v422_v37 = vmul.f32 0.2, %v358_v29  ;;  %v225_v59 = vld [vmem:[%s1382_s21 + $0x78] sm:$0xff]  ;;  %v226_v10 = vld [vmem:[%s1382_s21 + $0x80] sm:$0xff]  ;;  %v227_v15 = vld [vmem:[%s1382_s21 + $0x88] sm:$0xff] }
  0x19   : > { %v483_v39 = vmax.f32 %v355_v20, %v419_v30  ;;  %v484_v40 = vmax.f32 %v356_v21, %v420_v31  ;;  %v485_v41 = vmax.f32 %v357_v22, %v421_v32  ;;  %v423_v42 = vmul.f32 0.2, %v359_v33  ;;  %v228_v20 = vld [vmem:[%s1382_s21 + $0x90] sm:$0xff]  ;;  %v229_v21 = vld [vmem:[%s1382_s21 + $0x98] sm:$0xff]  ;;  %v230_v26 = vld [vmem:[%s1382_s21 + $0xa0] sm:$0xff] }
  0x1a   : > { %v1097_v45 = vpack.c.bf16 %v481_v35, %v480_v34  ;;  %v486_v46 = vmax.f32 %v358_v29, %v422_v37  ;;  %v289_v47 = vmul.f32 %v1377_v0, %v218_v24  ;;  %v290_v48 = vmul.f32 %v1377_v0, %v219_v25  ;;  %v231_v31 = vld [vmem:[%s1382_s21 + $0xa8] sm:$0xff] }
  0x1b   : > { %v1102_v51 = vpack.c.bf16 %v483_v39, %v482_v36  ;;  %v1107_v52 = vpack.c.bf16 %v485_v41, %v484_v40  ;;  %v487_v53 = vmax.f32 %v359_v33, %v423_v42  ;;  %v291_v54 = vmul.f32 %v1377_v0, %v220_v38  ;;  %v232_v36 = vld [vmem:[%s1382_s21 + $0xb0] sm:$0xff] }
  0x1c   : > { %1098 = vst [vmem:[%s1420_s27] sm:$0xff] %v1097_v45   ;;  %v360_v55 = vadd.f32 %v1387_v1, %v289_v47  ;;  %v361_v56 = vadd.f32 %v1387_v1, %v290_v48  ;;  %v292_v57 = vmul.f32 %v1377_v0, %v221_v43  ;;  %v293_v58 = vmul.f32 %v1377_v0, %v222_v44  ;;  %v233_v45 = vld [vmem:[%s1382_s21 + $0xb8] sm:$0xff] }
  0x1d   : > { %1254 = vst [vmem:[%s1420_s27 + $0x8] sm:$0xff] %v1102_v51   ;;  %1255 = vst [vmem:[%s1420_s27 + $0x10] sm:$0xff] %v1107_v52   ;;  %v1112_v60 = vpack.c.bf16 %v487_v53, %v486_v46  ;;  %v362_v61 = vadd.f32 %v1387_v1, %v291_v54  ;;  %v294_v62 = vmul.f32 %v1377_v0, %v223_v49 }
  0x1e   : > { %v295_v63 = vmul.f32 %v1377_v0, %v224_v50  ;;  %v424_v2 = vmul.f32 0.2, %v360_v55  ;;  %v425_v3 = vmul.f32 0.2, %v361_v56  ;;  %v363_v4 = vadd.f32 %v1387_v1, %v292_v57  ;;  %v234_v50 = vld [vmem:[%s1382_s21 + $0xc0] sm:$0xff] }
  0x1f   : > { %v364_v5 = vadd.f32 %v1387_v1, %v293_v58  ;;  %1256 = vst [vmem:[%s1420_s27 + $0x18] sm:$0xff] %v1112_v60   ;;  %v426_v6 = vmul.f32 0.2, %v362_v61  ;;  %v365_v7 = vadd.f32 %v1387_v1, %v294_v62  ;;  %v296_v8 = vmul.f32 %v1377_v0, %v225_v59  ;;  %v235_v59 = vld [vmem:[%s1382_s21 + $0xc8] sm:$0xff] }
  0x20   : > { %v366_v9 = vadd.f32 %v1387_v1, %v295_v63  ;;  %v488_v11 = vmax.f32 %v360_v55, %v424_v2  ;;  %v489_v12 = vmax.f32 %v361_v56, %v425_v3  ;;  %v427_v13 = vmul.f32 0.2, %v363_v4  ;;  %v236_v2 = vld [vmem:[%s1382_s21 + $0xd0] sm:$0xff]  ;;  %v237_v3 = vld [vmem:[%s1382_s21 + $0xd8] sm:$0xff] }
  0x21   : > { %v428_v14 = vmul.f32 0.2, %v364_v5  ;;  %v490_v16 = vmax.f32 %v362_v61, %v426_v6  ;;  %v429_v17 = vmul.f32 0.2, %v365_v7  ;;  %v367_v18 = vadd.f32 %v1387_v1, %v296_v8  ;;  %v238_v8 = vld [vmem:[%s1382_s21 + $0xe0] sm:$0xff] }
  0x22   : > { %v430_v19 = vmul.f32 0.2, %v366_v9  ;;  %v1117_v22 = vpack.c.bf16 %v489_v12, %v488_v11  ;;  %v491_v23 = vmax.f32 %v363_v4, %v427_v13  ;;  %v297_v25 = vmul.f32 %v1377_v0, %v226_v10  ;;  %v239_v13 = vld [vmem:[%s1382_s21 + $0xe8] sm:$0xff] }
  0x23   : > { %v492_v24 = vmax.f32 %v364_v5, %v428_v14  ;;  %v493_v27 = vmax.f32 %v365_v7, %v429_v17  ;;  %v431_v28 = vmul.f32 0.2, %v367_v18  ;;  %v298_v30 = vmul.f32 %v1377_v0, %v227_v15 }
  0x24   : > { %v494_v29 = vmax.f32 %v366_v9, %v430_v19  ;;  %1257 = vst [vmem:[%s1420_s27 + $0x20] sm:$0xff] %v1117_v22   ;;  %v1122_v32 = vpack.c.bf16 %v491_v23, %v490_v16  ;;  %v368_v33 = vadd.f32 %v1387_v1, %v297_v25  ;;  %v299_v34 = vmul.f32 %v1377_v0, %v228_v20 }
  0x25   : > { %v300_v35 = vmul.f32 %v1377_v0, %v229_v21  ;;  %v1127_v37 = vpack.c.bf16 %v493_v27, %v492_v24  ;;  %v495_v38 = vmax.f32 %v367_v18, %v431_v28  ;;  %v369_v39 = vadd.f32 %v1387_v1, %v298_v30  ;;  %v240_v18 = vld [vmem:[%s1382_s21 + $0xf0] sm:$0xff]  ;;  %v241_v27 = vld [vmem:[%s1382_s21 + $0xf8] sm:$0xff] }
  0x26   : > { %v301_v40 = vmul.f32 %v1377_v0, %v230_v26  ;;  %1258 = vst [vmem:[%s1420_s27 + $0x28] sm:$0xff] %v1122_v32   ;;  %v432_v41 = vmul.f32 0.2, %v368_v33  ;;  %v370_v42 = vadd.f32 %v1387_v1, %v299_v34  ;;  %v302_v44 = vmul.f32 %v1377_v0, %v231_v31  ;;  %v242_v32 = vld [vmem:[%s1382_s21 + $0x100] sm:$0xff] }
  0x27   : > { %v371_v43 = vadd.f32 %v1387_v1, %v300_v35  ;;  %1259 = vst [vmem:[%s1420_s27 + $0x30] sm:$0xff] %v1127_v37   ;;  %v1132_v46 = vpack.c.bf16 %v495_v38, %v494_v29  ;;  %v433_v47 = vmul.f32 0.2, %v369_v39  ;;  %v303_v49 = vmul.f32 %v1377_v0, %v232_v36 }
  0x28   : > { %v372_v48 = vadd.f32 %v1387_v1, %v301_v40  ;;  %v496_v51 = vmax.f32 %v368_v33, %v432_v41  ;;  %v434_v52 = vmul.f32 0.2, %v370_v42  ;;  %v373_v54 = vadd.f32 %v1387_v1, %v302_v44  ;;  %v243_v41 = vld [vmem:[%s1382_s21 + $0x108] sm:$0xff] }
  0x29   : > { %v435_v53 = vmul.f32 0.2, %v371_v43  ;;  %1260 = vst [vmem:[%s1420_s27 + $0x38] sm:$0xff] %v1132_v46   ;;  %v497_v55 = vmax.f32 %v369_v39, %v433_v47  ;;  %v304_v57 = vmul.f32 %v1377_v0, %v233_v45  ;;  %v374_v58 = vadd.f32 %v1387_v1, %v303_v49  ;;  %v244_v46 = vld [vmem:[%s1382_s21 + $0x110] sm:$0xff]  ;;  %v245_v47 = vld [vmem:[%s1382_s21 + $0x118] sm:$0xff] }
  0x2a   : > { %v436_v56 = vmul.f32 0.2, %v372_v48  ;;  %v498_v60 = vmax.f32 %v370_v42, %v434_v52  ;;  %v437_v62 = vmul.f32 0.2, %v373_v54  ;;  %v305_v63 = vmul.f32 %v1377_v0, %v234_v50  ;;  %v246_v52 = vld [vmem:[%s1382_s21 + $0x120] sm:$0xff] }
  0x2b   : > { %v499_v61 = vmax.f32 %v371_v43, %v435_v53  ;;  %v1137_v4 = vpack.c.bf16 %v497_v55, %v496_v51  ;;  %v375_v6 = vadd.f32 %v1387_v1, %v304_v57  ;;  %v438_v7 = vmul.f32 0.2, %v374_v58  ;;  %v247_v57 = vld [vmem:[%s1382_s21 + $0x128] sm:$0xff] }
  0x2c   : > { %v500_v5 = vmax.f32 %v372_v48, %v436_v56  ;;  %v501_v10 = vmax.f32 %v373_v54, %v437_v62  ;;  %v306_v11 = vmul.f32 %v1377_v0, %v235_v59  ;;  %v376_v12 = vadd.f32 %v1387_v1, %v305_v63  ;;  %v248_v62 = vld [vmem:[%s1382_s21 + $0x130] sm:$0xff] }
  0x2d   : > { %v1142_v9 = vpack.c.bf16 %v499_v61, %v498_v60  ;;  %1261 = vst [vmem:[%s1420_s27 + $0x40] sm:$0xff] %v1137_v4   ;;  %v439_v14 = vmul.f32 0.2, %v375_v6  ;;  %v502_v15 = vmax.f32 %v374_v58, %v438_v7  ;;  %v307_v16 = vmul.f32 %v1377_v0, %v236_v2 }
  0x2e   : > { %v308_v17 = vmul.f32 %v1377_v0, %v237_v3  ;;  %v1147_v19 = vpack.c.bf16 %v501_v10, %v500_v5  ;;  %v377_v20 = vadd.f32 %v1387_v1, %v306_v11  ;;  %v440_v21 = vmul.f32 0.2, %v376_v12 }
  0x2f   : > { %1262 = vst [vmem:[%s1420_s27 + $0x48] sm:$0xff] %v1142_v9   ;;  %v309_v22 = vmul.f32 %v1377_v0, %v238_v8  ;;  %v503_v23 = vmax.f32 %v375_v6, %v439_v14  ;;  %v378_v24 = vadd.f32 %v1387_v1, %v307_v16  ;;  %v310_v26 = vmul.f32 %v1377_v0, %v239_v13  ;;  %v249_v9 = vld [vmem:[%s1382_s21 + $0x138] sm:$0xff]  ;;  %v250_v14 = vld [vmem:[%s1382_s21 + $0x140] sm:$0xff] }
  0x30   : > { %v379_v25 = vadd.f32 %v1387_v1, %v308_v17  ;;  %1263 = vst [vmem:[%s1420_s27 + $0x50] sm:$0xff] %v1147_v19   ;;  %v441_v28 = vmul.f32 0.2, %v377_v20  ;;  %v504_v29 = vmax.f32 %v376_v12, %v440_v21  ;;  %v311_v31 = vmul.f32 %v1377_v0, %v240_v18 }
  0x31   : > { %v380_v30 = vadd.f32 %v1387_v1, %v309_v22  ;;  %v1152_v33 = vpack.c.bf16 %v503_v23, %v502_v15  ;;  %v442_v34 = vmul.f32 0.2, %v378_v24  ;;  %v381_v36 = vadd.f32 %v1387_v1, %v310_v26  ;;  %v251_v23 = vld [vmem:[%s1382_s21 + $0x148] sm:$0xff] }
  0x32   : > { %v443_v35 = vmul.f32 0.2, %v379_v25  ;;  %v505_v37 = vmax.f32 %v377_v20, %v441_v28  ;;  %v312_v39 = vmul.f32 %v1377_v0, %v241_v27  ;;  %v382_v40 = vadd.f32 %v1387_v1, %v311_v31  ;;  %v252_v28 = vld [vmem:[%s1382_s21 + $0x150] sm:$0xff] }
  0x33   : > { %v444_v38 = vmul.f32 0.2, %v380_v30  ;;  %1264 = vst [vmem:[%s1420_s27 + $0x58] sm:$0xff] %v1152_v33   ;;  %v506_v42 = vmax.f32 %v378_v24, %v442_v34  ;;  %v445_v44 = vmul.f32 0.2, %v381_v36  ;;  %v313_v45 = vmul.f32 %v1377_v0, %v242_v32  ;;  %v254_v34 = vld [vmem:[%s1382_s21 + $0x160] sm:$0xff] }
  0x34   : > { %v507_v43 = vmax.f32 %v379_v25, %v443_v35  ;;  %v1157_v48 = vpack.c.bf16 %v505_v37, %v504_v29  ;;  %v383_v50 = vadd.f32 %v1387_v1, %v312_v39  ;;  %v446_v51 = vmul.f32 0.2, %v382_v40  ;;  %v253_v29 = vld [vmem:[%s1382_s21 + $0x158] sm:$0xff]  ;;  %v255_v39 = vld [vmem:[%s1382_s21 + $0x168] sm:$0xff] }
  0x35   : > { %v508_v49 = vmax.f32 %v380_v30, %v444_v38  ;;  %v509_v54 = vmax.f32 %v381_v36, %v445_v44  ;;  %v314_v55 = vmul.f32 %v1377_v0, %v243_v41  ;;  %v384_v56 = vadd.f32 %v1387_v1, %v313_v45  ;;  %v256_v44 = vld [vmem:[%s1382_s21 + $0x170] sm:$0xff] }
  0x36   : > { %v1162_v53 = vpack.c.bf16 %v507_v43, %v506_v42  ;;  %1265 = vst [vmem:[%s1420_s27 + $0x60] sm:$0xff] %v1157_v48   ;;  %v447_v58 = vmul.f32 0.2, %v383_v50  ;;  %v510_v59 = vmax.f32 %v382_v40, %v446_v51  ;;  %v315_v60 = vmul.f32 %v1377_v0, %v244_v46 }
  0x37   : > { %v316_v61 = vmul.f32 %v1377_v0, %v245_v47  ;;  %v1167_v63 = vpack.c.bf16 %v509_v54, %v508_v49  ;;  %v385_v2 = vadd.f32 %v1387_v1, %v314_v55  ;;  %v448_v3 = vmul.f32 0.2, %v384_v56 }
  0x38   : > { %1266 = vst [vmem:[%s1420_s27 + $0x68] sm:$0xff] %v1162_v53   ;;  %v317_v4 = vmul.f32 %v1377_v0, %v246_v52  ;;  %v511_v5 = vmax.f32 %v383_v50, %v447_v58  ;;  %v386_v6 = vadd.f32 %v1387_v1, %v315_v60  ;;  %v318_v8 = vmul.f32 %v1377_v0, %v247_v57  ;;  %v257_v53 = vld [vmem:[%s1382_s21 + $0x178] sm:$0xff]  ;;  %v258_v58 = vld [vmem:[%s1382_s21 + $0x180] sm:$0xff] }
  0x39   : > { %v387_v7 = vadd.f32 %v1387_v1, %v316_v61  ;;  %1267 = vst [vmem:[%s1420_s27 + $0x70] sm:$0xff] %v1167_v63   ;;  %v449_v10 = vmul.f32 0.2, %v385_v2  ;;  %v512_v11 = vmax.f32 %v384_v56, %v448_v3  ;;  %v319_v13 = vmul.f32 %v1377_v0, %v248_v62 }
  0x3a   : > { %v388_v12 = vadd.f32 %v1387_v1, %v317_v4  ;;  %v1172_v15 = vpack.c.bf16 %v511_v5, %v510_v59  ;;  %v450_v16 = vmul.f32 0.2, %v386_v6  ;;  %v389_v18 = vadd.f32 %v1387_v1, %v318_v8  ;;  %v259_v5 = vld [vmem:[%s1382_s21 + $0x188] sm:$0xff] }
  0x3b   : > { %v451_v17 = vmul.f32 0.2, %v387_v7  ;;  %v513_v19 = vmax.f32 %v385_v2, %v449_v10  ;;  %v320_v21 = vmul.f32 %v1377_v0, %v249_v9  ;;  %v390_v22 = vadd.f32 %v1387_v1, %v319_v13  ;;  %v260_v10 = vld [vmem:[%s1382_s21 + $0x190] sm:$0xff] }
  0x3c   : > { %v452_v20 = vmul.f32 0.2, %v388_v12  ;;  %1268 = vst [vmem:[%s1420_s27 + $0x78] sm:$0xff] %v1172_v15   ;;  %v514_v24 = vmax.f32 %v386_v6, %v450_v16  ;;  %v453_v26 = vmul.f32 0.2, %v389_v18  ;;  %v321_v27 = vmul.f32 %v1377_v0, %v250_v14  ;;  %v262_v16 = vld [vmem:[%s1382_s21 + $0x1a0] sm:$0xff] }
  0x3d   : > { %v515_v25 = vmax.f32 %v387_v7, %v451_v17  ;;  %v1177_v30 = vpack.c.bf16 %v513_v19, %v512_v11  ;;  %v391_v32 = vadd.f32 %v1387_v1, %v320_v21  ;;  %v454_v33 = vmul.f32 0.2, %v390_v22  ;;  %v261_v11 = vld [vmem:[%s1382_s21 + $0x198] sm:$0xff]  ;;  %v263_v21 = vld [vmem:[%s1382_s21 + $0x1a8] sm:$0xff] }
  0x3e   : > { %v516_v31 = vmax.f32 %v388_v12, %v452_v20  ;;  %v517_v36 = vmax.f32 %v389_v18, %v453_v26  ;;  %v322_v37 = vmul.f32 %v1377_v0, %v251_v23  ;;  %v392_v38 = vadd.f32 %v1387_v1, %v321_v27  ;;  %v264_v26 = vld [vmem:[%s1382_s21 + $0x1b0] sm:$0xff] }
  0x3f   : > { %v1182_v35 = vpack.c.bf16 %v515_v25, %v514_v24  ;;  %1269 = vst [vmem:[%s1420_s27 + $0x80] sm:$0xff] %v1177_v30   ;;  %v455_v40 = vmul.f32 0.2, %v391_v32  ;;  %v518_v41 = vmax.f32 %v390_v22, %v454_v33  ;;  %v323_v42 = vmul.f32 %v1377_v0, %v252_v28 }
  0x40   : > { %v324_v43 = vmul.f32 %v1377_v0, %v253_v29  ;;  %v1187_v45 = vpack.c.bf16 %v517_v36, %v516_v31  ;;  %v393_v46 = vadd.f32 %v1387_v1, %v322_v37  ;;  %v456_v47 = vmul.f32 0.2, %v392_v38 }
  0x41   : > { %1270 = vst [vmem:[%s1420_s27 + $0x88] sm:$0xff] %v1182_v35   ;;  %v325_v48 = vmul.f32 %v1377_v0, %v254_v34  ;;  %v519_v49 = vmax.f32 %v391_v32, %v455_v40  ;;  %v394_v50 = vadd.f32 %v1387_v1, %v323_v42  ;;  %v326_v52 = vmul.f32 %v1377_v0, %v255_v39  ;;  %v265_v35 = vld [vmem:[%s1382_s21 + $0x1b8] sm:$0xff]  ;;  %v266_v40 = vld [vmem:[%s1382_s21 + $0x1c0] sm:$0xff] }
  0x42   : > { %v395_v51 = vadd.f32 %v1387_v1, %v324_v43  ;;  %1271 = vst [vmem:[%s1420_s27 + $0x90] sm:$0xff] %v1187_v45   ;;  %v457_v54 = vmul.f32 0.2, %v393_v46  ;;  %v520_v55 = vmax.f32 %v392_v38, %v456_v47  ;;  %v327_v57 = vmul.f32 %v1377_v0, %v256_v44 }
  0x43   : > { %v396_v56 = vadd.f32 %v1387_v1, %v325_v48  ;;  %v1192_v59 = vpack.c.bf16 %v519_v49, %v518_v41  ;;  %v458_v60 = vmul.f32 0.2, %v394_v50  ;;  %v397_v62 = vadd.f32 %v1387_v1, %v326_v52  ;;  %v267_v49 = vld [vmem:[%s1382_s21 + $0x1c8] sm:$0xff] }
  0x44   : > { %v459_v61 = vmul.f32 0.2, %v395_v51  ;;  %v521_v63 = vmax.f32 %v393_v46, %v457_v54  ;;  %v328_v3 = vmul.f32 %v1377_v0, %v257_v53  ;;  %v398_v4 = vadd.f32 %v1387_v1, %v327_v57  ;;  %v268_v54 = vld [vmem:[%s1382_s21 + $0x1d0] sm:$0xff] }
  0x45   : > { %v460_v2 = vmul.f32 0.2, %v396_v56  ;;  %1272 = vst [vmem:[%s1420_s27 + $0x98] sm:$0xff] %v1192_v59   ;;  %v522_v6 = vmax.f32 %v394_v50, %v458_v60  ;;  %v461_v8 = vmul.f32 0.2, %v397_v62  ;;  %v329_v9 = vmul.f32 %v1377_v0, %v258_v58  ;;  %v270_v60 = vld [vmem:[%s1382_s21 + $0x1e0] sm:$0xff] }
  0x46   : > { %v523_v7 = vmax.f32 %v395_v51, %v459_v61  ;;  %v1197_v12 = vpack.c.bf16 %v521_v63, %v520_v55  ;;  %v399_v14 = vadd.f32 %v1387_v1, %v328_v3  ;;  %v462_v15 = vmul.f32 0.2, %v398_v4  ;;  %v269_v55 = vld [vmem:[%s1382_s21 + $0x1d8] sm:$0xff]  ;;  %v271_v3 = vld [vmem:[%s1382_s21 + $0x1e8] sm:$0xff] }
  0x47   : > { %v524_v13 = vmax.f32 %v396_v56, %v460_v2  ;;  %v525_v18 = vmax.f32 %v397_v62, %v461_v8  ;;  %v330_v19 = vmul.f32 %v1377_v0, %v259_v5  ;;  %v400_v20 = vadd.f32 %v1387_v1, %v329_v9  ;;  %v272_v8 = vld [vmem:[%s1382_s21 + $0x1f0] sm:$0xff] }
  0x48   : > { %v1202_v17 = vpack.c.bf16 %v523_v7, %v522_v6  ;;  %1273 = vst [vmem:[%s1420_s27 + $0xa0] sm:$0xff] %v1197_v12   ;;  %v463_v22 = vmul.f32 0.2, %v399_v14  ;;  %v526_v23 = vmax.f32 %v398_v4, %v462_v15  ;;  %v331_v24 = vmul.f32 %v1377_v0, %v260_v10 }
  0x49   : > { %v332_v25 = vmul.f32 %v1377_v0, %v261_v11  ;;  %v1207_v27 = vpack.c.bf16 %v525_v18, %v524_v13  ;;  %v401_v28 = vadd.f32 %v1387_v1, %v330_v19  ;;  %v464_v29 = vmul.f32 0.2, %v400_v20 }
  0x4a   : > { %1274 = vst [vmem:[%s1420_s27 + $0xa8] sm:$0xff] %v1202_v17   ;;  %v333_v30 = vmul.f32 %v1377_v0, %v262_v16  ;;  %v527_v31 = vmax.f32 %v399_v14, %v463_v22  ;;  %v402_v32 = vadd.f32 %v1387_v1, %v331_v24  ;;  %v334_v34 = vmul.f32 %v1377_v0, %v263_v21  ;;  %v273_v17 = vld [vmem:[%s1382_s21 + $0x1f8] sm:$0xff] }
  0x4b   : > { %v403_v33 = vadd.f32 %v1387_v1, %v332_v25  ;;  %1275 = vst [vmem:[%s1420_s27 + $0xb0] sm:$0xff] %v1207_v27   ;;  %v465_v36 = vmul.f32 0.2, %v401_v28  ;;  %v528_v37 = vmax.f32 %v400_v20, %v464_v29  ;;  %v335_v39 = vmul.f32 %v1377_v0, %v264_v26 }
  0x4c   : > { %v404_v38 = vadd.f32 %v1387_v1, %v333_v30  ;;  %v1212_v41 = vpack.c.bf16 %v527_v31, %v526_v23  ;;  %v466_v42 = vmul.f32 0.2, %v402_v32  ;;  %v405_v44 = vadd.f32 %v1387_v1, %v334_v34 }
  0x4d   : > { %v467_v43 = vmul.f32 0.2, %v403_v33  ;;  %v529_v45 = vmax.f32 %v401_v28, %v465_v36  ;;  %v336_v47 = vmul.f32 %v1377_v0, %v265_v35  ;;  %v406_v48 = vadd.f32 %v1387_v1, %v335_v39 }
  0x4e   : > { %v468_v46 = vmul.f32 0.2, %v404_v38  ;;  %1276 = vst [vmem:[%s1420_s27 + $0xb8] sm:$0xff] %v1212_v41   ;;  %v530_v50 = vmax.f32 %v402_v32, %v466_v42  ;;  %v469_v52 = vmul.f32 0.2, %v405_v44  ;;  %v337_v53 = vmul.f32 %v1377_v0, %v266_v40 }
  0x4f   : > { %v531_v51 = vmax.f32 %v403_v33, %v467_v43  ;;  %v1217_v56 = vpack.c.bf16 %v529_v45, %v528_v37  ;;  %v407_v58 = vadd.f32 %v1387_v1, %v336_v47  ;;  %v470_v59 = vmul.f32 0.2, %v406_v48 }
  0x50   : > { %v532_v57 = vmax.f32 %v404_v38, %v468_v46  ;;  %v533_v62 = vmax.f32 %v405_v44, %v469_v52  ;;  %v338_v63 = vmul.f32 %v1377_v0, %v267_v49  ;;  %v408_v2 = vadd.f32 %v1387_v1, %v337_v53 }
  0x51   : > { %v1222_v61 = vpack.c.bf16 %v531_v51, %v530_v50  ;;  %1277 = vst [vmem:[%s1420_s27 + $0xc0] sm:$0xff] %v1217_v56   ;;  %v471_v4 = vmul.f32 0.2, %v407_v58  ;;  %v534_v5 = vmax.f32 %v406_v48, %v470_v59  ;;  %v339_v6 = vmul.f32 %v1377_v0, %v268_v54 }
  0x52   : > { %v340_v7 = vmul.f32 %v1377_v0, %v269_v55  ;;  %v1227_v9 = vpack.c.bf16 %v533_v62, %v532_v57  ;;  %v409_v10 = vadd.f32 %v1387_v1, %v338_v63  ;;  %v472_v11 = vmul.f32 0.2, %v408_v2 }
  0x53   : > { %1278 = vst [vmem:[%s1420_s27 + $0xc8] sm:$0xff] %v1222_v61   ;;  %v341_v12 = vmul.f32 %v1377_v0, %v270_v60  ;;  %v535_v13 = vmax.f32 %v407_v58, %v471_v4  ;;  %v410_v14 = vadd.f32 %v1387_v1, %v339_v6  ;;  %v342_v16 = vmul.f32 %v1377_v0, %v271_v3 }
  0x54   : > { %v411_v15 = vadd.f32 %v1387_v1, %v340_v7  ;;  %1279 = vst [vmem:[%s1420_s27 + $0xd0] sm:$0xff] %v1227_v9   ;;  %v473_v18 = vmul.f32 0.2, %v409_v10  ;;  %v536_v19 = vmax.f32 %v408_v2, %v472_v11  ;;  %v343_v21 = vmul.f32 %v1377_v0, %v272_v8 }
  0x55   : > { %v412_v20 = vadd.f32 %v1387_v1, %v341_v12  ;;  %v1232_v22 = vpack.c.bf16 %v535_v13, %v534_v5  ;;  %v474_v23 = vmul.f32 0.2, %v410_v14  ;;  %v413_v25 = vadd.f32 %v1387_v1, %v342_v16 }
  0x56   : > { %v475_v24 = vmul.f32 0.2, %v411_v15  ;;  %v537_v26 = vmax.f32 %v409_v10, %v473_v18  ;;  %v344_v28 = vmul.f32 %v1377_v0, %v273_v17  ;;  %v414_v29 = vadd.f32 %v1387_v1, %v343_v21 }
  0x57   : > { %v476_v27 = vmul.f32 0.2, %v412_v20  ;;  %1280 = vst [vmem:[%s1420_s27 + $0xd8] sm:$0xff] %v1232_v22   ;;  %v538_v30 = vmax.f32 %v410_v14, %v474_v23  ;;  %v477_v32 = vmul.f32 0.2, %v413_v25 }
  0x58   : > { %v539_v31 = vmax.f32 %v411_v15, %v475_v24  ;;  %v1237_v33 = vpack.c.bf16 %v537_v26, %v536_v19  ;;  %v415_v35 = vadd.f32 %v1387_v1, %v344_v28  ;;  %v478_v36 = vmul.f32 0.2, %v414_v29 }
  0x59   : > { %v540_v34 = vmax.f32 %v412_v20, %v476_v27  ;;  %v541_v38 = vmax.f32 %v413_v25, %v477_v32 }
  0x5a   : > { %v1242_v37 = vpack.c.bf16 %v539_v31, %v538_v30  ;;  %1281 = vst [vmem:[%s1420_s27 + $0xe0] sm:$0xff] %v1237_v33   ;;  %v479_v39 = vmul.f32 0.2, %v415_v35  ;;  %v542_v40 = vmax.f32 %v414_v29, %v478_v36 }
  0x5b   : > { %v1247_v0 = vpack.c.bf16 %v541_v38, %v540_v34 }
  0x5c   : > { %1282 = vst [vmem:[%s1420_s27 + $0xe8] sm:$0xff] %v1242_v37   ;;  %v543_v41 = vmax.f32 %v415_v35, %v479_v39 }
  0x5d   : > { %1283 = vst [vmem:[%s1420_s27 + $0xf0] sm:$0xff] %v1247_v0  }
  0x5e   : > { %v1252_v42 = vpack.c.bf16 %v543_v41, %v542_v40 }
  0x60   : > { %1284 = vst [vmem:[%s1420_s27 + $0xf8] sm:$0xff] %v1252_v42  }
  0x61 PF: > { %s13_s14 = sadd.s32 1, %s1331_s14   ;;  %s1632_s12 = smov %s1327_s13 }
  0x62   : > { %p10_p5 = scmp.ge.s32.totalorder %s13_s14, 6   ;;  %s1633_s13 = smov %s1635_s15 }
  0x64   :  { %12 = sbr.rel (!%p10_p5) target bundleno = 2 (0x2), region = 62 }

// kernel: dcgan_decoder_forward.17
= control target key start
LH: loop header
LB: loop body
LE: loop exit
PB: predicated region body
PF: predicated region fallthrough
CT: control target
= control target key end

     0   :  { %s2087_s12 = smov 0   ;;  %s2089_s13 = smov 0   ;;  %s2469_s0 = inlined_call_operand.vmem [shape: bf16[4,2048,64], index: 0, kind: input, shape index: {}]   ;;  %s2470_s1 = inlined_call_operand.vmem [shape: bf16[4,64,128], index: 1, kind: input, shape index: {}]   ;;  %s2471_s2 = inlined_call_operand.vmem [shape: f32[1,128], index: 2, kind: input, shape index: {}]   ;;  %s2472_s3 = inlined_call_operand.vmem [shape: f32[4,2048,128], index: 3, kind: output, shape index: {}]  }
   0x1   :  { %s2091_s14 = smov 0   ;;  %s2093_s15 = smov 0  }
   0x2   :  { %s2095_s16 = smov 0  }
   0x3 LB: > { %s22_s17 = sadd.s32 1, %s2057_s14  ;;  %s25_s18 = sadd.s32 1, %s2061_s15  ;;  %s2065_s16 = sphi %s2095_s16, %s13_s16   ;;  %s2061_s15 = sphi %s2093_s15, %s2476_s15   ;;  %s2057_s14 = sphi %s2091_s14, %s2475_s14   ;;  %s2053_s13 = sphi %s2089_s13, %s2474_s13   ;;  %s2049_s12 = sphi %s2087_s12, %s2473_s12  }
   0x4   : > { %p23_p0 = scmp.ge.s32.totalorder %s22_s17, 4  ;;  %p1434_p1 = scmp.ge.s32.totalorder %s2065_s16, 1 }
   0x5   : > { %p168_p2 = scmp.lt.s32.totalorder %s2065_s16, 17 }
   0x6   : > { %s2478_s17 = smov (%p23_p0, %s22_s17), 0  ;;  %s2480_s18 = smov (!%p23_p0, %s25_s18), %s2061_s15 }
   0x7   : > { %p169_p3 = pnand %p1434_p1, %p168_p2  ;;  %p27_p4 = scmp.ge.s32.totalorder %s2480_s18, 4 }
   0x8   : > { %s1435_s19 = sshll.u32 (!%p169_p3), %s2049_s12, 6  ;;  %p206_p5 = scmp.lt.s32.totalorder (!%p169_p3), %s2053_s13, 3  ;;  %vm494_vm0 = vcmask (!%p169_p3), 523264   ;;  %v2195_v36 = vld [vmem:[%s2471_s2] ss:$0 sm:$0xff] (!%p169_p3) }
   0x9   : > { %s2482_s18 = smov (%p27_p4, %s2480_s18), 0  ;;  %172 = sbr.rel (%p169_p3) target bundleno = 395 (0x18b), region = 32 }
   0xa   : > { %p208_p6 = scmp.lt.s32.totalorder (!%p169_p3), %s1435_s19, 255 }
  0x10   : > { %s2484_s13 = smov (!%p206_p5, %s2053_s13), 3  ;;  %s2486_s19 = smov (!%p208_p6, %s1435_s19), 255 }
  0x11   : > { %s1436_s20 = sshll.u32 %s2484_s13, 8  ;;  %s1578_s21 = sshll.u32 %s2484_s13, 5 }
  0x12   : > { %s2117_s22 = sadd.s32 %s1436_s20, %s2486_s19  ;;  %s219_s25 = scalar_lea.vmem %s2470_s1, %s1578_s21 }
  0x13   : > { %s1437_s26 = sshll.u32 %s2117_s22, 2  ;;  %v1735_v0 = vld [vmem:[%s219_s25] sm:$0xff]   ;;  %v1736_v1 = vld [vmem:[%s219_s25 + $0x8] sm:$0xff]   ;;  %v1737_v2 = vld [vmem:[%s219_s25 + $0x10] sm:$0xff]   ;;  %s1442_s5 = sshll.u32 %s2117_s22, 3 }
  0x14   : > { %s2126_s29 = scalar_lea.vmem %s2469_s0, %s1437_s26  ;;  %1615 = vmatprep.subr.bf16.mxu0 %v1735_v0  ;;  %1687 = vmatprep.subr.bf16.mxu1 %v1735_v0  ;;  %v1738_v5 = vld [vmem:[%s219_s25 + $0x18] sm:$0xff]   ;;  %s2225_s8 = scalar_lea.vmem %s2472_s3, %s1442_s5 }
  0x15   : > { %1616 = vmatpush3.bf16.msra.mxu0 %v1735_v0  ;;  %1691 = vmatpush3.bf16.msra.mxu1 %v1735_v0  ;;  %v1739_v3 = vld [vmem:[%s2126_s29] sm:$0xff]   ;;  %v1741_v6 = vld [vmem:[%s2126_s29 + $0x8] sm:$0xff]   ;;  %v1743_v8 = vld [vmem:[%s2126_s29 + $0x10] sm:$0xff]  }
  0x16   : > { %1617 = vmatprep.subr.bf16.mxu0 %v1736_v1  ;;  %1688 = vmatprep.subr.bf16.mxu1 %v1736_v1  ;;  %v1740_v4 = vld [vmem:[%s2126_s29 + $0x80] sm:$0xff]   ;;  %v1742_v7 = vld [vmem:[%s2126_s29 + $0x88] sm:$0xff]   ;;  %v1744_v9 = vld [vmem:[%s2126_s29 + $0x90] sm:$0xff]  }
  0x17   : > { %1623 = vmatprep.mubr.msk.bf16.mxu0 %vm494_vm0, %v1739_v3  ;;  %1655 = vmatprep.mubr.msk.bf16.mxu1 %vm494_vm0, %v1740_v4  ;;  %v1745_v10 = vld [vmem:[%s2126_s29 + $0x18] sm:$0xff]   ;;  %v1747_v12 = vld [vmem:[%s2126_s29 + $0x20] sm:$0xff]   ;;  %v1749_v14 = vld [vmem:[%s2126_s29 + $0x28] sm:$0xff]  }
  0x18   : > { %v1746_v11 = vld [vmem:[%s2126_s29 + $0x98] sm:$0xff]   ;;  %v1748_v13 = vld [vmem:[%s2126_s29 + $0xa0] sm:$0xff]   ;;  %v1750_v15 = vld [vmem:[%s2126_s29 + $0xa8] sm:$0xff]  }
  0x19   : > { %1618 = vmatpush3.bf16.msra.mxu0 %v1736_v1  ;;  %1692 = vmatpush3.bf16.msra.mxu1 %v1736_v1  ;;  %v1751_v16 = vld [vmem:[%s2126_s29 + $0x30] sm:$0xff]   ;;  %v1753_v18 = vld [vmem:[%s2126_s29 + $0x38] sm:$0xff]   ;;  %v1755_v20 = vld [vmem:[%s2126_s29 + $0x40] sm:$0xff]  }
  0x1a   : > { %1619 = vmatprep.subr.bf16.mxu0 %v1737_v2  ;;  %1689 = vmatprep.subr.bf16.mxu1 %v1737_v2  ;;  %v1752_v17 = vld [vmem:[%s2126_s29 + $0xb0] sm:$0xff]   ;;  %v1754_v19 = vld [vmem:[%s2126_s29 + $0xb8] sm:$0xff]   ;;  %v1756_v21 = vld [vmem:[%s2126_s29 + $0xc0] sm:$0xff]  }
  0x1b   : > { %v1757_v22 = vld [vmem:[%s2126_s29 + $0x48] sm:$0xff]   ;;  %v1759_v24 = vld [vmem:[%s2126_s29 + $0x50] sm:$0xff]   ;;  %v1761_v26 = vld [vmem:[%s2126_s29 + $0x58] sm:$0xff]  }
  0x1c   : > { %v1758_v23 = vld [vmem:[%s2126_s29 + $0xc8] sm:$0xff]   ;;  %v1760_v25 = vld [vmem:[%s2126_s29 + $0xd0] sm:$0xff]   ;;  %v1762_v27 = vld [vmem:[%s2126_s29 + $0xd8] sm:$0xff]  }
  0x1d   : > { %1620 = vmatpush3.bf16.msra.mxu0 %v1737_v2  ;;  %1693 = vmatpush3.bf16.msra.mxu1 %v1737_v2  ;;  %v1763_v28 = vld [vmem:[%s2126_s29 + $0x60] sm:$0xff]   ;;  %v1765_v30 = vld [vmem:[%s2126_s29 + $0x68] sm:$0xff]   ;;  %v1767_v32 = vld [vmem:[%s2126_s29 + $0x70] sm:$0xff]  }
  0x1e   : > { %1621 = vmatprep.subr.bf16.mxu0 %v1738_v5  ;;  %1690 = vmatprep.subr.bf16.mxu1 %v1738_v5  ;;  %v1764_v29 = vld [vmem:[%s2126_s29 + $0xe0] sm:$0xff]   ;;  %v1766_v31 = vld [vmem:[%s2126_s29 + $0xe8] sm:$0xff]   ;;  %v1768_v33 = vld [vmem:[%s2126_s29 + $0xf0] sm:$0xff]  }
  0x1f   : > { %v1769_v34 = vld [vmem:[%s2126_s29 + $0x78] sm:$0xff]  }
  0x20   : > { %v1770_v35 = vld [vmem:[%s2126_s29 + $0xf8] sm:$0xff]  }
  0x21   : > { %1622 = vmatpush3.bf16.msra.mxu0 %v1738_v5  ;;  %1694 = vmatpush3.bf16.msra.mxu1 %v1738_v5 }
  0x24   : > { %1624 = vmatmul.mubr.msk.bf16.vlgmr.msra.gmra.mrb[0].mxu0 %vm494_vm0, %v1741_v6  ;;  %1656 = vmatmul.mubr.msk.bf16.vlgmr.msra.gmra.mrb[0].mxu1 %vm494_vm0, %v1742_v7 }
  0x25   : > { %1627 = vmatprep.mubr.msk.bf16.mxu0 %vm494_vm0, %v1743_v8  ;;  %1659 = vmatprep.mubr.msk.bf16.mxu1 %vm494_vm0, %v1744_v9 }
  0x2c   : > { %1628 = vmatmul.mubr.msk.bf16.gmra.mrb[4].mxu0 %vm494_vm0, %v1745_v10  ;;  %1660 = vmatmul.mubr.msk.bf16.gmra.mrb[4].mxu1 %vm494_vm0, %v1746_v11 }
  0x2d   : > { %1631 = vmatprep.mubr.msk.bf16.mxu0 %vm494_vm0, %v1747_v12  ;;  %1663 = vmatprep.mubr.msk.bf16.mxu1 %vm494_vm0, %v1748_v13 }
  0x34   : > { %1632 = vmatmul.mubr.msk.bf16.gmra.mrb[8].mxu0 %vm494_vm0, %v1749_v14  ;;  %1664 = vmatmul.mubr.msk.bf16.gmra.mrb[8].mxu1 %vm494_vm0, %v1750_v15 }
  0x35   : > { %1635 = vmatprep.mubr.msk.bf16.mxu0 %vm494_vm0, %v1751_v16  ;;  %1667 = vmatprep.mubr.msk.bf16.mxu1 %vm494_vm0, %v1752_v17 }
  0x3c   : > { %1636 = vmatmul.mubr.msk.bf16.gmra.mrb[12].mxu0 %vm494_vm0, %v1753_v18  ;;  %1668 = vmatmul.mubr.msk.bf16.gmra.mrb[12].mxu1 %vm494_vm0, %v1754_v19 }
  0x3d   : > { %1639 = vmatprep.mubr.msk.bf16.mxu0 %vm494_vm0, %v1755_v20  ;;  %1671 = vmatprep.mubr.msk.bf16.mxu1 %vm494_vm0, %v1756_v21 }
  0x44   : > { %1640 = vmatmul.mubr.msk.bf16.gmra.mrb[16].mxu0 %vm494_vm0, %v1757_v22  ;;  %1672 = vmatmul.mubr.msk.bf16.gmra.mrb[16].mxu1 %vm494_vm0, %v1758_v23 }
  0x45   : > { %1643 = vmatprep.mubr.msk.bf16.mxu0 %vm494_vm0, %v1759_v24  ;;  %1675 = vmatprep.mubr.msk.bf16.mxu1 %vm494_vm0, %v1760_v25 }
  0x4c   : > { %1644 = vmatmul.mubr.msk.bf16.gmra.mrb[20].mxu0 %vm494_vm0, %v1761_v26  ;;  %1676 = vmatmul.mubr.msk.bf16.gmra.mrb[20].mxu1 %vm494_vm0, %v1762_v27 }
  0x4d   : > { %1647 = vmatprep.mubr.msk.bf16.mxu0 %vm494_vm0, %v1763_v28  ;;  %1679 = vmatprep.mubr.msk.bf16.mxu1 %vm494_vm0, %v1764_v29 }
  0x54   : > { %1648 = vmatmul.mubr.msk.bf16.gmra.mrb[24].mxu0 %vm494_vm0, %v1765_v30  ;;  %1680 = vmatmul.mubr.msk.bf16.gmra.mrb[24].mxu1 %vm494_vm0, %v1766_v31 }
  0x55   : > { %1651 = vmatprep.mubr.msk.bf16.mxu0 %vm494_vm0, %v1767_v32  ;;  %1683 = vmatprep.mubr.msk.bf16.mxu1 %vm494_vm0, %v1768_v33 }
  0x5c   : > { %1652 = vmatmul.mubr.msk.bf16.gmra.mrb[28].mxu0 %vm494_vm0, %v1769_v34  ;;  %1684 = vmatmul.mubr.msk.bf16.gmra.mrb[28].mxu1 %vm494_vm0, %v1770_v35 }
  0xf7   : > { %v1625_v37 = vpop.f32.mrb[0].mxu0  ;;  %v1657_v38 = vpop.f32.mrb[0].mxu1 }
  0xf8   : > { %v634_v39 = vadd.f32 %v1625_v37, %v2195_v36  ;;  %v762_v40 = vadd.f32 %v1657_v38, %v2195_v36  ;;  %v625_v41 = vpop.f32.mrb[1].mxu0  ;;  %v753_v42 = vpop.f32.mrb[1].mxu1 }
  0xf9   : > { %v626_v43 = vadd.f32 %v2195_v36, %v625_v41  ;;  %v754_v44 = vadd.f32 %v2195_v36, %v753_v42  ;;  %v1626_v45 = vpop.f32.mrb[2].mxu0  ;;  %v1658_v46 = vpop.f32.mrb[2].mxu1 }
  0xfa   : > { %v1514_v47 = vmul.f32 -1.442695, %v634_v39  ;;  %v1546_v48 = vmul.f32 -1.442695, %v762_v40  ;;  %v637_v49 = vadd.f32 %v1626_v45, %v2195_v36  ;;  %v765_v50 = vadd.f32 %v1658_v46, %v2195_v36  ;;  %v628_v51 = vpop.f32.mrb[3].mxu0  ;;  %v756_v52 = vpop.f32.mrb[3].mxu1 }
  0xfb   : > { %v1512_v53 = vmul.f32 -1.442695, %v626_v43  ;;  %v1544_v54 = vmul.f32 -1.442695, %v754_v44  ;;  %v629_v55 = vadd.f32 %v2195_v36, %v628_v51  ;;  %v757_v56 = vadd.f32 %v2195_v36, %v756_v52 }
  0xfc   : > { %1771 = vpow2.f32 %v1514_v47  ;;  %v1515_v57 = vmul.f32 -1.442695, %v637_v49  ;;  %v1547_v58 = vmul.f32 -1.442695, %v765_v50 }
  0xfd   : > { %1773 = vpow2.f32 %v1546_v48  ;;  %v1513_v59 = vmul.f32 -1.442695, %v629_v55  ;;  %v1545_v60 = vmul.f32 -1.442695, %v757_v56 }
  0xfe   : > { %1775 = vpow2.f32 %v1512_v53 }
  0xff   : > { %1777 = vpow2.f32 %v1544_v54  ;;  %v1629_v61 = vpop.f32.mrb[4].mxu0  ;;  %v1661_v62 = vpop.f32.mrb[4].mxu1 }
 0x100   : > { %1779 = vpow2.f32 %v1515_v57  ;;  %v650_v63 = vadd.f32 %v1629_v61, %v2195_v36  ;;  %v778_v0 = vadd.f32 %v1661_v62, %v2195_v36  ;;  %v641_v1 = vpop.f32.mrb[5].mxu0  ;;  %v769_v2 = vpop.f32.mrb[5].mxu1 }
 0x101   : > { %1781 = vpow2.f32 %v1547_v58  ;;  %v642_v3 = vadd.f32 %v2195_v36, %v641_v1  ;;  %v770_v4 = vadd.f32 %v2195_v36, %v769_v2  ;;  %v1630_v5 = vpop.f32.mrb[6].mxu0  ;;  %v1662_v6 = vpop.f32.mrb[6].mxu1 }
 0x102   : > { %1783 = vpow2.f32 %v1513_v59  ;;  %v1518_v7 = vmul.f32 -1.442695, %v650_v63  ;;  %v1550_v8 = vmul.f32 -1.442695, %v778_v0  ;;  %v653_v9 = vadd.f32 %v1630_v5, %v2195_v36  ;;  %v644_v10 = vpop.f32.mrb[7].mxu0  ;;  %v772_v11 = vpop.f32.mrb[7].mxu1 }
 0x103   : > { %1785 = vpow2.f32 %v1545_v60  ;;  %v1516_v12 = vmul.f32 -1.442695, %v642_v3  ;;  %v1548_v13 = vmul.f32 -1.442695, %v770_v4  ;;  %v781_v41 = vadd.f32 %v1662_v6, %v2195_v36 }
 0x104   : > { %1787 = vpow2.f32 %v1518_v7  ;;  %v1519_v14 = vmul.f32 -1.442695, %v653_v9  ;;  %v645_v44 = vadd.f32 %v2195_v36, %v644_v10  ;;  %v773_v48 = vadd.f32 %v2195_v36, %v772_v11 }
 0x105   : > { %1789 = vpow2.f32 %v1550_v8  ;;  %v1551_v58 = vmul.f32 -1.442695, %v781_v41 }
 0x106   : > { %v1772_v15 = vpop.eup %1771  ;;  %1791 = vpow2.f32 %v1516_v12  ;;  %v1517_v0 = vmul.f32 -1.442695, %v645_v44  ;;  %v1549_v4 = vmul.f32 -1.442695, %v773_v48 }
 0x107   : > { %v1774_v16 = vpop.eup %1773  ;;  %v1074_v17 = vadd.f32 1.0, %v1772_v15  ;;  %1793 = vpow2.f32 %v1548_v13  ;;  %v1633_v18 = vpop.f32.mrb[8].mxu0 }
 0x108   : > { %v1665_v19 = vpop.f32.mrb[8].mxu1  ;;  %v1776_v20 = vpop.eup %1775  ;;  %v1106_v21 = vadd.f32 1.0, %v1774_v16  ;;  %1795 = vpow2.f32 %v1519_v14  ;;  %v666_v53 = vadd.f32 %v1633_v18, %v2195_v36 }
 0x109   : > { %v657_v22 = vpop.f32.mrb[9].mxu0  ;;  %v785_v23 = vpop.f32.mrb[9].mxu1  ;;  %1797 = vrcp.f32 %v1074_v17  ;;  %v1072_v25 = vadd.f32 1.0, %v1776_v20  ;;  %v794_v59 = vadd.f32 %v1665_v19, %v2195_v36 }
 0x10a   : > { %v1778_v24 = vpop.eup %1777  ;;  %v1634_v26 = vpop.f32.mrb[10].mxu0  ;;  %1799 = vrcp.f32 %v1106_v21  ;;  %v658_v1 = vadd.f32 %v2195_v36, %v657_v22  ;;  %v786_v5 = vadd.f32 %v2195_v36, %v785_v23  ;;  %v1522_v7 = vmul.f32 -1.442695, %v666_v53 }
 0x10b   : > { %v2210_v27 = vpop.f32.mrb[10].mxu1  ;;  %v1780_v28 = vpop.eup %1779  ;;  %v1104_v29 = vadd.f32 1.0, %v1778_v24  ;;  %1801 = vrcp.f32 %v1072_v25  ;;  %v669_v8 = vadd.f32 %v1634_v26, %v2195_v36  ;;  %v1554_v10 = vmul.f32 -1.442695, %v794_v59 }
 0x10c   : > { %v2212_v30 = vpop.f32.mrb[11].mxu0  ;;  %v1782_v31 = vpop.eup %1781  ;;  %v1075_v32 = vadd.f32 1.0, %v1780_v28  ;;  %v797_v11 = vadd.f32 %v2210_v27, %v2195_v36  ;;  %v1520_v13 = vmul.f32 -1.442695, %v658_v1  ;;  %v1552_v18 = vmul.f32 -1.442695, %v786_v5 }
 0x10d   : > { %v2214_v33 = vpop.f32.mrb[11].mxu1  ;;  %v1784_v34 = vpop.eup %1783  ;;  %1803 = vrcp.f32 %v1104_v29  ;;  %v1107_v35 = vadd.f32 1.0, %v1782_v31  ;;  %v661_v14 = vadd.f32 %v2195_v36, %v2212_v30  ;;  %v1523_v23 = vmul.f32 -1.442695, %v669_v8 }
 0x10e   : > { %v1786_v37 = vpop.eup %1785  ;;  %1805 = vrcp.f32 %v1075_v32  ;;  %v1073_v38 = vadd.f32 1.0, %v1784_v34  ;;  %v789_v19 = vadd.f32 %v2195_v36, %v2214_v33  ;;  %v1555_v28 = vmul.f32 -1.442695, %v797_v11 }
 0x10f   : > { %v1788_v39 = vpop.eup %1787  ;;  %1807 = vrcp.f32 %v1107_v35  ;;  %v1105_v40 = vadd.f32 1.0, %v1786_v37  ;;  %v1637_v45 = vpop.f32.mrb[12].mxu0  ;;  %v1521_v33 = vmul.f32 -1.442695, %v661_v14 }
 0x110   : > { %v1790_v42 = vpop.eup %1789  ;;  %1809 = vrcp.f32 %v1073_v38  ;;  %v1078_v43 = vadd.f32 1.0, %v1788_v39  ;;  %v1669_v49 = vpop.f32.mrb[12].mxu1  ;;  %v682_v24 = vadd.f32 %v1637_v45, %v2195_v36  ;;  %v1553_v35 = vmul.f32 -1.442695, %v789_v19 }
 0x111   : > { %v1792_v46 = vpop.eup %1791  ;;  %1811 = vrcp.f32 %v1105_v40  ;;  %v1110_v47 = vadd.f32 1.0, %v1790_v42  ;;  %v2220_v50 = vpop.f32.mrb[13].mxu0  ;;  %v810_v29 = vadd.f32 %v1669_v49, %v2195_v36 }
 0x112   : > { %v1794_v51 = vpop.eup %1793  ;;  %1813 = vrcp.f32 %v1078_v43  ;;  %v1076_v52 = vadd.f32 1.0, %v1792_v46  ;;  %v2228_v54 = vpop.f32.mrb[13].mxu1  ;;  %v1526_v40 = vmul.f32 -1.442695, %v682_v24 }
 0x113   : > { %v2230_v55 = vpop.f32.mrb[14].mxu0  ;;  %v1796_v56 = vpop.eup %1795  ;;  %1815 = vrcp.f32 %v1110_v47  ;;  %v1108_v57 = vadd.f32 1.0, %v1794_v51  ;;  %v1558_v42 = vmul.f32 -1.442695, %v810_v29  ;;  %v802_v5 = vadd.f32 %v2195_v36, %v2228_v54 }
 0x114   : > { %v2233_v60 = vpop.f32.mrb[14].mxu1  ;;  %v2235_v61 = vpop.f32.mrb[15].mxu0  ;;  %1817 = vrcp.f32 %v1076_v52  ;;  %v1079_v63 = vadd.f32 1.0, %v1796_v56 }
 0x115   : > { %v1798_v62 = vpop.eup %1797  ;;  %v2238_v2 = vpop.f32.mrb[15].mxu1  ;;  %1819 = vrcp.f32 %v1108_v57 }
 0x116   : > { %v1800_v3 = vpop.eup %1799  ;;  %1266 = vst [vmem:[%s2225_s8 + $0x10] sm:$0xff] %v1798_v62  ;;  %1821 = vrcp.f32 %v1079_v63 }
 0x117   : > { %v1802_v6 = vpop.eup %1801  ;;  %1298 = vst [vmem:[%s2225_s8 + $0x110] sm:$0xff] %v1800_v3  ;;  %1823 = vpow2.f32 %v1551_v58  ;;  %v2250_v15 = vpop.f32.mrb[16].mxu0 }
 0x118   : > { %v1804_v9 = vpop.eup %1803  ;;  %1264 = vst [vmem:[%s2225_s8] sm:$0xff] %v1802_v6  ;;  %1825 = vpow2.f32 %v1517_v0  ;;  %v2252_v16 = vpop.f32.mrb[16].mxu1 }
 0x119   : > { %v1806_v12 = vpop.eup %1805  ;;  %1296 = vst [vmem:[%s2225_s8 + $0x100] sm:$0xff] %v1804_v9  ;;  %1827 = vpow2.f32 %v1549_v4  ;;  %v2257_v20 = vpop.f32.mrb[17].mxu0  ;;  %v674_v4 = vadd.f32 %v2195_v36, %v2220_v50 }
 0x11a   : > { %v1808_v17 = vpop.eup %1807  ;;  %1267 = vst [vmem:[%s2225_s8 + $0x18] sm:$0xff] %v1806_v12  ;;  %v2259_v21 = vpop.f32.mrb[17].mxu1  ;;  %1829 = vpow2.f32 %v1522_v7 }
 0x11b   : > { %v1810_v22 = vpop.eup %1809  ;;  %1299 = vst [vmem:[%s2225_s8 + $0x118] sm:$0xff] %v1808_v17  ;;  %v2263_v25 = vpop.f32.mrb[18].mxu0  ;;  %1831 = vpow2.f32 %v1554_v10  ;;  %v1524_v19 = vmul.f32 -1.442695, %v674_v4  ;;  %v698_v4 = vadd.f32 %v2250_v15, %v2195_v36  ;;  %v690_v15 = vadd.f32 %v2195_v36, %v2257_v20 }
 0x11c   : > { %v2265_v26 = vpop.f32.mrb[18].mxu1  ;;  %v1812_v27 = vpop.eup %1811  ;;  %1265 = vst [vmem:[%s2225_s8 + $0x8] sm:$0xff] %v1810_v22  ;;  %1833 = vpow2.f32 %v1520_v13  ;;  %v1556_v22 = vmul.f32 -1.442695, %v802_v5 }
 0x11d   : > { %v692_v30 = vpop.f32.mrb[19].mxu0  ;;  %v820_v31 = vpop.f32.mrb[19].mxu1  ;;  %1297 = vst [vmem:[%s2225_s8 + $0x108] sm:$0xff] %v1812_v27  ;;  %1835 = vpow2.f32 %v1552_v18 }
 0x11e   : > { %v1814_v32 = vpop.eup %1813  ;;  %v2272_v37 = vadd.f32 %v2195_v36, %v692_v30  ;;  %v2275_v38 = vadd.f32 %v2195_v36, %v820_v31  ;;  %1837 = vpow2.f32 %v1523_v23 }
 0x11f   : > { %v1816_v34 = vpop.eup %1815  ;;  %1270 = vst [vmem:[%s2225_s8 + $0x30] sm:$0xff] %v1814_v32  ;;  %1839 = vpow2.f32 %v1555_v28  ;;  %v1645_v44 = vpop.f32.mrb[20].mxu0  ;;  %v685_v28 = vadd.f32 %v2230_v55, %v2195_v36  ;;  %v813_v55 = vadd.f32 %v2233_v60, %v2195_v36 }
 0x120   : > { %v1818_v39 = vpop.eup %1817  ;;  %1302 = vst [vmem:[%s2225_s8 + $0x130] sm:$0xff] %v1816_v34  ;;  %1841 = vpow2.f32 %v1521_v33  ;;  %v1677_v45 = vpop.f32.mrb[20].mxu1  ;;  %v2282_v47 = vadd.f32 %v1645_v44, %v2195_v36 }
 0x121   : > { %v1820_v41 = vpop.eup %1819  ;;  %1268 = vst [vmem:[%s2225_s8 + $0x20] sm:$0xff] %v1818_v39  ;;  %1843 = vpow2.f32 %v1553_v35  ;;  %v2285_v48 = vadd.f32 %v1677_v45, %v2195_v36  ;;  %v705_v49 = vpop.f32.mrb[21].mxu0 }
 0x122   : > { %v1822_v43 = vpop.eup %1821  ;;  %1300 = vst [vmem:[%s2225_s8 + $0x120] sm:$0xff] %v1820_v41  ;;  %v833_v51 = vpop.f32.mrb[21].mxu1  ;;  %1845 = vpow2.f32 %v1526_v40  ;;  %v2288_v56 = vadd.f32 %v2195_v36, %v705_v49 }
 0x123   : > { %v1824_v46 = vpop.eup %1823  ;;  %1271 = vst [vmem:[%s2225_s8 + $0x38] sm:$0xff] %v1822_v43  ;;  %v2291_v57 = vadd.f32 %v2195_v36, %v833_v51  ;;  %v1646_v58 = vpop.f32.mrb[22].mxu0  ;;  %1847 = vpow2.f32 %v1558_v42  ;;  %v677_v51 = vadd.f32 %v2195_v36, %v2235_v61 }
 0x124   : > { %v1826_v52 = vpop.eup %1825  ;;  %v1111_v53 = vadd.f32 1.0, %v1824_v46  ;;  %v1678_v59 = vpop.f32.mrb[22].mxu1  ;;  %v2298_v9 = vadd.f32 %v1646_v58, %v2195_v36 }
 0x125   : > { %v1828_v62 = vpop.eup %1827  ;;  %v1077_v63 = vadd.f32 1.0, %v1826_v52  ;;  %v708_v0 = vpop.f32.mrb[23].mxu0  ;;  %v2301_v10 = vadd.f32 %v1678_v59, %v2195_v36  ;;  %v805_v52 = vadd.f32 %v2195_v36, %v2238_v2  ;;  %v1527_v59 = vmul.f32 -1.442695, %v685_v28 }
 0x126   : > { %v1830_v1 = vpop.eup %1829  ;;  %1849 = vrcp.f32 %v1111_v53  ;;  %v1109_v3 = vadd.f32 1.0, %v1828_v62  ;;  %v836_v6 = vpop.f32.mrb[23].mxu1  ;;  %v2304_v13 = vadd.f32 %v2195_v36, %v708_v0 }
 0x127   : > { %v1832_v7 = vpop.eup %1831  ;;  %1851 = vrcp.f32 %v1077_v63  ;;  %v1082_v8 = vadd.f32 1.0, %v1830_v1  ;;  %v2307_v50 = vadd.f32 %v2195_v36, %v836_v6  ;;  %v1649_v23 = vpop.f32.mrb[24].mxu0 }
 0x128   : > { %v1834_v11 = vpop.eup %1833  ;;  %1853 = vrcp.f32 %v1109_v3  ;;  %v1114_v12 = vadd.f32 1.0, %v1832_v7  ;;  %v2312_v29 = vadd.f32 %v1649_v23, %v2195_v36  ;;  %v1681_v30 = vpop.f32.mrb[24].mxu1  ;;  %v1559_v3 = vmul.f32 -1.442695, %v813_v55 }
 0x129   : > { %v1836_v54 = vpop.eup %1835  ;;  %1855 = vrcp.f32 %v1082_v8  ;;  %v1080_v14 = vadd.f32 1.0, %v1834_v11  ;;  %v721_v31 = vpop.f32.mrb[25].mxu0  ;;  %v2315_v34 = vadd.f32 %v1681_v30, %v2195_v36  ;;  %v1525_v7 = vmul.f32 -1.442695, %v677_v51 }
 0x12a   : > { %v1838_v17 = vpop.eup %1837  ;;  %1857 = vrcp.f32 %v1114_v12  ;;  %v1112_v18 = vadd.f32 1.0, %v1836_v54  ;;  %v2318_v35 = vadd.f32 %v2195_v36, %v721_v31  ;;  %v849_v39 = vpop.f32.mrb[25].mxu1  ;;  %v1557_v8 = vmul.f32 -1.442695, %v805_v52 }
 0x12b   : > { %v1840_v24 = vpop.eup %1839  ;;  %1859 = vrcp.f32 %v1080_v14  ;;  %v1083_v27 = vadd.f32 1.0, %v1838_v17  ;;  %v1650_v40 = vpop.f32.mrb[26].mxu0  ;;  %v2323_v43 = vadd.f32 %v2195_v36, %v849_v39  ;;  %v826_v11 = vadd.f32 %v2252_v16, %v2195_v36 }
 0x12c   : > { %v1842_v32 = vpop.eup %1841  ;;  %1861 = vrcp.f32 %v1112_v18  ;;  %v1115_v33 = vadd.f32 1.0, %v1840_v24  ;;  %v1682_v44 = vpop.f32.mrb[26].mxu1  ;;  %v2330_v62 = vadd.f32 %v1650_v40, %v2195_v36  ;;  %v818_v16 = vadd.f32 %v2195_v36, %v2259_v21 }
 0x12d   : > { %v1844_v41 = vpop.eup %1843  ;;  %1863 = vrcp.f32 %v1083_v27  ;;  %v1081_v42 = vadd.f32 1.0, %v1842_v32  ;;  %v724_v45 = vpop.f32.mrb[27].mxu0  ;;  %v2333_v1 = vadd.f32 %v1682_v44, %v2195_v36  ;;  %v1530_v32 = vmul.f32 -1.442695, %v698_v4 }
 0x12e   : > { %v1846_v46 = vpop.eup %1845  ;;  %1865 = vrcp.f32 %v1115_v33  ;;  %v1113_v49 = vadd.f32 1.0, %v1844_v41  ;;  %v852_v53 = vpop.f32.mrb[27].mxu1  ;;  %v2336_v61 = vadd.f32 %v2195_v36, %v724_v45  ;;  %v701_v33 = vadd.f32 %v2263_v25, %v2195_v36 }
 0x12f   : > { %v1848_v58 = vpop.eup %1847  ;;  %1867 = vrcp.f32 %v1081_v42  ;;  %v1086_v60 = vadd.f32 1.0, %v1846_v46  ;;  %v2342_v5 = vadd.f32 %v2195_v36, %v852_v53  ;;  %v1653_v12 = vpop.f32.mrb[28].mxu0  ;;  %v1562_v41 = vmul.f32 -1.442695, %v826_v11 }
 0x130   : > { %v1850_v63 = vpop.eup %1849  ;;  %1869 = vrcp.f32 %v1113_v49  ;;  %v1118_v0 = vadd.f32 1.0, %v1848_v58  ;;  %v1685_v54 = vpop.f32.mrb[28].mxu1  ;;  %v2351_v17 = vadd.f32 %v1653_v12, %v2195_v36  ;;  %v829_v42 = vadd.f32 %v2265_v26, %v2195_v36 }
 0x131   : > { %v1852_v2 = vpop.eup %1851  ;;  %1303 = vst [vmem:[%s2225_s8 + $0x138] sm:$0xff] %v1850_v63  ;;  %1871 = vrcp.f32 %v1086_v60  ;;  %v2354_v18 = vadd.f32 %v1685_v54, %v2195_v36  ;;  %v737_v23 = vpop.f32.mrb[29].mxu0  ;;  %v1528_v25 = vmul.f32 -1.442695, %v690_v15  ;;  %v1560_v26 = vmul.f32 -1.442695, %v818_v16 }
 0x132   : > { %v1854_v6 = vpop.eup %1853  ;;  %1269 = vst [vmem:[%s2225_s8 + $0x28] sm:$0xff] %v1852_v2  ;;  %1873 = vrcp.f32 %v1118_v0  ;;  %v865_v24 = vpop.f32.mrb[29].mxu1  ;;  %v1531_v52 = vmul.f32 -1.442695, %v701_v33  ;;  %v1563_v58 = vmul.f32 -1.442695, %v829_v42 }
 0x133   : > { %v1856_v14 = vpop.eup %1855  ;;  %1301 = vst [vmem:[%s2225_s8 + $0x128] sm:$0xff] %v1854_v6  ;;  %1875 = vpow2.f32 %v1524_v19  ;;  %v2360_v19 = vadd.f32 %v2195_v36, %v737_v23  ;;  %v2363_v20 = vadd.f32 %v2195_v36, %v865_v24  ;;  %v1654_v28 = vpop.f32.mrb[30].mxu0 }
 0x134   : > { %v1858_v27 = vpop.eup %1857  ;;  %1274 = vst [vmem:[%s2225_s8 + $0x50] sm:$0xff] %v1856_v14  ;;  %1877 = vpow2.f32 %v1556_v22  ;;  %v1686_v30 = vpop.f32.mrb[30].mxu1  ;;  %v2369_v22 = vadd.f32 %v1654_v28, %v2195_v36 }
 0x135   : > { %v1860_v31 = vpop.eup %1859  ;;  %1306 = vst [vmem:[%s2225_s8 + $0x150] sm:$0xff] %v1858_v27  ;;  %1879 = vpow2.f32 %v1527_v59  ;;  %v740_v21 = vpop.f32.mrb[31].mxu0  ;;  %v2375_v55 = vadd.f32 %v1686_v30, %v2195_v36 }
 0x136   : > { %v868_v39 = vpop.f32.mrb[31].mxu1  ;;  %v1862_v40 = vpop.eup %1861  ;;  %1272 = vst [vmem:[%s2225_s8 + $0x40] sm:$0xff] %v1860_v31  ;;  %1881 = vpow2.f32 %v1559_v3  ;;  %v2379_v45 = vadd.f32 %v2195_v36, %v740_v21 }
 0x137   : > { %v1864_v44 = vpop.eup %1863  ;;  %1304 = vst [vmem:[%s2225_s8 + $0x140] sm:$0xff] %v1862_v40  ;;  %1883 = vpow2.f32 %v1525_v7  ;;  %v2382_v46 = vadd.f32 %v2195_v36, %v868_v39  ;;  %v1529_v36 = vmul.f32 -1.442695, %v2272_v37  ;;  %v1561_v40 = vmul.f32 -1.442695, %v2275_v38 }
 0x138   : > { %v1866_v49 = vpop.eup %1865  ;;  %1275 = vst [vmem:[%s2225_s8 + $0x58] sm:$0xff] %v1864_v44  ;;  %1885 = vpow2.f32 %v1557_v8  ;;  %v1534_v44 = vmul.f32 -1.442695, %v2282_v47  ;;  %v1564_v38 = vmul.f32 -1.442695, %v2291_v57 }
 0x139   : > { %v1868_v51 = vpop.eup %1867  ;;  %1307 = vst [vmem:[%s2225_s8 + $0x158] sm:$0xff] %v1866_v49  ;;  %1887 = vpow2.f32 %v1530_v32  ;;  %v1566_v49 = vmul.f32 -1.442695, %v2285_v48  ;;  %v1535_v47 = vmul.f32 -1.442695, %v2298_v9 }
 0x13a   : > { %v1870_v53 = vpop.eup %1869  ;;  %1273 = vst [vmem:[%s2225_s8 + $0x48] sm:$0xff] %v1868_v51  ;;  %1889 = vpow2.f32 %v1562_v41  ;;  %v1532_v51 = vmul.f32 -1.442695, %v2288_v56  ;;  %v1567_v48 = vmul.f32 -1.442695, %v2301_v10 }
 0x13b   : > { %v1872_v60 = vpop.eup %1871  ;;  %1305 = vst [vmem:[%s2225_s8 + $0x148] sm:$0xff] %v1870_v53  ;;  %1891 = vpow2.f32 %v1528_v25  ;;  %v1533_v56 = vmul.f32 -1.442695, %v2304_v13  ;;  %v1565_v57 = vmul.f32 -1.442695, %v2307_v50 }
 0x13c   : > { %v1874_v59 = vpop.eup %1873  ;;  %1278 = vst [vmem:[%s2225_s8 + $0x70] sm:$0xff] %v1872_v60  ;;  %1893 = vpow2.f32 %v1560_v26  ;;  %v1538_v9 = vmul.f32 -1.442695, %v2312_v29  ;;  %v1570_v10 = vmul.f32 -1.442695, %v2315_v34 }
 0x13d   : > { %v1876_v63 = vpop.eup %1875  ;;  %1310 = vst [vmem:[%s2225_s8 + $0x170] sm:$0xff] %v1874_v59  ;;  %1895 = vpow2.f32 %v1531_v52  ;;  %v1536_v13 = vmul.f32 -1.442695, %v2318_v35  ;;  %v1568_v50 = vmul.f32 -1.442695, %v2323_v43 }
 0x13e   : > { %v1878_v0 = vpop.eup %1877  ;;  %v1084_v2 = vadd.f32 1.0, %v1876_v63  ;;  %1897 = vpow2.f32 %v1563_v58 }
 0x13f   : > { %v1880_v3 = vpop.eup %1879  ;;  %v1116_v4 = vadd.f32 1.0, %v1878_v0  ;;  %1899 = vpow2.f32 %v1529_v36 }
 0x140   : > { %v1882_v6 = vpop.eup %1881  ;;  %1901 = vrcp.f32 %v1084_v2  ;;  %v1087_v7 = vadd.f32 1.0, %v1880_v3 }
 0x141   : > { %v1884_v8 = vpop.eup %1883  ;;  %1903 = vrcp.f32 %v1116_v4  ;;  %v1119_v11 = vadd.f32 1.0, %v1882_v6 }
 0x142   : > { %v1886_v12 = vpop.eup %1885  ;;  %1905 = vrcp.f32 %v1087_v7  ;;  %v1085_v37 = vadd.f32 1.0, %v1884_v8 }
 0x143   : > { %v1888_v54 = vpop.eup %1887  ;;  %1907 = vrcp.f32 %v1119_v11  ;;  %v1117_v14 = vadd.f32 1.0, %v1886_v12 }
 0x144   : > { %v1890_v15 = vpop.eup %1889  ;;  %1909 = vrcp.f32 %v1085_v37  ;;  %v1090_v23 = vadd.f32 1.0, %v1888_v54 }
 0x145   : > { %v1892_v24 = vpop.eup %1891  ;;  %1911 = vrcp.f32 %v1117_v14  ;;  %v1122_v27 = vadd.f32 1.0, %v1890_v15 }
 0x146   : > { %v1894_v16 = vpop.eup %1893  ;;  %1913 = vrcp.f32 %v1090_v23  ;;  %v1088_v28 = vadd.f32 1.0, %v1892_v24 }
 0x147   : > { %v1896_v30 = vpop.eup %1895  ;;  %1915 = vrcp.f32 %v1122_v27  ;;  %v1120_v31 = vadd.f32 1.0, %v1894_v16 }
 0x148   : > { %v1898_v32 = vpop.eup %1897  ;;  %1917 = vrcp.f32 %v1088_v28  ;;  %v1091_v33 = vadd.f32 1.0, %v1896_v30 }
 0x149   : > { %v1900_v21 = vpop.eup %1899  ;;  %1919 = vrcp.f32 %v1120_v31  ;;  %v1123_v39 = vadd.f32 1.0, %v1898_v32 }
 0x14a   : > { %v1902_v41 = vpop.eup %1901  ;;  %1921 = vrcp.f32 %v1091_v33  ;;  %v1089_v42 = vadd.f32 1.0, %v1900_v21 }
 0x14b   : > { %v1904_v25 = vpop.eup %1903  ;;  %1276 = vst [vmem:[%s2225_s8 + $0x60] sm:$0xff] %v1902_v41  ;;  %1923 = vrcp.f32 %v1123_v39 }
 0x14c   : > { %v1906_v26 = vpop.eup %1905  ;;  %1308 = vst [vmem:[%s2225_s8 + $0x160] sm:$0xff] %v1904_v25  ;;  %1925 = vrcp.f32 %v1089_v42 }
 0x14d   : > { %v1908_v52 = vpop.eup %1907  ;;  %1279 = vst [vmem:[%s2225_s8 + $0x78] sm:$0xff] %v1906_v26  ;;  %1927 = vpow2.f32 %v1561_v40  ;;  %v1539_v40 = vmul.f32 -1.442695, %v2330_v62  ;;  %v1542_v62 = vmul.f32 -1.442695, %v2351_v17 }
 0x14e   : > { %v1910_v53 = vpop.eup %1909  ;;  %1311 = vst [vmem:[%s2225_s8 + $0x178] sm:$0xff] %v1908_v52  ;;  %1929 = vpow2.f32 %v1534_v44  ;;  %v1571_v44 = vmul.f32 -1.442695, %v2333_v1  ;;  %v1574_v1 = vmul.f32 -1.442695, %v2354_v18 }
 0x14f   : > { %v1912_v58 = vpop.eup %1911  ;;  %1277 = vst [vmem:[%s2225_s8 + $0x68] sm:$0xff] %v1910_v53  ;;  %1931 = vpow2.f32 %v1566_v49  ;;  %v1537_v49 = vmul.f32 -1.442695, %v2336_v61  ;;  %v1540_v61 = vmul.f32 -1.442695, %v2360_v19 }
 0x150   : > { %v1914_v60 = vpop.eup %1913  ;;  %1309 = vst [vmem:[%s2225_s8 + $0x168] sm:$0xff] %v1912_v58  ;;  %1933 = vpow2.f32 %v1532_v51  ;;  %v1569_v51 = vmul.f32 -1.442695, %v2342_v5  ;;  %v1572_v5 = vmul.f32 -1.442695, %v2363_v20 }
 0x151   : > { %v1916_v36 = vpop.eup %1915  ;;  %1282 = vst [vmem:[%s2225_s8 + $0x90] sm:$0xff] %v1914_v60  ;;  %1935 = vpow2.f32 %v1564_v38  ;;  %v1543_v17 = vmul.f32 -1.442695, %v2369_v22  ;;  %v1575_v18 = vmul.f32 -1.442695, %v2375_v55 }
 0x152   : > { %v1918_v59 = vpop.eup %1917  ;;  %1314 = vst [vmem:[%s2225_s8 + $0x190] sm:$0xff] %v1916_v36  ;;  %1937 = vpow2.f32 %v1535_v47  ;;  %v1541_v60 = vmul.f32 -1.442695, %v2379_v45  ;;  %v1573_v20 = vmul.f32 -1.442695, %v2382_v46 }
 0x153   : > { %v1920_v63 = vpop.eup %1919  ;;  %1280 = vst [vmem:[%s2225_s8 + $0x80] sm:$0xff] %v1918_v59  ;;  %1939 = vpow2.f32 %v1567_v48 }
 0x154   : > { %v1922_v0 = vpop.eup %1921  ;;  %1312 = vst [vmem:[%s2225_s8 + $0x180] sm:$0xff] %v1920_v63  ;;  %1941 = vpow2.f32 %v1533_v56 }
 0x155   : > { %v1924_v2 = vpop.eup %1923  ;;  %1283 = vst [vmem:[%s2225_s8 + $0x98] sm:$0xff] %v1922_v0  ;;  %1943 = vpow2.f32 %v1565_v57 }
 0x156   : > { %v1926_v3 = vpop.eup %1925  ;;  %1315 = vst [vmem:[%s2225_s8 + $0x198] sm:$0xff] %v1924_v2  ;;  %1945 = vpow2.f32 %v1538_v9 }
 0x157   : > { %v1928_v29 = vpop.eup %1927  ;;  %1281 = vst [vmem:[%s2225_s8 + $0x88] sm:$0xff] %v1926_v3  ;;  %1947 = vpow2.f32 %v1570_v10 }
 0x158   : > { %v1930_v4 = vpop.eup %1929  ;;  %v1121_v6 = vadd.f32 1.0, %v1928_v29  ;;  %1949 = vpow2.f32 %v1536_v13 }
 0x159   : > { %v1932_v34 = vpop.eup %1931  ;;  %v1094_v7 = vadd.f32 1.0, %v1930_v4  ;;  %1951 = vpow2.f32 %v1568_v50 }
 0x15a   : > { %v1934_v8 = vpop.eup %1933  ;;  %1953 = vrcp.f32 %v1121_v6  ;;  %v1126_v35 = vadd.f32 1.0, %v1932_v34 }
 0x15b   : > { %v1936_v11 = vpop.eup %1935  ;;  %1955 = vrcp.f32 %v1094_v7  ;;  %v1092_v12 = vadd.f32 1.0, %v1934_v8 }
 0x15c   : > { %v1938_v37 = vpop.eup %1937  ;;  %1957 = vrcp.f32 %v1126_v35  ;;  %v1124_v43 = vadd.f32 1.0, %v1936_v11 }
 0x15d   : > { %v1940_v54 = vpop.eup %1939  ;;  %1959 = vrcp.f32 %v1092_v12  ;;  %v1095_v14 = vadd.f32 1.0, %v1938_v37 }
 0x15e   : > { %v1942_v15 = vpop.eup %1941  ;;  %1961 = vrcp.f32 %v1124_v43  ;;  %v1127_v23 = vadd.f32 1.0, %v1940_v54 }
 0x15f   : > { %v1944_v24 = vpop.eup %1943  ;;  %1963 = vrcp.f32 %v1095_v14  ;;  %v1093_v27 = vadd.f32 1.0, %v1942_v15 }
 0x160   : > { %v1946_v16 = vpop.eup %1945  ;;  %1965 = vrcp.f32 %v1127_v23  ;;  %v1125_v28 = vadd.f32 1.0, %v1944_v24 }
 0x161   : > { %v1948_v30 = vpop.eup %1947  ;;  %1967 = vrcp.f32 %v1093_v27  ;;  %v1098_v31 = vadd.f32 1.0, %v1946_v16 }
 0x162   : > { %v1950_v32 = vpop.eup %1949  ;;  %1969 = vrcp.f32 %v1125_v28  ;;  %v1130_v33 = vadd.f32 1.0, %v1948_v30 }
 0x163   : > { %v1952_v21 = vpop.eup %1951  ;;  %1971 = vrcp.f32 %v1098_v31  ;;  %v1096_v39 = vadd.f32 1.0, %v1950_v32 }
 0x164   : > { %v1954_v41 = vpop.eup %1953  ;;  %1973 = vrcp.f32 %v1130_v33  ;;  %v1128_v42 = vadd.f32 1.0, %v1952_v21 }
 0x165   : > { %v1956_v25 = vpop.eup %1955  ;;  %1313 = vst [vmem:[%s2225_s8 + $0x188] sm:$0xff] %v1954_v41  ;;  %1975 = vrcp.f32 %v1096_v39 }
 0x166   : > { %v1958_v26 = vpop.eup %1957  ;;  %1286 = vst [vmem:[%s2225_s8 + $0xb0] sm:$0xff] %v1956_v25  ;;  %1977 = vrcp.f32 %v1128_v42 }
 0x167   : > { %v1960_v52 = vpop.eup %1959  ;;  %1318 = vst [vmem:[%s2225_s8 + $0x1b0] sm:$0xff] %v1958_v26  ;;  %1979 = vpow2.f32 %v1539_v40 }
 0x168   : > { %v1962_v38 = vpop.eup %1961  ;;  %1284 = vst [vmem:[%s2225_s8 + $0xa0] sm:$0xff] %v1960_v52  ;;  %1981 = vpow2.f32 %v1571_v44 }
 0x169   : > { %v1964_v53 = vpop.eup %1963  ;;  %1316 = vst [vmem:[%s2225_s8 + $0x1a0] sm:$0xff] %v1962_v38  ;;  %1983 = vpow2.f32 %v1537_v49 }
 0x16a   : > { %v1966_v47 = vpop.eup %1965  ;;  %1287 = vst [vmem:[%s2225_s8 + $0xb8] sm:$0xff] %v1964_v53  ;;  %1985 = vpow2.f32 %v1569_v51 }
 0x16b   : > { %v1968_v58 = vpop.eup %1967  ;;  %1319 = vst [vmem:[%s2225_s8 + $0x1b8] sm:$0xff] %v1966_v47  ;;  %1987 = vpow2.f32 %v1542_v62 }
 0x16c   : > { %v1970_v48 = vpop.eup %1969  ;;  %1285 = vst [vmem:[%s2225_s8 + $0xa8] sm:$0xff] %v1968_v58  ;;  %1989 = vpow2.f32 %v1574_v1 }
 0x16d   : > { %v1972_v19 = vpop.eup %1971  ;;  %1317 = vst [vmem:[%s2225_s8 + $0x1a8] sm:$0xff] %v1970_v48  ;;  %1991 = vpow2.f32 %v1540_v61 }
 0x16e   : > { %v1974_v56 = vpop.eup %1973  ;;  %1290 = vst [vmem:[%s2225_s8 + $0xd0] sm:$0xff] %v1972_v19  ;;  %1993 = vpow2.f32 %v1572_v5 }
 0x16f   : > { %v1976_v36 = vpop.eup %1975  ;;  %1322 = vst [vmem:[%s2225_s8 + $0x1d0] sm:$0xff] %v1974_v56  ;;  %1995 = vpow2.f32 %v1543_v17 }
 0x170   : > { %v1978_v22 = vpop.eup %1977  ;;  %1288 = vst [vmem:[%s2225_s8 + $0xc0] sm:$0xff] %v1976_v36  ;;  %1997 = vpow2.f32 %v1575_v18 }
 0x171   : > { %v1980_v57 = vpop.eup %1979  ;;  %1320 = vst [vmem:[%s2225_s8 + $0x1c0] sm:$0xff] %v1978_v22  ;;  %1999 = vpow2.f32 %v1541_v60 }
 0x172   : > { %v1982_v55 = vpop.eup %1981  ;;  %v1099_v59 = vadd.f32 1.0, %v1980_v57  ;;  %2001 = vpow2.f32 %v1573_v20 }
 0x173   : > { %v1984_v9 = vpop.eup %1983  ;;  %v1131_v63 = vadd.f32 1.0, %v1982_v55 }
 0x174   : > { %v1986_v45 = vpop.eup %1985  ;;  %2003 = vrcp.f32 %v1099_v59  ;;  %v1097_v10 = vadd.f32 1.0, %v1984_v9 }
 0x175   : > { %v1988_v0 = vpop.eup %1987  ;;  %2005 = vrcp.f32 %v1131_v63  ;;  %v1129_v46 = vadd.f32 1.0, %v1986_v45 }
 0x176   : > { %v1990_v13 = vpop.eup %1989  ;;  %2007 = vrcp.f32 %v1097_v10  ;;  %v1102_v2 = vadd.f32 1.0, %v1988_v0 }
 0x177   : > { %v1992_v50 = vpop.eup %1991  ;;  %2009 = vrcp.f32 %v1129_v46  ;;  %v1134_v3 = vadd.f32 1.0, %v1990_v13 }
 0x178   : > { %v1994_v29 = vpop.eup %1993  ;;  %2011 = vrcp.f32 %v1102_v2  ;;  %v1100_v4 = vadd.f32 1.0, %v1992_v50 }
 0x179   : > { %v1996_v6 = vpop.eup %1995  ;;  %2013 = vrcp.f32 %v1134_v3  ;;  %v1132_v34 = vadd.f32 1.0, %v1994_v29 }
 0x17a   : > { %v1998_v7 = vpop.eup %1997  ;;  %2015 = vrcp.f32 %v1100_v4  ;;  %v1103_v8 = vadd.f32 1.0, %v1996_v6 }
 0x17b   : > { %v2000_v35 = vpop.eup %1999  ;;  %2017 = vrcp.f32 %v1132_v34  ;;  %v1135_v11 = vadd.f32 1.0, %v1998_v7 }
 0x17c   : > { %v2002_v12 = vpop.eup %2001  ;;  %2019 = vrcp.f32 %v1103_v8  ;;  %v1101_v37 = vadd.f32 1.0, %v2000_v35 }
 0x17d   : > { %2021 = vrcp.f32 %v1135_v11  ;;  %v1133_v43 = vadd.f32 1.0, %v2002_v12 }
 0x17e   : > { %v2004_v54 = vpop.eup %2003  ;;  %2023 = vrcp.f32 %v1101_v37 }
 0x17f   : > { %v2006_v14 = vpop.eup %2005  ;;  %1291 = vst [vmem:[%s2225_s8 + $0xd8] sm:$0xff] %v2004_v54  ;;  %2025 = vrcp.f32 %v1133_v43 }
 0x180   : > { %v2008_v15 = vpop.eup %2007  ;;  %1323 = vst [vmem:[%s2225_s8 + $0x1d8] sm:$0xff] %v2006_v14 }
 0x181   : > { %v2010_v23 = vpop.eup %2009  ;;  %1289 = vst [vmem:[%s2225_s8 + $0xc8] sm:$0xff] %v2008_v15 }
 0x182   : > { %v2012_v24 = vpop.eup %2011  ;;  %1321 = vst [vmem:[%s2225_s8 + $0x1c8] sm:$0xff] %v2010_v23 }
 0x183   : > { %v2014_v27 = vpop.eup %2013  ;;  %1294 = vst [vmem:[%s2225_s8 + $0xf0] sm:$0xff] %v2012_v24 }
 0x184   : > { %v2016_v16 = vpop.eup %2015  ;;  %1326 = vst [vmem:[%s2225_s8 + $0x1f0] sm:$0xff] %v2014_v27 }
 0x185   : > { %v2018_v28 = vpop.eup %2017  ;;  %1292 = vst [vmem:[%s2225_s8 + $0xe0] sm:$0xff] %v2016_v16 }
 0x186   : > { %v2020_v30 = vpop.eup %2019  ;;  %1324 = vst [vmem:[%s2225_s8 + $0x1e0] sm:$0xff] %v2018_v28 }
 0x187   : > { %v2022_v31 = vpop.eup %2021  ;;  %1295 = vst [vmem:[%s2225_s8 + $0xf8] sm:$0xff] %v2020_v30 }
 0x188   : > { %v2024_v32 = vpop.eup %2023  ;;  %1327 = vst [vmem:[%s2225_s8 + $0x1f8] sm:$0xff] %v2022_v31 }
 0x189   : > { %v2026_v33 = vpop.eup %2025  ;;  %1293 = vst [vmem:[%s2225_s8 + $0xe8] sm:$0xff] %v2024_v32 }
 0x18a   : > { %1325 = vst [vmem:[%s2225_s8 + $0x1e8] sm:$0xff] %v2026_v33 }
 0x18b PF: > { %s13_s16 = sadd.s32 1, %s2065_s16   ;;  %s2473_s12 = smov %s2057_s14 }
 0x18c   : > { %p10_p7 = scmp.ge.s32.totalorder %s13_s16, 18   ;;  %s2474_s13 = smov %s2061_s15 }
 0x18d   : > { %s2475_s14 = smov %s2478_s17  ;;  %s2476_s15 = smov %s2482_s18 }
 0x18e   :  { %12 = sbr.rel (!%p10_p7) target bundleno = 3 (0x3), region = 65 }

</bundles_post_ra>
